<compile_context>
chip_gen: v5e
topology: v5e:2x2
jax: 0.10.0
libtpu: 0.0.40
codegen_flags: <defaults>
</compile_context>

<pallas_src>
import math
from functools import partial

import numpy as np
import jax
import jax.numpy as jnp
from jax.experimental import pallas as pl
from jax.experimental.pallas import tpu as pltpu

# ----- small synthetic BERT config -----
VOCAB = 64
MAX_POS = 32
TYPE_VOCAB = 2
HIDDEN = 32
NUM_LAYERS = 2
NUM_HEADS = 2
HEAD_DIM = HIDDEN // NUM_HEADS
INTERMEDIATE = 64
LN_EPS = 1e-12
MASK_BIAS = -10000.0

# ----- packed weight-slab row layout (all matrix offsets are multiples of 8) -----
W_COLS = max(HIDDEN, INTERMEDIATE)                 # 64 (lane-padded to 128 in VMEM anyway)
OFF_WORD = 0                                       # (VOCAB, H)
OFF_POS = OFF_WORD + VOCAB                         # (MAX_POS, H)
OFF_TYPE = OFF_POS + MAX_POS                       # (TYPE_VOCAB, H), padded to 8 rows
OFF_LAYER0 = OFF_TYPE + 8
ROWS_QKV = 3 * NUM_HEADS * HIDDEN                  # per-head (H, HD) blocks, row-stacked
ROWS_O = NUM_HEADS * HEAD_DIM                      # per-head (HD, H) blocks, row-stacked
PER_LAYER_ROWS = ROWS_QKV + ROWS_O + HIDDEN + INTERMEDIATE
OFF_POOL = OFF_LAYER0 + NUM_LAYERS * PER_LAYER_ROWS
W_ROWS = OFF_POOL + HIDDEN

# ----- packed bias / LayerNorm vector-slab row layout -----
VR_BQKV = 0                                        # 3*L*NH rows of HEAD_DIM-wide biases
VR_BO = VR_BQKV + 3 * NUM_LAYERS * NUM_HEADS
VR_BFF1 = VR_BO + NUM_LAYERS
VR_BFF2 = VR_BFF1 + NUM_LAYERS
VR_LNG = VR_BFF2 + NUM_LAYERS
VR_LNB = VR_LNG + (2 * NUM_LAYERS + 1)
VR_BPOOL = VR_LNB + (2 * NUM_LAYERS + 1)
VR_WCLS = VR_BPOOL + 1
VR_BCLS = VR_WCLS + 1
V_ROWS = ((VR_BCLS + 1 + 7) // 8) * 8              # pad to a multiple of 8 rows


def _layernorm(v, g, b):
    mu = jnp.mean(v, axis=-1, keepdims=True)
    var = jnp.mean(jnp.square(v - mu), axis=-1, keepdims=True)
    return (v - mu) * jax.lax.rsqrt(var + LN_EPS) * g + b


def bert_pair_kernel(ids_ref, tt_ref, mask_ref, w_ref, vec_ref, out_ref, *, tile_bn, seq):
    H, HD, NH, L, FF = HIDDEN, HEAD_DIM, NUM_HEADS, NUM_LAYERS, INTERMEDIATE
    bns = tile_bn * seq
    scale = 1.0 / math.sqrt(HD)

    def vrow(r, width):                            # one (1, width) bias / LN row
        return vec_ref[r:r + 1, :width]

    # ---------------- embeddings, built in-kernel ------------------------------------
    ids = ids_ref[...]                             # (bns, 1) int32
    tt = tt_ref[...].astype(jnp.float32)           # (bns, 1)

    # word embedding: one-hot(ids) (bns, VOCAB) @ word table (VOCAB, H) — one MXU push
    onehot = (ids == jax.lax.broadcasted_iota(jnp.int32, (bns, VOCAB), 1)).astype(jnp.float32)
    x = jnp.dot(onehot, w_ref[OFF_WORD:OFF_WORD + VOCAB, :H],
                preferred_element_type=jnp.float32)
    # position embedding: broadcast the first `seq` table rows over all sequences
    pos = w_ref[OFF_POS:OFF_POS + seq, :H]                                   # (seq, H)
    x = (x.reshape(tile_bn, seq, H) + pos[None, :, :]).reshape(bns, H)
    # token-type embedding: TYPE_VOCAB == 2 -> exact arithmetic select row0 + tt*(row1-row0)
    t0 = w_ref[OFF_TYPE:OFF_TYPE + 1, :H]
    t1 = w_ref[OFF_TYPE + 1:OFF_TYPE + 2, :H]
    x = x + t0 + tt * (t1 - t0)

    # additive attention-mask bias (tile_bn, 1, seq)
    bias = ((1.0 - mask_ref[...].astype(jnp.float32)) * MASK_BIAS)[:, None, :]

    # embedding LayerNorm
    x = _layernorm(x, vrow(VR_LNG, H), vrow(VR_LNB, H))

    for l in range(L):
        base = OFF_LAYER0 + l * PER_LAYER_ROWS

        # ---------------- self attention ----------------------------------------------
        # Per-head weights are row-stacked in the slab, so every projection output is
        # lane-aligned at 0 (no 16-lane activation slices) and the output projection is
        # the sum of per-head (HD, H) products (no head concatenate).
        attn_out = vrow(VR_BO + l, H)              # start from the output bias
        for h in range(NH):
            rq = base + (0 * NH + h) * H
            rk = base + (1 * NH + h) * H
            rv = base + (2 * NH + h) * H
            q = (jnp.dot(x, w_ref[rq:rq + H, :HD], preferred_element_type=jnp.float32)
                 + vrow(VR_BQKV + (0 * L + l) * NH + h, HD)).reshape(tile_bn, seq, HD)
            k = (jnp.dot(x, w_ref[rk:rk + H, :HD], preferred_element_type=jnp.float32)
                 + vrow(VR_BQKV + (1 * L + l) * NH + h, HD)).reshape(tile_bn, seq, HD)
            v = (jnp.dot(x, w_ref[rv:rv + H, :HD], preferred_element_type=jnp.float32)
                 + vrow(VR_BQKV + (2 * L + l) * NH + h, HD)).reshape(tile_bn, seq, HD)

            s = jnp.einsum('bqd,bkd->bqk', q, k,
                           preferred_element_type=jnp.float32) * scale + bias
            s = s - jnp.max(s, axis=-1, keepdims=True)
            p = jnp.exp(s)
            # softmax denominator on the (otherwise idle) EUP slot
            p = p * pl.reciprocal(jnp.sum(p, axis=-1, keepdims=True), approx=True)
            ctx = jnp.einsum('bqk,bkd->bqd', p, v,
                             preferred_element_type=jnp.float32).reshape(bns, HD)

            ro = base + ROWS_QKV + h * HD
            attn_out = attn_out + jnp.dot(ctx, w_ref[ro:ro + HD, :H],
                                          preferred_element_type=jnp.float32)

        x = _layernorm(x + attn_out,
                       vrow(VR_LNG + 2 * l + 1, H), vrow(VR_LNB + 2 * l + 1, H))

        # ---------------- feed forward -------------------------------------------------
        rf = base + ROWS_QKV + ROWS_O
        h1 = jnp.dot(x, w_ref[rf:rf + H, :FF],
                     preferred_element_type=jnp.float32) + vrow(VR_BFF1 + l, FF)
        h1 = jax.nn.gelu(h1, approximate=True)
        h2 = jnp.dot(h1, w_ref[rf + H:rf + H + FF, :H],
                     preferred_element_type=jnp.float32) + vrow(VR_BFF2 + l, H)
        x = _layernorm(x + h2,
                       vrow(VR_LNG + 2 * l + 2, H), vrow(VR_LNB + 2 * l + 2, H))

    # ---------------- pooler (CLS token) + classification head -----------------------
    cls = x.reshape(tile_bn, seq, H)[:, 0, :]                                 # (tile_bn, H)
    pooled = jnp.tanh(jnp.dot(cls, w_ref[OFF_POOL:OFF_POOL + H, :H],
                              preferred_element_type=jnp.float32) + vrow(VR_BPOOL, H))
    # lane-dense (1, tile_bn) logits row: W_cls (1, H) x pooled^T (transposed-rhs dot)
    logits = jnp.einsum('oh,bh->ob', vrow(VR_WCLS, H), pooled,
                        preferred_element_type=jnp.float32) + vec_ref[VR_BCLS:VR_BCLS + 1, 0:1]
    out_ref[...] = logits                                                     # (1, tile_bn)


def pack_params(params):
    """One-time host-side repack of the parameter pytree into two DMA-friendly slabs.

    Done with numpy outside the per-call path, so no weight-repack HLOs run per
    forward invocation.
    """
    H, HD, NH, L, FF = HIDDEN, HEAD_DIM, NUM_HEADS, NUM_LAYERS, INTERMEDIATE

    W = np.zeros((W_ROWS, W_COLS), np.float32)
    W[OFF_WORD:OFF_WORD + VOCAB, :H] = np.asarray(params['word_emb'])
    W[OFF_POS:OFF_POS + MAX_POS, :H] = np.asarray(params['pos_emb'])
    W[OFF_TYPE:OFF_TYPE + TYPE_VOCAB, :H] = np.asarray(params['type_emb'])
    for l in range(L):
        base = OFF_LAYER0 + l * PER_LAYER_ROWS
        for m in range(3):                          # 0:q, 1:k, 2:v
            wm = np.asarray(params['w_attn'][l, m])                   # (H, H)
            for h in range(NH):
                r = base + (m * NH + h) * H
                W[r:r + H, :HD] = wm[:, h * HD:(h + 1) * HD]
        wo = np.asarray(params['w_attn'][l, 3])                       # (H, H)
        for h in range(NH):
            r = base + ROWS_QKV + h * HD
            W[r:r + HD, :H] = wo[h * HD:(h + 1) * HD, :]
        r = base + ROWS_QKV + ROWS_O
        W[r:r + H, :FF] = np.asarray(params['w_ff1'][l])
        W[r + H:r + H + FF, :H] = np.asarray(params['w_ff2'][l])
    W[OFF_POOL:OFF_POOL + H, :H] = np.asarray(params['w_pool'])

    V = np.zeros((V_ROWS, W_COLS), np.float32)
    for m in range(3):
        for l in range(L):
            bm = np.asarray(params['b_attn'][l, m])                   # (H,)
            for h in range(NH):
                V[VR_BQKV + (m * L + l) * NH + h, :HD] = bm[h * HD:(h + 1) * HD]
    for l in range(L):
        V[VR_BO + l, :H] = np.asarray(params['b_attn'][l, 3])
        V[VR_BFF1 + l, :FF] = np.asarray(params['b_ff1'][l])
        V[VR_BFF2 + l, :H] = np.asarray(params['b_ff2'][l])
    V[VR_LNG:VR_LNG + 2 * L + 1, :H] = np.asarray(params['ln_g'])
    V[VR_LNB:VR_LNB + 2 * L + 1, :H] = np.asarray(params['ln_b'])
    V[VR_BPOOL, :H] = np.asarray(params['b_pool'])[0]
    V[VR_WCLS, :H] = np.asarray(params['w_cls'])[:, 0]
    V[VR_BCLS, 0] = np.asarray(params['b_cls'])[0, 0]

    return jnp.asarray(W), jnp.asarray(V)


def bert_pair_forward(input_ids, attention_mask, token_type_ids, w_slab, vec_slab,
                      tile_bn=None):
    batch, n_choice, seq = input_ids.shape
    bn = batch * n_choice
    if tile_bn is None:
        tile_bn = bn          # all sequences in one grid step at this size (review)
    nblk = pl.cdiv(bn, tile_bn)
    bn_pad = nblk * tile_bn
    if nblk > 1:
        assert tile_bn % 8 == 0, "multi-block configs need tile_bn % 8 == 0"

    # only free metadata reshapes / casts remain on the host side
    ids = input_ids.reshape(bn, seq).astype(jnp.int32)
    tt = token_type_ids.reshape(bn, seq).astype(jnp.int32)
    am = attention_mask.reshape(bn, seq).astype(jnp.int32)
    if bn_pad != bn:
        # Padded rows: ids/tt = 0, mask = 1 (benign garbage rows, sliced off below).
        # Do NOT pad with an all-zero mask: a fully -1e4-biased row would still be
        # fine here, but an -inf-style "fix" would create NaNs in the padded rows.
        ids = jnp.pad(ids, ((0, bn_pad - bn), (0, 0)))
        tt = jnp.pad(tt, ((0, bn_pad - bn), (0, 0)))
        am = jnp.pad(am, ((0, bn_pad - bn), (0, 0)), constant_values=1)

    ids_flat = ids.reshape(bn_pad * seq, 1)
    tt_flat = tt.reshape(bn_pad * seq, 1)

    kernel = partial(bert_pair_kernel, tile_bn=tile_bn, seq=seq)

    out = pl.pallas_call(
        kernel,
        out_shape=jax.ShapeDtypeStruct((nblk, tile_bn), jnp.float32),
        grid_spec=pltpu.PrefetchScalarGridSpec(
            num_scalar_prefetch=0,
            grid=(nblk,),
            in_specs=[
                pl.BlockSpec((tile_bn * seq, 1), lambda i: (i, 0)),   # token ids
                pl.BlockSpec((tile_bn * seq, 1), lambda i: (i, 0)),   # token-type ids
                pl.BlockSpec((tile_bn, seq), lambda i: (i, 0)),       # attention mask
                pl.BlockSpec((W_ROWS, W_COLS), lambda i: (0, 0)),     # all matmul weights
                pl.BlockSpec((V_ROWS, W_COLS), lambda i: (0, 0)),     # all bias / LN vectors
            ],
            out_specs=pl.BlockSpec((1, tile_bn), lambda i: (i, 0)),   # lane-dense logits row
        ),
        compiler_params=pltpu.CompilerParams(dimension_semantics=("parallel",)),
    )(ids_flat, tt_flat, am, w_slab, vec_slab)

    return out.reshape(bn_pad)[:bn].reshape(batch, n_choice)


# ----------------------------- pure-JAX reference ------------------------------------
def bert_pair_reference(input_ids, attention_mask, token_type_ids, params):
    batch, n_choice, seq = input_ids.shape
    bn = batch * n_choice
    ids = input_ids.reshape(bn, seq)
    am = attention_mask.reshape(bn, seq).astype(jnp.float32)
    tt = token_type_ids.reshape(bn, seq)
    x = params['word_emb'][ids] + params['pos_emb'][:seq][None] + params['type_emb'][tt]
    bias = ((1.0 - am) * MASK_BIAS)[:, None, :]

    def ln(v, g, b):
        mu = v.mean(-1, keepdims=True)
        var = ((v - mu) ** 2).mean(-1, keepdims=True)
        return (v - mu) * jax.lax.rsqrt(var + LN_EPS) * g + b

    x = ln(x, params['ln_g'][0], params['ln_b'][0])
    scale = 1.0 / math.sqrt(HEAD_DIM)
    for l in range(NUM_LAYERS):
        q = x @ params['w_attn'][l, 0] + params['b_attn'][l, 0]
        k = x @ params['w_attn'][l, 1] + params['b_attn'][l, 1]
        v = x @ params['w_attn'][l, 2] + params['b_attn'][l, 2]
        q = q.reshape(bn, seq, NUM_HEADS, HEAD_DIM).transpose(0, 2, 1, 3)
        k = k.reshape(bn, seq, NUM_HEADS, HEAD_DIM).transpose(0, 2, 1, 3)
        v = v.reshape(bn, seq, NUM_HEADS, HEAD_DIM).transpose(0, 2, 1, 3)
        s = jnp.einsum('bhqd,bhkd->bhqk', q, k) * scale + bias[:, None, :, :]
        p = jax.nn.softmax(s, axis=-1)
        ctx = jnp.einsum('bhqk,bhkd->bhqd', p, v).transpose(0, 2, 1, 3).reshape(bn, seq, HIDDEN)
        attn_out = ctx @ params['w_attn'][l, 3] + params['b_attn'][l, 3]
        x = ln(x + attn_out, params['ln_g'][2 * l + 1], params['ln_b'][2 * l + 1])
        h1 = jax.nn.gelu(x @ params['w_ff1'][l] + params['b_ff1'][l], approximate=True)
        h2 = h1 @ params['w_ff2'][l] + params['b_ff2'][l]
        x = ln(x + h2, params['ln_g'][2 * l + 2], params['ln_b'][2 * l + 2])
    cls = x[:, 0, :]
    pooled = jnp.tanh(cls @ params['w_pool'] + params['b_pool'][0])
    logit = pooled @ params['w_cls'][:, 0] + params['b_cls'][0, 0]
    return logit.reshape(batch, n_choice)


def init_params(key):
    keys = jax.random.split(key, 13)
    std = 0.02
    p = {
        'word_emb': jax.random.normal(keys[0], (VOCAB, HIDDEN), jnp.float32) * std,
        'pos_emb': jax.random.normal(keys[1], (MAX_POS, HIDDEN), jnp.float32) * std,
        'type_emb': jax.random.normal(keys[2], (TYPE_VOCAB, HIDDEN), jnp.float32) * std,
        'w_attn': jax.random.normal(keys[3], (NUM_LAYERS, 4, HIDDEN, HIDDEN), jnp.float32) * std,
        'b_attn': jax.random.normal(keys[4], (NUM_LAYERS, 4, HIDDEN), jnp.float32) * std,
        'ln_g': jnp.ones((2 * NUM_LAYERS + 1, HIDDEN), jnp.float32),
        'ln_b': jnp.zeros((2 * NUM_LAYERS + 1, HIDDEN), jnp.float32),
        'w_ff1': jax.random.normal(keys[5], (NUM_LAYERS, HIDDEN, INTERMEDIATE), jnp.float32) * std,
        'b_ff1': jax.random.normal(keys[6], (NUM_LAYERS, INTERMEDIATE), jnp.float32) * std,
        'w_ff2': jax.random.normal(keys[7], (NUM_LAYERS, INTERMEDIATE, HIDDEN), jnp.float32) * std,
        'b_ff2': jax.random.normal(keys[8], (NUM_LAYERS, HIDDEN), jnp.float32) * std,
        'w_pool': jax.random.normal(keys[9], (HIDDEN, HIDDEN), jnp.float32) * std,
        'b_pool': jax.random.normal(keys[10], (1, HIDDEN), jnp.float32) * std,
        'w_cls': jax.random.normal(keys[11], (HIDDEN, 1), jnp.float32) * std,
        'b_cls': jax.random.normal(keys[12], (1, 1), jnp.float32) * std,
    }
    return p


if __name__ == "__main__":
    key = jax.random.PRNGKey(0)
    kp, kid, ktt, klen = jax.random.split(key, 4)
    params = init_params(kp)
    # one-time weight repack (outside the per-call path)
    w_slab, vec_slab = pack_params(params)

    batch, n_choice, seq = 2, 2, 8
    input_ids = jax.random.randint(kid, (batch, n_choice, seq), 0, VOCAB, dtype=jnp.int32)
    token_type_ids = jax.random.randint(ktt, (batch, n_choice, seq), 0, TYPE_VOCAB, dtype=jnp.int32)
    lengths = jax.random.randint(klen, (batch, n_choice), 4, seq + 1)
    attention_mask = (jnp.arange(seq)[None, None, :] < lengths[..., None]).astype(jnp.int32)

    # jit with the packed slabs closed over, so only the tiny metadata reshapes
    # surround the single pallas_call.
    fwd = jax.jit(lambda i, a, t: bert_pair_forward(i, a, t, w_slab, vec_slab))

    out = jax.block_until_ready(fwd(input_ids, attention_mask, token_type_ids))
    ref = jax.block_until_ready(
        bert_pair_reference(input_ids, attention_mask, token_type_ids, params))

    assert out.shape == (batch, n_choice)
    # tolerance slightly above 1e-4: pl.reciprocal(approx=True) in the softmax and
    # f32 re-association from the fused/packed layout introduce ~1e-5-level noise.
    np.testing.assert_allclose(np.asarray(out), np.asarray(ref), atol=2e-4, rtol=2e-4)
    print("KERNEL_OK")
</pallas_src>

<mosaic_0001>
module attributes {stable_mosaic.version = 11 : i64} {
  func.func @bert_pair_kernel(%arg0: i32, %arg1: memref<32x1xi32, #tpu.memory_space<vmem>>, %arg2: memref<32x1xi32, #tpu.memory_space<vmem>>, %arg3: memref<4x8xi32, #tpu.memory_space<vmem>>, %arg4: memref<776x64xf32, #tpu.memory_space<vmem>>, %arg5: memref<32x64xf32, #tpu.memory_space<vmem>>, %arg6: memref<1x4xf32, #tpu.memory_space<vmem>>) attributes {dimension_semantics = [#tpu.dimension_semantics<parallel>], iteration_bounds = array<i64: 1>, scalar_prefetch = 0 : i64, scratch_operands = 0 : i64, tpu.core_type = #tpu.core_type<tc>, window_params = [{transform_indices = @transform_0, window_bounds = array<i64: 32, 1>}, {transform_indices = @transform_1, window_bounds = array<i64: 32, 1>}, {transform_indices = @transform_2, window_bounds = array<i64: 4, 8>}, {pipeline_mode = #tpu.pipeline_mode<synchronous>, transform_indices = @transform_3, window_bounds = array<i64: 776, 64>}, {pipeline_mode = #tpu.pipeline_mode<synchronous>, transform_indices = @transform_4, window_bounds = array<i64: 32, 64>}, {transform_indices = @transform_5, window_bounds = array<i64: 1, 4>}]} {
    %c0 = arith.constant 0 : index
    %c0_0 = arith.constant 0 : index
    %0 = vector.load %arg1[%c0, %c0_0] : memref<32x1xi32, #tpu.memory_space<vmem>>, vector<32x1xi32>
    %c0_1 = arith.constant 0 : index
    %c0_2 = arith.constant 0 : index
    %1 = vector.load %arg2[%c0_1, %c0_2] : memref<32x1xi32, #tpu.memory_space<vmem>>, vector<32x1xi32>
    %2 = arith.sitofp %1 : vector<32x1xi32> to vector<32x1xf32>
    %3 = tpu.iota {dimensions = array<i32: 1>} : vector<32x64xi32>
    %4 = vector.broadcast %0 : vector<32x1xi32> to vector<32x64xi32>
    %5 = arith.cmpi eq, %4, %3 : vector<32x64xi32>
    %6 = arith.extui %5 : vector<32x64xi1> to vector<32x64xi32>
    %7 = arith.sitofp %6 : vector<32x64xi32> to vector<32x64xf32>
    %c0_3 = arith.constant 0 : index
    %c0_4 = arith.constant 0 : index
    %8 = vector.load %arg4[%c0_3, %c0_4] : memref<776x64xf32, #tpu.memory_space<vmem>>, vector<64x32xf32>
    %cst = arith.constant dense<0.000000e+00> : vector<32x32xf32>
    %9 = tpu.matmul %7, %8, %cst {dimension_numbers = #tpu.dot_dimension_numbers<[1], [0], [0], [1], [0, 0, 1, 1], [], []>} : vector<32x64xf32>, vector<64x32xf32>, vector<32x32xf32> -> vector<32x32xf32>
    %c64 = arith.constant 64 : index
    %c0_5 = arith.constant 0 : index
    %10 = vector.load %arg4[%c64, %c0_5] : memref<776x64xf32, #tpu.memory_space<vmem>>, vector<8x32xf32>
    %11 = vector.shape_cast %9 : vector<32x32xf32> to vector<4x8x32xf32>
    %12 = vector.shape_cast %10 : vector<8x32xf32> to vector<1x8x32xf32>
    %13 = vector.broadcast %12 : vector<1x8x32xf32> to vector<4x8x32xf32>
    %14 = arith.addf %11, %13 : vector<4x8x32xf32>
    %15 = vector.shape_cast %14 : vector<4x8x32xf32> to vector<32x32xf32>
    %c96 = arith.constant 96 : index
    %c0_6 = arith.constant 0 : index
    %16 = vector.load %arg4[%c96, %c0_6] : memref<776x64xf32, #tpu.memory_space<vmem>>, vector<1x32xf32>
    %c97 = arith.constant 97 : index
    %c0_7 = arith.constant 0 : index
    %17 = vector.load %arg4[%c97, %c0_7] : memref<776x64xf32, #tpu.memory_space<vmem>>, vector<1x32xf32>
    %18 = vector.broadcast %16 : vector<1x32xf32> to vector<32x32xf32>
    %19 = arith.addf %15, %18 : vector<32x32xf32>
    %20 = arith.subf %17, %16 : vector<1x32xf32>
    %21 = vector.broadcast %2 : vector<32x1xf32> to vector<32x32xf32>
    %22 = vector.broadcast %20 : vector<1x32xf32> to vector<32x32xf32>
    %23 = arith.mulf %21, %22 : vector<32x32xf32>
    %24 = arith.addf %19, %23 : vector<32x32xf32>
    %c0_8 = arith.constant 0 : index
    %c0_9 = arith.constant 0 : index
    %25 = vector.load %arg3[%c0_8, %c0_9] : memref<4x8xi32, #tpu.memory_space<vmem>>, vector<4x8xi32>
    %26 = arith.sitofp %25 : vector<4x8xi32> to vector<4x8xf32>
    %cst_10 = arith.constant 1.000000e+00 : f32
    %27 = vector.broadcast %cst_10 : f32 to vector<4x8xf32>
    %28 = arith.subf %27, %26 : vector<4x8xf32>
    %cst_11 = arith.constant -1.000000e+04 : f32
    %29 = vector.broadcast %cst_11 : f32 to vector<4x8xf32>
    %30 = arith.mulf %28, %29 : vector<4x8xf32>
    %31 = vector.shape_cast %30 : vector<4x8xf32> to vector<4x1x8xf32>
    %c18 = arith.constant 18 : index
    %c0_12 = arith.constant 0 : index
    %32 = vector.load %arg5[%c18, %c0_12] : memref<32x64xf32, #tpu.memory_space<vmem>>, vector<1x32xf32>
    %c23 = arith.constant 23 : index
    %c0_13 = arith.constant 0 : index
    %33 = vector.load %arg5[%c23, %c0_13] : memref<32x64xf32, #tpu.memory_space<vmem>>, vector<1x32xf32>
    %cst_14 = arith.constant dense<0.000000e+00> : vector<32xf32>
    %34 = vector.multi_reduction <add>, %24, %cst_14 [1] : vector<32x32xf32> to vector<32xf32>
    %35 = vector.shape_cast %34 : vector<32xf32> to vector<32x1xf32>
    %cst_15 = arith.constant 3.200000e+01 : f32
    %36 = vector.broadcast %cst_15 : f32 to vector<32x1xf32>
    %37 = arith.divf %35, %36 : vector<32x1xf32>
    %38 = vector.broadcast %37 : vector<32x1xf32> to vector<32x32xf32>
    %39 = arith.subf %24, %38 : vector<32x32xf32>
    %40 = arith.mulf %39, %39 : vector<32x32xf32>
    %cst_16 = arith.constant dense<0.000000e+00> : vector<32xf32>
    %41 = vector.multi_reduction <add>, %40, %cst_16 [1] : vector<32x32xf32> to vector<32xf32>
    %42 = vector.shape_cast %41 : vector<32xf32> to vector<32x1xf32>
    %cst_17 = arith.constant 3.200000e+01 : f32
    %43 = vector.broadcast %cst_17 : f32 to vector<32x1xf32>
    %44 = arith.divf %42, %43 : vector<32x1xf32>
    %45 = vector.broadcast %37 : vector<32x1xf32> to vector<32x32xf32>
    %46 = arith.subf %24, %45 : vector<32x32xf32>
    %cst_18 = arith.constant 9.99999996E-13 : f32
    %47 = vector.broadcast %cst_18 : f32 to vector<32x1xf32>
    %48 = arith.addf %44, %47 : vector<32x1xf32>
    %49 = math.rsqrt %48 : vector<32x1xf32>
    %50 = vector.broadcast %49 : vector<32x1xf32> to vector<32x32xf32>
    %51 = arith.mulf %46, %50 : vector<32x32xf32>
    %52 = vector.broadcast %32 : vector<1x32xf32> to vector<32x32xf32>
    %53 = arith.mulf %51, %52 : vector<32x32xf32>
    %54 = vector.broadcast %33 : vector<1x32xf32> to vector<32x32xf32>
    %55 = arith.addf %53, %54 : vector<32x32xf32>
    %c12 = arith.constant 12 : index
    %c0_19 = arith.constant 0 : index
    %56 = vector.load %arg5[%c12, %c0_19] : memref<32x64xf32, #tpu.memory_space<vmem>>, vector<1x32xf32>
    %c104 = arith.constant 104 : index
    %c0_20 = arith.constant 0 : index
    %57 = vector.load %arg4[%c104, %c0_20] : memref<776x64xf32, #tpu.memory_space<vmem>>, vector<32x16xf32>
    %cst_21 = arith.constant dense<0.000000e+00> : vector<32x16xf32>
    %58 = tpu.matmul %55, %57, %cst_21 {dimension_numbers = #tpu.dot_dimension_numbers<[1], [0], [0], [1], [0, 0, 1, 1], [], []>} : vector<32x32xf32>, vector<32x16xf32>, vector<32x16xf32> -> vector<32x16xf32>
    %c0_22 = arith.constant 0 : index
    %c0_23 = arith.constant 0 : index
    %59 = vector.load %arg5[%c0_22, %c0_23] : memref<32x64xf32, #tpu.memory_space<vmem>>, vector<1x16xf32>
    %60 = vector.broadcast %59 : vector<1x16xf32> to vector<32x16xf32>
    %61 = arith.addf %58, %60 : vector<32x16xf32>
    %62 = vector.shape_cast %61 : vector<32x16xf32> to vector<4x8x16xf32>
    %c168 = arith.constant 168 : index
    %c0_24 = arith.constant 0 : index
    %63 = vector.load %arg4[%c168, %c0_24] : memref<776x64xf32, #tpu.memory_space<vmem>>, vector<32x16xf32>
    %cst_25 = arith.constant dense<0.000000e+00> : vector<32x16xf32>
    %64 = tpu.matmul %55, %63, %cst_25 {dimension_numbers = #tpu.dot_dimension_numbers<[1], [0], [0], [1], [0, 0, 1, 1], [], []>} : vector<32x32xf32>, vector<32x16xf32>, vector<32x16xf32> -> vector<32x16xf32>
    %c4 = arith.constant 4 : index
    %c0_26 = arith.constant 0 : index
    %65 = vector.load %arg5[%c4, %c0_26] : memref<32x64xf32, #tpu.memory_space<vmem>>, vector<1x16xf32>
    %66 = vector.broadcast %65 : vector<1x16xf32> to vector<32x16xf32>
    %67 = arith.addf %64, %66 : vector<32x16xf32>
    %68 = vector.shape_cast %67 : vector<32x16xf32> to vector<4x8x16xf32>
    %c232 = arith.constant 232 : index
    %c0_27 = arith.constant 0 : index
    %69 = vector.load %arg4[%c232, %c0_27] : memref<776x64xf32, #tpu.memory_space<vmem>>, vector<32x16xf32>
    %cst_28 = arith.constant dense<0.000000e+00> : vector<32x16xf32>
    %70 = tpu.matmul %55, %69, %cst_28 {dimension_numbers = #tpu.dot_dimension_numbers<[1], [0], [0], [1], [0, 0, 1, 1], [], []>} : vector<32x32xf32>, vector<32x16xf32>, vector<32x16xf32> -> vector<32x16xf32>
    %c8 = arith.constant 8 : index
    %c0_29 = arith.constant 0 : index
    %71 = vector.load %arg5[%c8, %c0_29] : memref<32x64xf32, #tpu.memory_space<vmem>>, vector<1x16xf32>
    %72 = vector.broadcast %71 : vector<1x16xf32> to vector<32x16xf32>
    %73 = arith.addf %70, %72 : vector<32x16xf32>
    %74 = vector.shape_cast %73 : vector<32x16xf32> to vector<4x8x16xf32>
    "tpu.trace_start"() <{level = 10 : i32, message = "bqd,bkd->bqk"}> : () -> ()
    %cst_30 = arith.constant dense<0.000000e+00> : vector<4x8x8xf32>
    %75 = tpu.matmul %62, %68, %cst_30 {dimension_numbers = #tpu.dot_dimension_numbers<[2], [2], [1], [1], [0, 0, 0, 1, 1, 1], [0], [0]>} : vector<4x8x16xf32>, vector<4x8x16xf32>, vector<4x8x8xf32> -> vector<4x8x8xf32>
    "tpu.trace_stop"() : () -> ()
    %cst_31 = arith.constant 2.500000e-01 : f32
    %76 = vector.broadcast %cst_31 : f32 to vector<4x8x8xf32>
    %77 = arith.mulf %75, %76 : vector<4x8x8xf32>
    %78 = vector.broadcast %31 : vector<4x1x8xf32> to vector<4x8x8xf32>
    %79 = arith.addf %77, %78 : vector<4x8x8xf32>
    %cst_32 = arith.constant dense<0xFF800000> : vector<4x8xf32>
    %80 = vector.multi_reduction <maximumf>, %79, %cst_32 [2] : vector<4x8x8xf32> to vector<4x8xf32>
    %81 = vector.shape_cast %80 : vector<4x8xf32> to vector<4x8x1xf32>
    %82 = vector.broadcast %81 : vector<4x8x1xf32> to vector<4x8x8xf32>
    %83 = arith.subf %79, %82 : vector<4x8x8xf32>
    %84 = math.exp %83 : vector<4x8x8xf32>
    %cst_33 = arith.constant dense<0.000000e+00> : vector<4x8xf32>
    %85 = vector.multi_reduction <add>, %84, %cst_33 [2] : vector<4x8x8xf32> to vector<4x8xf32>
    %86 = vector.shape_cast %85 : vector<4x8xf32> to vector<4x8x1xf32>
    %87 = tpu.reciprocal %86 {approx = true} : vector<4x8x1xf32> -> vector<4x8x1xf32>
    %88 = vector.broadcast %87 : vector<4x8x1xf32> to vector<4x8x8xf32>
    %89 = arith.mulf %84, %88 : vector<4x8x8xf32>
    "tpu.trace_start"() <{level = 10 : i32, message = "bqk,bkd->bqd"}> : () -> ()
    %cst_34 = arith.constant dense<0.000000e+00> : vector<4x8x16xf32>
    %90 = tpu.matmul %89, %74, %cst_34 {dimension_numbers = #tpu.dot_dimension_numbers<[2], [1], [1], [2], [0, 0, 0, 1, 1, 2], [0], [0]>} : vector<4x8x8xf32>, vector<4x8x16xf32>, vector<4x8x16xf32> -> vector<4x8x16xf32>
    "tpu.trace_stop"() : () -> ()
    %91 = vector.shape_cast %90 : vector<4x8x16xf32> to vector<32x16xf32>
    %c296 = arith.constant 296 : index
    %c0_35 = arith.constant 0 : index
    %92 = vector.load %arg4[%c296, %c0_35] : memref<776x64xf32, #tpu.memory_space<vmem>>, vector<16x32xf32>
    %cst_36 = arith.constant dense<0.000000e+00> : vector<32x32xf32>
    %93 = tpu.matmul %91, %92, %cst_36 {dimension_numbers = #tpu.dot_dimension_numbers<[1], [0], [0], [1], [0, 0, 1, 1], [], []>} : vector<32x16xf32>, vector<16x32xf32>, vector<32x32xf32> -> vector<32x32xf32>
    %94 = vector.broadcast %56 : vector<1x32xf32> to vector<32x32xf32>
    %95 = arith.addf %94, %93 : vector<32x32xf32>
    %c136 = arith.constant 136 : index
    %c0_37 = arith.constant 0 : index
    %96 = vector.load %arg4[%c136, %c0_37] : memref<776x64xf32, #tpu.memory_space<vmem>>, vector<32x16xf32>
    %cst_38 = arith.constant dense<0.000000e+00> : vector<32x16xf32>
    %97 = tpu.matmul %55, %96, %cst_38 {dimension_numbers = #tpu.dot_dimension_numbers<[1], [0], [0], [1], [0, 0, 1, 1], [], []>} : vector<32x32xf32>, vector<32x16xf32>, vector<32x16xf32> -> vector<32x16xf32>
    %c1 = arith.constant 1 : index
    %c0_39 = arith.constant 0 : index
    %98 = vector.load %arg5[%c1, %c0_39] : memref<32x64xf32, #tpu.memory_space<vmem>>, vector<1x16xf32>
    %99 = vector.broadcast %98 : vector<1x16xf32> to vector<32x16xf32>
    %100 = arith.addf %97, %99 : vector<32x16xf32>
    %101 = vector.shape_cast %100 : vector<32x16xf32> to vector<4x8x16xf32>
    %c200 = arith.constant 200 : index
    %c0_40 = arith.constant 0 : index
    %102 = vector.load %arg4[%c200, %c0_40] : memref<776x64xf32, #tpu.memory_space<vmem>>, vector<32x16xf32>
    %cst_41 = arith.constant dense<0.000000e+00> : vector<32x16xf32>
    %103 = tpu.matmul %55, %102, %cst_41 {dimension_numbers = #tpu.dot_dimension_numbers<[1], [0], [0], [1], [0, 0, 1, 1], [], []>} : vector<32x32xf32>, vector<32x16xf32>, vector<32x16xf32> -> vector<32x16xf32>
    %c5 = arith.constant 5 : index
    %c0_42 = arith.constant 0 : index
    %104 = vector.load %arg5[%c5, %c0_42] : memref<32x64xf32, #tpu.memory_space<vmem>>, vector<1x16xf32>
    %105 = vector.broadcast %104 : vector<1x16xf32> to vector<32x16xf32>
    %106 = arith.addf %103, %105 : vector<32x16xf32>
    %107 = vector.shape_cast %106 : vector<32x16xf32> to vector<4x8x16xf32>
    %c264 = arith.constant 264 : index
    %c0_43 = arith.constant 0 : index
    %108 = vector.load %arg4[%c264, %c0_43] : memref<776x64xf32, #tpu.memory_space<vmem>>, vector<32x16xf32>
    %cst_44 = arith.constant dense<0.000000e+00> : vector<32x16xf32>
    %109 = tpu.matmul %55, %108, %cst_44 {dimension_numbers = #tpu.dot_dimension_numbers<[1], [0], [0], [1], [0, 0, 1, 1], [], []>} : vector<32x32xf32>, vector<32x16xf32>, vector<32x16xf32> -> vector<32x16xf32>
    %c9 = arith.constant 9 : index
    %c0_45 = arith.constant 0 : index
    %110 = vector.load %arg5[%c9, %c0_45] : memref<32x64xf32, #tpu.memory_space<vmem>>, vector<1x16xf32>
    %111 = vector.broadcast %110 : vector<1x16xf32> to vector<32x16xf32>
    %112 = arith.addf %109, %111 : vector<32x16xf32>
    %113 = vector.shape_cast %112 : vector<32x16xf32> to vector<4x8x16xf32>
    "tpu.trace_start"() <{level = 10 : i32, message = "bqd,bkd->bqk"}> : () -> ()
    %cst_46 = arith.constant dense<0.000000e+00> : vector<4x8x8xf32>
    %114 = tpu.matmul %101, %107, %cst_46 {dimension_numbers = #tpu.dot_dimension_numbers<[2], [2], [1], [1], [0, 0, 0, 1, 1, 1], [0], [0]>} : vector<4x8x16xf32>, vector<4x8x16xf32>, vector<4x8x8xf32> -> vector<4x8x8xf32>
    "tpu.trace_stop"() : () -> ()
    %cst_47 = arith.constant 2.500000e-01 : f32
    %115 = vector.broadcast %cst_47 : f32 to vector<4x8x8xf32>
    %116 = arith.mulf %114, %115 : vector<4x8x8xf32>
    %117 = vector.broadcast %31 : vector<4x1x8xf32> to vector<4x8x8xf32>
    %118 = arith.addf %116, %117 : vector<4x8x8xf32>
    %cst_48 = arith.constant dense<0xFF800000> : vector<4x8xf32>
    %119 = vector.multi_reduction <maximumf>, %118, %cst_48 [2] : vector<4x8x8xf32> to vector<4x8xf32>
    %120 = vector.shape_cast %119 : vector<4x8xf32> to vector<4x8x1xf32>
    %121 = vector.broadcast %120 : vector<4x8x1xf32> to vector<4x8x8xf32>
    %122 = arith.subf %118, %121 : vector<4x8x8xf32>
    %123 = math.exp %122 : vector<4x8x8xf32>
    %cst_49 = arith.constant dense<0.000000e+00> : vector<4x8xf32>
    %124 = vector.multi_reduction <add>, %123, %cst_49 [2] : vector<4x8x8xf32> to vector<4x8xf32>
    %125 = vector.shape_cast %124 : vector<4x8xf32> to vector<4x8x1xf32>
    %126 = tpu.reciprocal %125 {approx = true} : vector<4x8x1xf32> -> vector<4x8x1xf32>
    %127 = vector.broadcast %126 : vector<4x8x1xf32> to vector<4x8x8xf32>
    %128 = arith.mulf %123, %127 : vector<4x8x8xf32>
    "tpu.trace_start"() <{level = 10 : i32, message = "bqk,bkd->bqd"}> : () -> ()
    %cst_50 = arith.constant dense<0.000000e+00> : vector<4x8x16xf32>
    %129 = tpu.matmul %128, %113, %cst_50 {dimension_numbers = #tpu.dot_dimension_numbers<[2], [1], [1], [2], [0, 0, 0, 1, 1, 2], [0], [0]>} : vector<4x8x8xf32>, vector<4x8x16xf32>, vector<4x8x16xf32> -> vector<4x8x16xf32>
    "tpu.trace_stop"() : () -> ()
    %130 = vector.shape_cast %129 : vector<4x8x16xf32> to vector<32x16xf32>
    %c312 = arith.constant 312 : index
    %c0_51 = arith.constant 0 : index
    %131 = vector.load %arg4[%c312, %c0_51] : memref<776x64xf32, #tpu.memory_space<vmem>>, vector<16x32xf32>
    %cst_52 = arith.constant dense<0.000000e+00> : vector<32x32xf32>
    %132 = tpu.matmul %130, %131, %cst_52 {dimension_numbers = #tpu.dot_dimension_numbers<[1], [0], [0], [1], [0, 0, 1, 1], [], []>} : vector<32x16xf32>, vector<16x32xf32>, vector<32x32xf32> -> vector<32x32xf32>
    %133 = arith.addf %95, %132 : vector<32x32xf32>
    %134 = arith.addf %55, %133 : vector<32x32xf32>
    %c19 = arith.constant 19 : index
    %c0_53 = arith.constant 0 : index
    %135 = vector.load %arg5[%c19, %c0_53] : memref<32x64xf32, #tpu.memory_space<vmem>>, vector<1x32xf32>
    %c24 = arith.constant 24 : index
    %c0_54 = arith.constant 0 : index
    %136 = vector.load %arg5[%c24, %c0_54] : memref<32x64xf32, #tpu.memory_space<vmem>>, vector<1x32xf32>
    %cst_55 = arith.constant dense<0.000000e+00> : vector<32xf32>
    %137 = vector.multi_reduction <add>, %134, %cst_55 [1] : vector<32x32xf32> to vector<32xf32>
    %138 = vector.shape_cast %137 : vector<32xf32> to vector<32x1xf32>
    %cst_56 = arith.constant 3.200000e+01 : f32
    %139 = vector.broadcast %cst_56 : f32 to vector<32x1xf32>
    %140 = arith.divf %138, %139 : vector<32x1xf32>
    %141 = vector.broadcast %140 : vector<32x1xf32> to vector<32x32xf32>
    %142 = arith.subf %134, %141 : vector<32x32xf32>
    %143 = arith.mulf %142, %142 : vector<32x32xf32>
    %cst_57 = arith.constant dense<0.000000e+00> : vector<32xf32>
    %144 = vector.multi_reduction <add>, %143, %cst_57 [1] : vector<32x32xf32> to vector<32xf32>
    %145 = vector.shape_cast %144 : vector<32xf32> to vector<32x1xf32>
    %cst_58 = arith.constant 3.200000e+01 : f32
    %146 = vector.broadcast %cst_58 : f32 to vector<32x1xf32>
    %147 = arith.divf %145, %146 : vector<32x1xf32>
    %148 = vector.broadcast %140 : vector<32x1xf32> to vector<32x32xf32>
    %149 = arith.subf %134, %148 : vector<32x32xf32>
    %cst_59 = arith.constant 9.99999996E-13 : f32
    %150 = vector.broadcast %cst_59 : f32 to vector<32x1xf32>
    %151 = arith.addf %147, %150 : vector<32x1xf32>
    %152 = math.rsqrt %151 : vector<32x1xf32>
    %153 = vector.broadcast %152 : vector<32x1xf32> to vector<32x32xf32>
    %154 = arith.mulf %149, %153 : vector<32x32xf32>
    %155 = vector.broadcast %135 : vector<1x32xf32> to vector<32x32xf32>
    %156 = arith.mulf %154, %155 : vector<32x32xf32>
    %157 = vector.broadcast %136 : vector<1x32xf32> to vector<32x32xf32>
    %158 = arith.addf %156, %157 : vector<32x32xf32>
    %c328 = arith.constant 328 : index
    %c0_60 = arith.constant 0 : index
    %159 = vector.load %arg4[%c328, %c0_60] : memref<776x64xf32, #tpu.memory_space<vmem>>, vector<32x64xf32>
    %cst_61 = arith.constant dense<0.000000e+00> : vector<32x64xf32>
    %160 = tpu.matmul %158, %159, %cst_61 {dimension_numbers = #tpu.dot_dimension_numbers<[1], [0], [0], [1], [0, 0, 1, 1], [], []>} : vector<32x32xf32>, vector<32x64xf32>, vector<32x64xf32> -> vector<32x64xf32>
    %c14 = arith.constant 14 : index
    %c0_62 = arith.constant 0 : index
    %161 = vector.load %arg5[%c14, %c0_62] : memref<32x64xf32, #tpu.memory_space<vmem>>, vector<1x64xf32>
    %162 = vector.broadcast %161 : vector<1x64xf32> to vector<32x64xf32>
    %163 = arith.addf %160, %162 : vector<32x64xf32>
    %164 = arith.mulf %163, %163 : vector<32x64xf32>
    %165 = arith.mulf %163, %164 : vector<32x64xf32>
    %cst_63 = arith.constant 4.471500e-02 : f32
    %166 = vector.broadcast %cst_63 : f32 to vector<32x64xf32>
    %167 = arith.mulf %166, %165 : vector<32x64xf32>
    %168 = arith.addf %163, %167 : vector<32x64xf32>
    %cst_64 = arith.constant 0.797884583 : f32
    %169 = vector.broadcast %cst_64 : f32 to vector<32x64xf32>
    %170 = arith.mulf %169, %168 : vector<32x64xf32>
    %171 = math.tanh %170 : vector<32x64xf32>
    %cst_65 = arith.constant 1.000000e+00 : f32
    %172 = vector.broadcast %cst_65 : f32 to vector<32x64xf32>
    %173 = arith.addf %172, %171 : vector<32x64xf32>
    %cst_66 = arith.constant 5.000000e-01 : f32
    %174 = vector.broadcast %cst_66 : f32 to vector<32x64xf32>
    %175 = arith.mulf %174, %173 : vector<32x64xf32>
    %176 = arith.mulf %163, %175 : vector<32x64xf32>
    %c360 = arith.constant 360 : index
    %c0_67 = arith.constant 0 : index
    %177 = vector.load %arg4[%c360, %c0_67] : memref<776x64xf32, #tpu.memory_space<vmem>>, vector<64x32xf32>
    %cst_68 = arith.constant dense<0.000000e+00> : vector<32x32xf32>
    %178 = tpu.matmul %176, %177, %cst_68 {dimension_numbers = #tpu.dot_dimension_numbers<[1], [0], [0], [1], [0, 0, 1, 1], [], []>} : vector<32x64xf32>, vector<64x32xf32>, vector<32x32xf32> -> vector<32x32xf32>
    %c16 = arith.constant 16 : index
    %c0_69 = arith.constant 0 : index
    %179 = vector.load %arg5[%c16, %c0_69] : memref<32x64xf32, #tpu.memory_space<vmem>>, vector<1x32xf32>
    %180 = vector.broadcast %179 : vector<1x32xf32> to vector<32x32xf32>
    %181 = arith.addf %178, %180 : vector<32x32xf32>
    %182 = arith.addf %158, %181 : vector<32x32xf32>
    %c20 = arith.constant 20 : index
    %c0_70 = arith.constant 0 : index
    %183 = vector.load %arg5[%c20, %c0_70] : memref<32x64xf32, #tpu.memory_space<vmem>>, vector<1x32xf32>
    %c25 = arith.constant 25 : index
    %c0_71 = arith.constant 0 : index
    %184 = vector.load %arg5[%c25, %c0_71] : memref<32x64xf32, #tpu.memory_space<vmem>>, vector<1x32xf32>
    %cst_72 = arith.constant dense<0.000000e+00> : vector<32xf32>
    %185 = vector.multi_reduction <add>, %182, %cst_72 [1] : vector<32x32xf32> to vector<32xf32>
    %186 = vector.shape_cast %185 : vector<32xf32> to vector<32x1xf32>
    %cst_73 = arith.constant 3.200000e+01 : f32
    %187 = vector.broadcast %cst_73 : f32 to vector<32x1xf32>
    %188 = arith.divf %186, %187 : vector<32x1xf32>
    %189 = vector.broadcast %188 : vector<32x1xf32> to vector<32x32xf32>
    %190 = arith.subf %182, %189 : vector<32x32xf32>
    %191 = arith.mulf %190, %190 : vector<32x32xf32>
    %cst_74 = arith.constant dense<0.000000e+00> : vector<32xf32>
    %192 = vector.multi_reduction <add>, %191, %cst_74 [1] : vector<32x32xf32> to vector<32xf32>
    %193 = vector.shape_cast %192 : vector<32xf32> to vector<32x1xf32>
    %cst_75 = arith.constant 3.200000e+01 : f32
    %194 = vector.broadcast %cst_75 : f32 to vector<32x1xf32>
    %195 = arith.divf %193, %194 : vector<32x1xf32>
    %196 = vector.broadcast %188 : vector<32x1xf32> to vector<32x32xf32>
    %197 = arith.subf %182, %196 : vector<32x32xf32>
    %cst_76 = arith.constant 9.99999996E-13 : f32
    %198 = vector.broadcast %cst_76 : f32 to vector<32x1xf32>
    %199 = arith.addf %195, %198 : vector<32x1xf32>
    %200 = math.rsqrt %199 : vector<32x1xf32>
    %201 = vector.broadcast %200 : vector<32x1xf32> to vector<32x32xf32>
    %202 = arith.mulf %197, %201 : vector<32x32xf32>
    %203 = vector.broadcast %183 : vector<1x32xf32> to vector<32x32xf32>
    %204 = arith.mulf %202, %203 : vector<32x32xf32>
    %205 = vector.broadcast %184 : vector<1x32xf32> to vector<32x32xf32>
    %206 = arith.addf %204, %205 : vector<32x32xf32>
    %c13 = arith.constant 13 : index
    %c0_77 = arith.constant 0 : index
    %207 = vector.load %arg5[%c13, %c0_77] : memref<32x64xf32, #tpu.memory_space<vmem>>, vector<1x32xf32>
    %c424 = arith.constant 424 : index
    %c0_78 = arith.constant 0 : index
    %208 = vector.load %arg4[%c424, %c0_78] : memref<776x64xf32, #tpu.memory_space<vmem>>, vector<32x16xf32>
    %cst_79 = arith.constant dense<0.000000e+00> : vector<32x16xf32>
    %209 = tpu.matmul %206, %208, %cst_79 {dimension_numbers = #tpu.dot_dimension_numbers<[1], [0], [0], [1], [0, 0, 1, 1], [], []>} : vector<32x32xf32>, vector<32x16xf32>, vector<32x16xf32> -> vector<32x16xf32>
    %c2 = arith.constant 2 : index
    %c0_80 = arith.constant 0 : index
    %210 = vector.load %arg5[%c2, %c0_80] : memref<32x64xf32, #tpu.memory_space<vmem>>, vector<1x16xf32>
    %211 = vector.broadcast %210 : vector<1x16xf32> to vector<32x16xf32>
    %212 = arith.addf %209, %211 : vector<32x16xf32>
    %213 = vector.shape_cast %212 : vector<32x16xf32> to vector<4x8x16xf32>
    %c488 = arith.constant 488 : index
    %c0_81 = arith.constant 0 : index
    %214 = vector.load %arg4[%c488, %c0_81] : memref<776x64xf32, #tpu.memory_space<vmem>>, vector<32x16xf32>
    %cst_82 = arith.constant dense<0.000000e+00> : vector<32x16xf32>
    %215 = tpu.matmul %206, %214, %cst_82 {dimension_numbers = #tpu.dot_dimension_numbers<[1], [0], [0], [1], [0, 0, 1, 1], [], []>} : vector<32x32xf32>, vector<32x16xf32>, vector<32x16xf32> -> vector<32x16xf32>
    %c6 = arith.constant 6 : index
    %c0_83 = arith.constant 0 : index
    %216 = vector.load %arg5[%c6, %c0_83] : memref<32x64xf32, #tpu.memory_space<vmem>>, vector<1x16xf32>
    %217 = vector.broadcast %216 : vector<1x16xf32> to vector<32x16xf32>
    %218 = arith.addf %215, %217 : vector<32x16xf32>
    %219 = vector.shape_cast %218 : vector<32x16xf32> to vector<4x8x16xf32>
    %c552 = arith.constant 552 : index
    %c0_84 = arith.constant 0 : index
    %220 = vector.load %arg4[%c552, %c0_84] : memref<776x64xf32, #tpu.memory_space<vmem>>, vector<32x16xf32>
    %cst_85 = arith.constant dense<0.000000e+00> : vector<32x16xf32>
    %221 = tpu.matmul %206, %220, %cst_85 {dimension_numbers = #tpu.dot_dimension_numbers<[1], [0], [0], [1], [0, 0, 1, 1], [], []>} : vector<32x32xf32>, vector<32x16xf32>, vector<32x16xf32> -> vector<32x16xf32>
    %c10 = arith.constant 10 : index
    %c0_86 = arith.constant 0 : index
    %222 = vector.load %arg5[%c10, %c0_86] : memref<32x64xf32, #tpu.memory_space<vmem>>, vector<1x16xf32>
    %223 = vector.broadcast %222 : vector<1x16xf32> to vector<32x16xf32>
    %224 = arith.addf %221, %223 : vector<32x16xf32>
    %225 = vector.shape_cast %224 : vector<32x16xf32> to vector<4x8x16xf32>
    "tpu.trace_start"() <{level = 10 : i32, message = "bqd,bkd->bqk"}> : () -> ()
    %cst_87 = arith.constant dense<0.000000e+00> : vector<4x8x8xf32>
    %226 = tpu.matmul %213, %219, %cst_87 {dimension_numbers = #tpu.dot_dimension_numbers<[2], [2], [1], [1], [0, 0, 0, 1, 1, 1], [0], [0]>} : vector<4x8x16xf32>, vector<4x8x16xf32>, vector<4x8x8xf32> -> vector<4x8x8xf32>
    "tpu.trace_stop"() : () -> ()
    %cst_88 = arith.constant 2.500000e-01 : f32
    %227 = vector.broadcast %cst_88 : f32 to vector<4x8x8xf32>
    %228 = arith.mulf %226, %227 : vector<4x8x8xf32>
    %229 = vector.broadcast %31 : vector<4x1x8xf32> to vector<4x8x8xf32>
    %230 = arith.addf %228, %229 : vector<4x8x8xf32>
    %cst_89 = arith.constant dense<0xFF800000> : vector<4x8xf32>
    %231 = vector.multi_reduction <maximumf>, %230, %cst_89 [2] : vector<4x8x8xf32> to vector<4x8xf32>
    %232 = vector.shape_cast %231 : vector<4x8xf32> to vector<4x8x1xf32>
    %233 = vector.broadcast %232 : vector<4x8x1xf32> to vector<4x8x8xf32>
    %234 = arith.subf %230, %233 : vector<4x8x8xf32>
    %235 = math.exp %234 : vector<4x8x8xf32>
    %cst_90 = arith.constant dense<0.000000e+00> : vector<4x8xf32>
    %236 = vector.multi_reduction <add>, %235, %cst_90 [2] : vector<4x8x8xf32> to vector<4x8xf32>
    %237 = vector.shape_cast %236 : vector<4x8xf32> to vector<4x8x1xf32>
    %238 = tpu.reciprocal %237 {approx = true} : vector<4x8x1xf32> -> vector<4x8x1xf32>
    %239 = vector.broadcast %238 : vector<4x8x1xf32> to vector<4x8x8xf32>
    %240 = arith.mulf %235, %239 : vector<4x8x8xf32>
    "tpu.trace_start"() <{level = 10 : i32, message = "bqk,bkd->bqd"}> : () -> ()
    %cst_91 = arith.constant dense<0.000000e+00> : vector<4x8x16xf32>
    %241 = tpu.matmul %240, %225, %cst_91 {dimension_numbers = #tpu.dot_dimension_numbers<[2], [1], [1], [2], [0, 0, 0, 1, 1, 2], [0], [0]>} : vector<4x8x8xf32>, vector<4x8x16xf32>, vector<4x8x16xf32> -> vector<4x8x16xf32>
    "tpu.trace_stop"() : () -> ()
    %242 = vector.shape_cast %241 : vector<4x8x16xf32> to vector<32x16xf32>
    %c616 = arith.constant 616 : index
    %c0_92 = arith.constant 0 : index
    %243 = vector.load %arg4[%c616, %c0_92] : memref<776x64xf32, #tpu.memory_space<vmem>>, vector<16x32xf32>
    %cst_93 = arith.constant dense<0.000000e+00> : vector<32x32xf32>
    %244 = tpu.matmul %242, %243, %cst_93 {dimension_numbers = #tpu.dot_dimension_numbers<[1], [0], [0], [1], [0, 0, 1, 1], [], []>} : vector<32x16xf32>, vector<16x32xf32>, vector<32x32xf32> -> vector<32x32xf32>
    %245 = vector.broadcast %207 : vector<1x32xf32> to vector<32x32xf32>
    %246 = arith.addf %245, %244 : vector<32x32xf32>
    %c456 = arith.constant 456 : index
    %c0_94 = arith.constant 0 : index
    %247 = vector.load %arg4[%c456, %c0_94] : memref<776x64xf32, #tpu.memory_space<vmem>>, vector<32x16xf32>
    %cst_95 = arith.constant dense<0.000000e+00> : vector<32x16xf32>
    %248 = tpu.matmul %206, %247, %cst_95 {dimension_numbers = #tpu.dot_dimension_numbers<[1], [0], [0], [1], [0, 0, 1, 1], [], []>} : vector<32x32xf32>, vector<32x16xf32>, vector<32x16xf32> -> vector<32x16xf32>
    %c3 = arith.constant 3 : index
    %c0_96 = arith.constant 0 : index
    %249 = vector.load %arg5[%c3, %c0_96] : memref<32x64xf32, #tpu.memory_space<vmem>>, vector<1x16xf32>
    %250 = vector.broadcast %249 : vector<1x16xf32> to vector<32x16xf32>
    %251 = arith.addf %248, %250 : vector<32x16xf32>
    %252 = vector.shape_cast %251 : vector<32x16xf32> to vector<4x8x16xf32>
    %c520 = arith.constant 520 : index
    %c0_97 = arith.constant 0 : index
    %253 = vector.load %arg4[%c520, %c0_97] : memref<776x64xf32, #tpu.memory_space<vmem>>, vector<32x16xf32>
    %cst_98 = arith.constant dense<0.000000e+00> : vector<32x16xf32>
    %254 = tpu.matmul %206, %253, %cst_98 {dimension_numbers = #tpu.dot_dimension_numbers<[1], [0], [0], [1], [0, 0, 1, 1], [], []>} : vector<32x32xf32>, vector<32x16xf32>, vector<32x16xf32> -> vector<32x16xf32>
    %c7 = arith.constant 7 : index
    %c0_99 = arith.constant 0 : index
    %255 = vector.load %arg5[%c7, %c0_99] : memref<32x64xf32, #tpu.memory_space<vmem>>, vector<1x16xf32>
    %256 = vector.broadcast %255 : vector<1x16xf32> to vector<32x16xf32>
    %257 = arith.addf %254, %256 : vector<32x16xf32>
    %258 = vector.shape_cast %257 : vector<32x16xf32> to vector<4x8x16xf32>
    %c584 = arith.constant 584 : index
    %c0_100 = arith.constant 0 : index
    %259 = vector.load %arg4[%c584, %c0_100] : memref<776x64xf32, #tpu.memory_space<vmem>>, vector<32x16xf32>
    %cst_101 = arith.constant dense<0.000000e+00> : vector<32x16xf32>
    %260 = tpu.matmul %206, %259, %cst_101 {dimension_numbers = #tpu.dot_dimension_numbers<[1], [0], [0], [1], [0, 0, 1, 1], [], []>} : vector<32x32xf32>, vector<32x16xf32>, vector<32x16xf32> -> vector<32x16xf32>
    %c11 = arith.constant 11 : index
    %c0_102 = arith.constant 0 : index
    %261 = vector.load %arg5[%c11, %c0_102] : memref<32x64xf32, #tpu.memory_space<vmem>>, vector<1x16xf32>
    %262 = vector.broadcast %261 : vector<1x16xf32> to vector<32x16xf32>
    %263 = arith.addf %260, %262 : vector<32x16xf32>
    %264 = vector.shape_cast %263 : vector<32x16xf32> to vector<4x8x16xf32>
    "tpu.trace_start"() <{level = 10 : i32, message = "bqd,bkd->bqk"}> : () -> ()
    %cst_103 = arith.constant dense<0.000000e+00> : vector<4x8x8xf32>
    %265 = tpu.matmul %252, %258, %cst_103 {dimension_numbers = #tpu.dot_dimension_numbers<[2], [2], [1], [1], [0, 0, 0, 1, 1, 1], [0], [0]>} : vector<4x8x16xf32>, vector<4x8x16xf32>, vector<4x8x8xf32> -> vector<4x8x8xf32>
    "tpu.trace_stop"() : () -> ()
    %cst_104 = arith.constant 2.500000e-01 : f32
    %266 = vector.broadcast %cst_104 : f32 to vector<4x8x8xf32>
    %267 = arith.mulf %265, %266 : vector<4x8x8xf32>
    %268 = vector.broadcast %31 : vector<4x1x8xf32> to vector<4x8x8xf32>
    %269 = arith.addf %267, %268 : vector<4x8x8xf32>
    %cst_105 = arith.constant dense<0xFF800000> : vector<4x8xf32>
    %270 = vector.multi_reduction <maximumf>, %269, %cst_105 [2] : vector<4x8x8xf32> to vector<4x8xf32>
    %271 = vector.shape_cast %270 : vector<4x8xf32> to vector<4x8x1xf32>
    %272 = vector.broadcast %271 : vector<4x8x1xf32> to vector<4x8x8xf32>
    %273 = arith.subf %269, %272 : vector<4x8x8xf32>
    %274 = math.exp %273 : vector<4x8x8xf32>
    %cst_106 = arith.constant dense<0.000000e+00> : vector<4x8xf32>
    %275 = vector.multi_reduction <add>, %274, %cst_106 [2] : vector<4x8x8xf32> to vector<4x8xf32>
    %276 = vector.shape_cast %275 : vector<4x8xf32> to vector<4x8x1xf32>
    %277 = tpu.reciprocal %276 {approx = true} : vector<4x8x1xf32> -> vector<4x8x1xf32>
    %278 = vector.broadcast %277 : vector<4x8x1xf32> to vector<4x8x8xf32>
    %279 = arith.mulf %274, %278 : vector<4x8x8xf32>
    "tpu.trace_start"() <{level = 10 : i32, message = "bqk,bkd->bqd"}> : () -> ()
    %cst_107 = arith.constant dense<0.000000e+00> : vector<4x8x16xf32>
    %280 = tpu.matmul %279, %264, %cst_107 {dimension_numbers = #tpu.dot_dimension_numbers<[2], [1], [1], [2], [0, 0, 0, 1, 1, 2], [0], [0]>} : vector<4x8x8xf32>, vector<4x8x16xf32>, vector<4x8x16xf32> -> vector<4x8x16xf32>
    "tpu.trace_stop"() : () -> ()
    %281 = vector.shape_cast %280 : vector<4x8x16xf32> to vector<32x16xf32>
    %c632 = arith.constant 632 : index
    %c0_108 = arith.constant 0 : index
    %282 = vector.load %arg4[%c632, %c0_108] : memref<776x64xf32, #tpu.memory_space<vmem>>, vector<16x32xf32>
    %cst_109 = arith.constant dense<0.000000e+00> : vector<32x32xf32>
    %283 = tpu.matmul %281, %282, %cst_109 {dimension_numbers = #tpu.dot_dimension_numbers<[1], [0], [0], [1], [0, 0, 1, 1], [], []>} : vector<32x16xf32>, vector<16x32xf32>, vector<32x32xf32> -> vector<32x32xf32>
    %284 = arith.addf %246, %283 : vector<32x32xf32>
    %285 = arith.addf %206, %284 : vector<32x32xf32>
    %c21 = arith.constant 21 : index
    %c0_110 = arith.constant 0 : index
    %286 = vector.load %arg5[%c21, %c0_110] : memref<32x64xf32, #tpu.memory_space<vmem>>, vector<1x32xf32>
    %c26 = arith.constant 26 : index
    %c0_111 = arith.constant 0 : index
    %287 = vector.load %arg5[%c26, %c0_111] : memref<32x64xf32, #tpu.memory_space<vmem>>, vector<1x32xf32>
    %cst_112 = arith.constant dense<0.000000e+00> : vector<32xf32>
    %288 = vector.multi_reduction <add>, %285, %cst_112 [1] : vector<32x32xf32> to vector<32xf32>
    %289 = vector.shape_cast %288 : vector<32xf32> to vector<32x1xf32>
    %cst_113 = arith.constant 3.200000e+01 : f32
    %290 = vector.broadcast %cst_113 : f32 to vector<32x1xf32>
    %291 = arith.divf %289, %290 : vector<32x1xf32>
    %292 = vector.broadcast %291 : vector<32x1xf32> to vector<32x32xf32>
    %293 = arith.subf %285, %292 : vector<32x32xf32>
    %294 = arith.mulf %293, %293 : vector<32x32xf32>
    %cst_114 = arith.constant dense<0.000000e+00> : vector<32xf32>
    %295 = vector.multi_reduction <add>, %294, %cst_114 [1] : vector<32x32xf32> to vector<32xf32>
    %296 = vector.shape_cast %295 : vector<32xf32> to vector<32x1xf32>
    %cst_115 = arith.constant 3.200000e+01 : f32
    %297 = vector.broadcast %cst_115 : f32 to vector<32x1xf32>
    %298 = arith.divf %296, %297 : vector<32x1xf32>
    %299 = vector.broadcast %291 : vector<32x1xf32> to vector<32x32xf32>
    %300 = arith.subf %285, %299 : vector<32x32xf32>
    %cst_116 = arith.constant 9.99999996E-13 : f32
    %301 = vector.broadcast %cst_116 : f32 to vector<32x1xf32>
    %302 = arith.addf %298, %301 : vector<32x1xf32>
    %303 = math.rsqrt %302 : vector<32x1xf32>
    %304 = vector.broadcast %303 : vector<32x1xf32> to vector<32x32xf32>
    %305 = arith.mulf %300, %304 : vector<32x32xf32>
    %306 = vector.broadcast %286 : vector<1x32xf32> to vector<32x32xf32>
    %307 = arith.mulf %305, %306 : vector<32x32xf32>
    %308 = vector.broadcast %287 : vector<1x32xf32> to vector<32x32xf32>
    %309 = arith.addf %307, %308 : vector<32x32xf32>
    %c648 = arith.constant 648 : index
    %c0_117 = arith.constant 0 : index
    %310 = vector.load %arg4[%c648, %c0_117] : memref<776x64xf32, #tpu.memory_space<vmem>>, vector<32x64xf32>
    %cst_118 = arith.constant dense<0.000000e+00> : vector<32x64xf32>
    %311 = tpu.matmul %309, %310, %cst_118 {dimension_numbers = #tpu.dot_dimension_numbers<[1], [0], [0], [1], [0, 0, 1, 1], [], []>} : vector<32x32xf32>, vector<32x64xf32>, vector<32x64xf32> -> vector<32x64xf32>
    %c15 = arith.constant 15 : index
    %c0_119 = arith.constant 0 : index
    %312 = vector.load %arg5[%c15, %c0_119] : memref<32x64xf32, #tpu.memory_space<vmem>>, vector<1x64xf32>
    %313 = vector.broadcast %312 : vector<1x64xf32> to vector<32x64xf32>
    %314 = arith.addf %311, %313 : vector<32x64xf32>
    %315 = arith.mulf %314, %314 : vector<32x64xf32>
    %316 = arith.mulf %314, %315 : vector<32x64xf32>
    %cst_120 = arith.constant 4.471500e-02 : f32
    %317 = vector.broadcast %cst_120 : f32 to vector<32x64xf32>
    %318 = arith.mulf %317, %316 : vector<32x64xf32>
    %319 = arith.addf %314, %318 : vector<32x64xf32>
    %cst_121 = arith.constant 0.797884583 : f32
    %320 = vector.broadcast %cst_121 : f32 to vector<32x64xf32>
    %321 = arith.mulf %320, %319 : vector<32x64xf32>
    %322 = math.tanh %321 : vector<32x64xf32>
    %cst_122 = arith.constant 1.000000e+00 : f32
    %323 = vector.broadcast %cst_122 : f32 to vector<32x64xf32>
    %324 = arith.addf %323, %322 : vector<32x64xf32>
    %cst_123 = arith.constant 5.000000e-01 : f32
    %325 = vector.broadcast %cst_123 : f32 to vector<32x64xf32>
    %326 = arith.mulf %325, %324 : vector<32x64xf32>
    %327 = arith.mulf %314, %326 : vector<32x64xf32>
    %c680 = arith.constant 680 : index
    %c0_124 = arith.constant 0 : index
    %328 = vector.load %arg4[%c680, %c0_124] : memref<776x64xf32, #tpu.memory_space<vmem>>, vector<64x32xf32>
    %cst_125 = arith.constant dense<0.000000e+00> : vector<32x32xf32>
    %329 = tpu.matmul %327, %328, %cst_125 {dimension_numbers = #tpu.dot_dimension_numbers<[1], [0], [0], [1], [0, 0, 1, 1], [], []>} : vector<32x64xf32>, vector<64x32xf32>, vector<32x32xf32> -> vector<32x32xf32>
    %c17 = arith.constant 17 : index
    %c0_126 = arith.constant 0 : index
    %330 = vector.load %arg5[%c17, %c0_126] : memref<32x64xf32, #tpu.memory_space<vmem>>, vector<1x32xf32>
    %331 = vector.broadcast %330 : vector<1x32xf32> to vector<32x32xf32>
    %332 = arith.addf %329, %331 : vector<32x32xf32>
    %333 = arith.addf %309, %332 : vector<32x32xf32>
    %c22 = arith.constant 22 : index
    %c0_127 = arith.constant 0 : index
    %334 = vector.load %arg5[%c22, %c0_127] : memref<32x64xf32, #tpu.memory_space<vmem>>, vector<1x32xf32>
    %c27 = arith.constant 27 : index
    %c0_128 = arith.constant 0 : index
    %335 = vector.load %arg5[%c27, %c0_128] : memref<32x64xf32, #tpu.memory_space<vmem>>, vector<1x32xf32>
    %cst_129 = arith.constant dense<0.000000e+00> : vector<32xf32>
    %336 = vector.multi_reduction <add>, %333, %cst_129 [1] : vector<32x32xf32> to vector<32xf32>
    %337 = vector.shape_cast %336 : vector<32xf32> to vector<32x1xf32>
    %cst_130 = arith.constant 3.200000e+01 : f32
    %338 = vector.broadcast %cst_130 : f32 to vector<32x1xf32>
    %339 = arith.divf %337, %338 : vector<32x1xf32>
    %340 = vector.broadcast %339 : vector<32x1xf32> to vector<32x32xf32>
    %341 = arith.subf %333, %340 : vector<32x32xf32>
    %342 = arith.mulf %341, %341 : vector<32x32xf32>
    %cst_131 = arith.constant dense<0.000000e+00> : vector<32xf32>
    %343 = vector.multi_reduction <add>, %342, %cst_131 [1] : vector<32x32xf32> to vector<32xf32>
    %344 = vector.shape_cast %343 : vector<32xf32> to vector<32x1xf32>
    %cst_132 = arith.constant 3.200000e+01 : f32
    %345 = vector.broadcast %cst_132 : f32 to vector<32x1xf32>
    %346 = arith.divf %344, %345 : vector<32x1xf32>
    %347 = vector.broadcast %339 : vector<32x1xf32> to vector<32x32xf32>
    %348 = arith.subf %333, %347 : vector<32x32xf32>
    %cst_133 = arith.constant 9.99999996E-13 : f32
    %349 = vector.broadcast %cst_133 : f32 to vector<32x1xf32>
    %350 = arith.addf %346, %349 : vector<32x1xf32>
    %351 = math.rsqrt %350 : vector<32x1xf32>
    %352 = vector.broadcast %351 : vector<32x1xf32> to vector<32x32xf32>
    %353 = arith.mulf %348, %352 : vector<32x32xf32>
    %354 = vector.broadcast %334 : vector<1x32xf32> to vector<32x32xf32>
    %355 = arith.mulf %353, %354 : vector<32x32xf32>
    %356 = vector.broadcast %335 : vector<1x32xf32> to vector<32x32xf32>
    %357 = arith.addf %355, %356 : vector<32x32xf32>
    %358 = vector.shape_cast %357 : vector<32x32xf32> to vector<4x8x32xf32>
    %359 = vector.extract_strided_slice %358 {offsets = [0, 0, 0], sizes = [4, 1, 32], strides = [1, 1, 1]} : vector<4x8x32xf32> to vector<4x1x32xf32>
    %360 = vector.shape_cast %359 : vector<4x1x32xf32> to vector<4x32xf32>
    %c744 = arith.constant 744 : index
    %c0_134 = arith.constant 0 : index
    %361 = vector.load %arg4[%c744, %c0_134] : memref<776x64xf32, #tpu.memory_space<vmem>>, vector<32x32xf32>
    %cst_135 = arith.constant dense<0.000000e+00> : vector<4x32xf32>
    %362 = tpu.matmul %360, %361, %cst_135 {dimension_numbers = #tpu.dot_dimension_numbers<[1], [0], [0], [1], [0, 0, 1, 1], [], []>} : vector<4x32xf32>, vector<32x32xf32>, vector<4x32xf32> -> vector<4x32xf32>
    %c28 = arith.constant 28 : index
    %c0_136 = arith.constant 0 : index
    %363 = vector.load %arg5[%c28, %c0_136] : memref<32x64xf32, #tpu.memory_space<vmem>>, vector<1x32xf32>
    %364 = vector.broadcast %363 : vector<1x32xf32> to vector<4x32xf32>
    %365 = arith.addf %362, %364 : vector<4x32xf32>
    %366 = math.tanh %365 : vector<4x32xf32>
    %c29 = arith.constant 29 : index
    %c0_137 = arith.constant 0 : index
    %367 = vector.load %arg5[%c29, %c0_137] : memref<32x64xf32, #tpu.memory_space<vmem>>, vector<1x32xf32>
    "tpu.trace_start"() <{level = 10 : i32, message = "oh,bh->ob"}> : () -> ()
    %cst_138 = arith.constant dense<0.000000e+00> : vector<1x4xf32>
    %368 = tpu.matmul %367, %366, %cst_138 {dimension_numbers = #tpu.dot_dimension_numbers<[1], [1], [0], [0], [0, 0, 1, 0], [], []>} : vector<1x32xf32>, vector<4x32xf32>, vector<1x4xf32> -> vector<1x4xf32>
    "tpu.trace_stop"() : () -> ()
    %c30 = arith.constant 30 : index
    %c0_139 = arith.constant 0 : index
    %369 = vector.load %arg5[%c30, %c0_139] : memref<32x64xf32, #tpu.memory_space<vmem>>, vector<1x1xf32>
    %370 = vector.broadcast %369 : vector<1x1xf32> to vector<1x4xf32>
    %371 = arith.addf %368, %370 : vector<1x4xf32>
    %c0_140 = arith.constant 0 : index
    %c0_141 = arith.constant 0 : index
    %372 = vector.load %arg6[%c0_140, %c0_141] : memref<1x4xf32, #tpu.memory_space<vmem>>, vector<1x4xf32>
    tpu.vector_store %arg6[%c0_140, %c0_141], %371 {strides = array<i32>} : memref<1x4xf32, #tpu.memory_space<vmem>>, vector<1x4xf32>,
    return
  }
  func.func @transform_0(%arg0: i32) -> (i32, i32) {
    %c0_i32 = arith.constant 0 : i32
    %c0_i32_0 = arith.constant 0 : i32
    return %arg0, %c0_i32 : i32, i32
  }
  func.func @transform_1(%arg0: i32) -> (i32, i32) {
    %c0_i32 = arith.constant 0 : i32
    %c0_i32_0 = arith.constant 0 : i32
    return %arg0, %c0_i32 : i32, i32
  }
  func.func @transform_2(%arg0: i32) -> (i32, i32) {
    %c0_i32 = arith.constant 0 : i32
    %c0_i32_0 = arith.constant 0 : i32
    return %arg0, %c0_i32 : i32, i32
  }
  func.func @transform_3(%arg0: i32) -> (i32, i32) {
    %c0_i32 = arith.constant 0 : i32
    %c0_i32_0 = arith.constant 0 : i32
    %c0_i32_1 = arith.constant 0 : i32
    return %c0_i32, %c0_i32_0 : i32, i32
  }
  func.func @transform_4(%arg0: i32) -> (i32, i32) {
    %c0_i32 = arith.constant 0 : i32
    %c0_i32_0 = arith.constant 0 : i32
    %c0_i32_1 = arith.constant 0 : i32
    return %c0_i32, %c0_i32_0 : i32, i32
  }
  func.func @transform_5(%arg0: i32) -> (i32, i32) {
    %c0_i32 = arith.constant 0 : i32
    %c0_i32_0 = arith.constant 0 : i32
    return %arg0, %c0_i32 : i32, i32
  }
}

</mosaic_0001>

<bundles_post_ra>
// kernel: _lambda_.1
= control target key start
LH: loop header
LB: loop body
LE: loop exit
PB: predicated region body
PF: predicated region fallthrough
CT: control target
= control target key end

     0   :  { %10 = vsyncpa [#allocation3], 0  ;;  %s3022_s21 = smov [#allocation2]   ;;  %s3023_s23 = smov 128   ;;  %s3675_s0 = inlined_call_operand.vmem [shape: s32[32,1], index: 0, kind: input, shape index: {}]   ;;  %s3676_s1 = inlined_call_operand.vmem [shape: s32[32,1], index: 1, kind: input, shape index: {}]   ;;  %s3677_s2 = inlined_call_operand.vmem [shape: s32[4,8], index: 2, kind: input, shape index: {}]   ;;  %s3678_s3 = inlined_call_operand.hbm [shape: f32[776,64], index: 3, kind: input, shape index: {}]   ;;  %s3679_s4 = inlined_call_operand.vmem [shape: f32[32,64], index: 4, kind: input, shape index: {}]   ;;  %s3680_s5 = inlined_call_operand.vmem [shape: f32[1,4], index: 5, kind: output, shape index: {}]  }
   0x1   :  { %s21_s20 = sshll.u32 %s3678_s3, 4  ;;  %s23_s22 = sshll.u32 %s3022_s21, 4  ;;  %s22_s20 = int_to_ptr.hbm [resolvable:$true] %s21_s20  ;;  %s24_s22 = int_to_ptr.vmem [resolvable:$true] %s23_s22 }
   0x2   :  { %s3024_s24 = smov 8  }
   0x3   :  { %29 = dma.hbm_to_vmem [thread:$0]  %s22_s20, 12416, %s24_s22, [#allocation3], %s3023_s23, %s3023_s23, %s3024_s24  }
   0x4   :  { %3020 = dma.done.wait [#allocation3], 12416  }
   0x5   :  { %3021 = vsyncadd [#allocation3], 4294954880  ;;  %v3025_v0 = vmov 0   ;;  %v38_v1 = vld [vmem:[%s3675_s0 + $0x10] sm:$0xff]  ;;  %v36_v2 = vld [vmem:[%s3675_s0] sm:$0xff]  ;;  %v48_v18 = vlaneseq  ;;  %vm82_vm0 = vcmask 523264  }
   0x6   :  { %2840 = vset.pattern.permute.xlu1 %v3025_v0  ;;  %2839 = vset.pattern.permute.xlu0 %v3025_v0  ;;  %v81_v3 = vld [vmem:[#allocation2 + $0x38] sm:$0xff]  ;;  %v80_v4 = vld [vmem:[#allocation2 + $0x30] sm:$0xff]  ;;  %v79_v5 = vld [vmem:[#allocation2 + $0x28] sm:$0xff]  ;;  %v3026_v24 = vmov 0.0   ;;  %vm176_vm5 = vcmask 261120  }
   0x7   :  { %2841 = vset.pattern.permute.xlu2 %v3025_v0  ;;  %57 = vperm.xlu1 %2840, %v38_v1   ;;  %v78_v6 = vld [vmem:[#allocation2 + $0x20] sm:$0xff]  ;;  %v39_v7 = vld [vmem:[%s3675_s0 + $0x18] sm:$0xff]  ;;  %v37_v8 = vld [vmem:[%s3675_s0 + $0x8] sm:$0xff]  ;;  %v49_v20 = vand.u32 127, %v48_v18 }
   0x8   :  { %51 = vperm.xlu0 %2839, %v36_v2   ;;  %103 = vmatpush.msra.mxu0 %v81_v3  ;;  %v77_v9 = vld [vmem:[#allocation2 + $0x18] sm:$0xff]  ;;  %v76_v10 = vld [vmem:[#allocation2 + $0x10] sm:$0xff]  ;;  %v75_v12 = vld [vmem:[#allocation2 + $0x8] sm:$0xff]  ;;  %v3027_v2 = vmov 32.0  }
   0x9   :  { %2825 = vmatpush.msra.mxu1 %v81_v3  ;;  %v42_v11 = vld [vmem:[%s3676_s1 + $0x10] sm:$0xff]  ;;  %v74_v14 = vld [vmem:[#allocation2] sm:$0xff]  ;;  %v41_v17 = vld [vmem:[%s3676_s1 + $0x8] sm:$0xff]  ;;  %2872 = vrcp.f32 %v3027_v2 }
   0xa   :  { %104 = vmatpush.msra.mxu0 %v80_v4  ;;  %v46_v13 = vcvt.s32.f32 %v42_v11  ;;  %v40_v15 = vld [vmem:[%s3676_s1] sm:$0xff]  ;;  %v45_v19 = vcvt.s32.f32 %v41_v17  ;;  %v43_v21 = vld [vmem:[%s3676_s1 + $0x18] sm:$0xff] }
   0xb   :  { %2826 = vmatpush.msra.mxu1 %v80_v4  ;;  %v44_v16 = vcvt.s32.f32 %v40_v15  ;;  %v47_v26 = vcvt.s32.f32 %v43_v21  ;;  %v129_v33 = vld [vmem:[#allocation2 + $0x60] sm:$0x1]  ;;  %v130_v34 = vld [vmem:[#allocation2 + $0x61] sm:$0x1] }
   0xc   :  { %105 = vmatpush.msra.mxu0 %v79_v5  ;;  %v136_v35 = vsub.f32 %v130_v34, %v129_v33  ;;  %v124_v37 = vld [vmem:[#allocation2 + $0x40] sm:$0xff]  ;;  %v332_v33 = vld [vmem:[#allocation2 + $0xb8] sm:$0xff] }
   0xd   :  { %2827 = vmatpush.msra.mxu1 %v79_v5  ;;  %139 = vperm.xlu2 %2841, %v44_v16   ;;  %v2842_v38 = vld [vmem:[#allocation2 + $0x60] ss:$0 sm:$0xff]  ;;  %v367_v34 = vld [vmem:[#allocation2 + $0xf8] sm:$0xff] }
   0xe   :  { %106 = vmatpush.msra.mxu0 %v78_v6  ;;  %v157_v39 = vperm.slane %v136_v35, 0  ;;  %v284_v35 = vld [vmem:[#allocation2 + $0x70] sm:$0xff] }
   0xf   :  { %2828 = vmatpush.msra.mxu1 %v78_v6  ;;  %60 = vperm.xlu1 %2840, %v39_v7   ;;  %v2873_v3 = vpop.eup %2872 }
  0x10   :  { %54 = vperm.xlu0 %2839, %v37_v8   ;;  %107 = vmatpush.msra.mxu0 %v77_v9  ;;  %v190_v4 = vmul.f32 32.0, %v2873_v3  ;;  %vm194_vm6 = vweird.f32 %v2873_v3 }
  0x11   :  { %2829 = vmatpush.msra.mxu1 %v77_v9 }
  0x12   :  { %108 = vmatpush.msra.mxu0 %v76_v10  ;;  %v191_v5 = vsub.f32 1.0, %v190_v4 }
  0x13   :  { %2830 = vmatpush.msra.mxu1 %v76_v10 }
  0x14   :  { %109 = vmatpush.msra.mxu0 %v75_v12  ;;  %v192_v6 = vmul.f32 %v2873_v3, %v191_v5 }
  0x15   :  { %2831 = vmatpush.msra.mxu1 %v75_v12  ;;  %144 = vperm.xlu2 %2841, %v45_v19  }
  0x16   :  { %110 = vmatpush.msra.mxu0 %v74_v14  ;;  %v193_v7 = vadd.f32 %v2873_v3, %v192_v6 }
  0x17   :  { %2832 = vmatpush.msra.mxu1 %v74_v14 }
  0x18   :  { %149 = vperm.xlu0 %2839, %v46_v13   ;;  %v3093_v8 = vsel %vm194_vm6, %v2873_v3, %v193_v7  ;;  %vm521_vm6 = vcmask 64512  }
  0x1d   :  { %154 = vperm.xlu2 %2841, %v47_v26  }
  0x67   :  { %v140_v32 = vpop.permute.xlu2 %139 }
  0x68   :  { %v158_v41 = vmul.f32 %v157_v39, %v140_v32  ;;  %v285_v32 = vld [vmem:[#allocation2 + $0x78] sm:$0xff] }
  0x6f   :  { %v145_v36 = vpop.permute.xlu2 %144 }
  0x70   :  { %v159_v51 = vmul.f32 %v157_v39, %v145_v36  ;;  %v331_v36 = vld [vmem:[#allocation2 + $0xb0] sm:$0xff] }
  0x77   :  { %v155_v45 = vpop.permute.xlu2 %154 }
  0x78   :  { %v161_v52 = vmul.f32 %v157_v39, %v155_v45 }
  0x79   :  { %v58_v22 = vpop.permute.xlu1 %57 }
  0x7a   :  { %v52_v23 = vpop.permute.xlu0 %51  ;;  %vm64_vm4 = vcmp.eq.s32.totalorder %v58_v22, %v49_v20 }
  0x7b   :  { %vm62_vm1 = vcmp.eq.s32.totalorder %v52_v23, %v49_v20  ;;  %v2688_v31 = vsel %vm64_vm4, 1.0, %v3026_v24  ;;  %vm400_vm4 = vcmask 130048  }
  0x7c   :  { %v2686_v25 = vsel %vm62_vm1, 1.0, %v3026_v24 }
  0x7d   :  { %2690 = vmatmul.msk.f32.vlgmr.msra.gmra.mxu0 %vm82_vm0, %v2686_v25 }
  0x81   :  { %v61_v27 = vpop.permute.xlu1 %60 }
  0x82   :  { %v55_v28 = vpop.permute.xlu0 %54  ;;  %vm65_vm2 = vcmp.eq.s32.totalorder %v61_v27, %v49_v20 }
  0x83   :  { %vm63_vm3 = vcmp.eq.s32.totalorder %v55_v28, %v49_v20  ;;  %v2689_v29 = vsel %vm65_vm2, 1.0, %v3026_v24 }
  0x84   :  { %v2687_v30 = vsel %vm63_vm3, 1.0, %v3026_v24  ;;  %2693 = vmatmul.msk.f32.vlgmr.msra.gmra.mxu1 %vm82_vm0, %v2689_v29  ;;  %v286_v29 = vld [vmem:[#allocation2 + $0x80] sm:$0xff] }
  0x85   :  { %2691 = vmatmul.msk.f32.gmra.mxu0 %vm82_vm0, %v2687_v30  ;;  %v333_v30 = vld [vmem:[#allocation2 + $0xc0] sm:$0xff]  ;;  %313 = vmatpush.msrb.mxu1 %v286_v29 }
  0x86   :  { %348 = vmatpush.msra.mxu2 %v333_v30 }
  0x87   :  { %314 = vmatpush.msrb.mxu1 %v285_v32 }
  0x88   :  { %349 = vmatpush.msra.mxu2 %v332_v33  ;;  %v2846_v33 = vld [vmem:[%s3679_s4 + $0x4] ss:$0 sm:$0xff] }
  0x89   :  { %315 = vmatpush.msrb.mxu1 %v284_v35  ;;  %v2845_v35 = vld [vmem:[%s3679_s4] ss:$0 sm:$0xff] }
  0x8a   :  { %v150_v59 = vpop.permute.xlu0 %149  ;;  %350 = vmatpush.msra.mxu2 %v331_v36 }
  0x8b   :  { %v160_v62 = vmul.f32 %v157_v39, %v150_v59  ;;  %v330_v39 = vld [vmem:[#allocation2 + $0xa8] sm:$0xff] }
  0x8c   :  { %351 = vmatpush.msra.mxu2 %v330_v39 }
  0x8d   :  { %2692 = vmatmul.msk.f32.gmra.mxu0 %vm82_vm0, %v2688_v31  ;;  %v368_v31 = vld [vmem:[#allocation2 + $0x100] sm:$0xff] }
  0x8e   :  { %383 = vmatpush.msra.mxu3 %v368_v31 }
  0x90   :  { %384 = vmatpush.msra.mxu3 %v367_v34  ;;  %v2847_v34 = vld [vmem:[%s3679_s4 + $0x8] ss:$0 sm:$0xff] }
  0xfa   :  { %v112_v40 = vpop.f32.mrf.mxu0 }
  0xfb   :  { %v125_v42 = vadd.f32 %v124_v37, %v112_v40  ;;  %v365_v40 = vld [vmem:[#allocation2 + $0xe8] sm:$0xff] }
  0xfd   :  { %v132_v43 = vadd.f32 %v2842_v38, %v125_v42 }
  0xff   :  { %v162_v44 = vadd.f32 %v158_v41, %v132_v43 }
 0x101   :  { %v177_v46 = vsel %vm176_vm5, %v162_v44, 0.0  ;;  %v121_v47 = vpop.f32.mrf.mxu1 }
 0x102   :  { %178 = vadd.xlane.f32.xlu1 %v177_v46  ;;  %v115_v48 = vpop.f32.mrf.mxu0  ;;  %v128_v49 = vadd.f32 %v124_v37, %v121_v47 }
 0x103   :  { %v126_v50 = vadd.f32 %v124_v37, %v115_v48 }
 0x104   :  { %v135_v53 = vadd.f32 %v2842_v38, %v128_v49 }
 0x105   :  { %v133_v54 = vadd.f32 %v2842_v38, %v126_v50 }
 0x106   :  { %v165_v55 = vadd.f32 %v161_v52, %v135_v53 }
 0x107   :  { %v163_v56 = vadd.f32 %v159_v51, %v133_v54 }
 0x108   :  { %v186_v57 = vsel %vm176_vm5, %v165_v55, 0.0 }
 0x109   :  { %v180_v58 = vsel %vm176_vm5, %v163_v56, 0.0 }
 0x10a   :  { %187 = vadd.xlane.f32.xlu1 %v186_v57  ;;  %181 = vadd.xlane.f32.xlu0 %v180_v58  ;;  %v118_v60 = vpop.f32.mrf.mxu0 }
 0x10b   :  { %v127_v61 = vadd.f32 %v124_v37, %v118_v60  ;;  %v366_v37 = vld [vmem:[#allocation2 + $0xf0] sm:$0xff] }
 0x10c   :  { %385 = vmatpush.msra.mxu3 %v366_v37 }
 0x10d   :  { %v134_v63 = vadd.f32 %v2842_v38, %v127_v61  ;;  %v283_v38 = vld [vmem:[#allocation2 + $0x68] sm:$0xff]  ;;  %v2843_v61 = vld [vmem:[%s3679_s4 + $0x12] ss:$0 sm:$0xff] }
 0x10e   :  { %316 = vmatpush.msrb.mxu1 %v283_v38  ;;  %386 = vmatpush.msra.mxu3 %v365_v40 }
 0x10f   :  { %v164_v0 = vadd.f32 %v160_v62, %v134_v63 }
 0x111   :  { %v183_v1 = vsel %vm176_vm5, %v164_v0, 0.0 }
 0x112   :  { %184 = vadd.xlane.f32.xlu2 %v183_v1  ;;  %v2844_v1 = vld [vmem:[%s3679_s4 + $0x17] ss:$0 sm:$0xff] }
 0x175   :  { %v179_v9 = vpop.xlane.xlu1 %178 }
 0x176   :  { %v196_v10 = vmul.f32 %v3093_v8, %v179_v9 }
 0x178   :  { %v3096_v11 = vsub.f32 %v162_v44, %v196_v10 }
 0x17a   :  { %v204_v12 = vmul.f32 %v3096_v11, %v3096_v11 }
 0x17c   :  { %v208_v13 = vsel %vm176_vm5, %v204_v12, 0.0 }
 0x17d   :  { %v188_v14 = vpop.xlane.xlu1 %187  ;;  %209 = vadd.xlane.f32.xlu2 %v208_v13  ;;  %v182_v15 = vpop.xlane.xlu0 %181 }
 0x17e   :  { %v199_v16 = vmul.f32 %v3093_v8, %v188_v14  ;;  %v197_v17 = vmul.f32 %v3093_v8, %v182_v15 }
 0x180   :  { %v3103_v18 = vsub.f32 %v165_v55, %v199_v16  ;;  %v3105_v19 = vsub.f32 %v163_v56, %v197_v17 }
 0x182   :  { %v207_v20 = vmul.f32 %v3103_v18, %v3103_v18  ;;  %v205_v21 = vmul.f32 %v3105_v19, %v3105_v19 }
 0x184   :  { %v217_v22 = vsel %vm176_vm5, %v207_v20, 0.0  ;;  %v211_v23 = vsel %vm176_vm5, %v205_v21, 0.0 }
 0x185   :  { %218 = vadd.xlane.f32.xlu2 %v217_v22  ;;  %v185_v24 = vpop.xlane.xlu2 %184  ;;  %212 = vadd.xlane.f32.xlu0 %v211_v23 }
 0x186   :  { %v198_v25 = vmul.f32 %v3093_v8, %v185_v24 }
 0x188   :  { %v3114_v26 = vsub.f32 %v164_v0, %v198_v25 }
 0x18a   :  { %v206_v27 = vmul.f32 %v3114_v26, %v3114_v26 }
 0x18c   :  { %v214_v28 = vsel %vm176_vm5, %v206_v27, 0.0 }
 0x18d   :  { %215 = vadd.xlane.f32.xlu1 %v214_v28 }
 0x1f0   :  { %v210_v41 = vpop.xlane.xlu2 %209 }
 0x1f1   :  { %v220_v42 = vmul.f32 %v210_v41, %v3093_v8 }
 0x1f3   :  { %v224_v43 = vadd.f32 1e-12, %v220_v42 }
 0x1f5   :  { %2874 = vrsqrt.f32 %v224_v43  ;;  %vm234_vm8 = vweird.f32 %v224_v43 }
 0x1f8   :  { %v219_v44 = vpop.xlane.xlu2 %218  ;;  %v213_v45 = vpop.xlane.xlu0 %212 }
 0x1f9   :  { %v223_v46 = vmul.f32 %v219_v44, %v3093_v8  ;;  %v221_v47 = vmul.f32 %v213_v45, %v3093_v8 }
 0x1fb   :  { %v2875_v48 = vpop.eup %2874  ;;  %v227_v49 = vadd.f32 1e-12, %v223_v46  ;;  %v225_v50 = vadd.f32 1e-12, %v221_v47 }
 0x1fc   :  { %v229_v51 = vmul.f32 %v2875_v48, %v224_v43  ;;  %vm235_vm7 = vweird.f32 %v2875_v48 }
 0x1fd   :  { %2876 = vrsqrt.f32 %v227_v49  ;;  %vm236_vm9 = vmor %vm234_vm8, %vm235_vm7  ;;  %vm244_vm11 = vweird.f32 %v225_v50  ;;  %vm264_vm2 = vweird.f32 %v227_v49 }
 0x1fe   :  { %v230_v52 = vmul.f32 %v2875_v48, %v229_v51  ;;  %2878 = vrsqrt.f32 %v225_v50 }
 0x200   :  { %v231_v53 = vmul.f32 0.5, %v230_v52  ;;  %v216_v54 = vpop.xlane.xlu1 %215 }
 0x201   :  { %v222_v55 = vmul.f32 %v216_v54, %v3093_v8 }
 0x202   :  { %v232_v56 = vsub.f32 1.5, %v231_v53 }
 0x203   :  { %v2877_v57 = vpop.eup %2876  ;;  %v226_v58 = vadd.f32 1e-12, %v222_v55 }
 0x204   :  { %v2879_v59 = vpop.eup %2878  ;;  %v233_v60 = vmul.f32 %v2875_v48, %v232_v56  ;;  %v259_v62 = vmul.f32 %v2877_v57, %v227_v49  ;;  %vm265_vm15 = vweird.f32 %v2877_v57 }
 0x205   :  { %v239_v63 = vmul.f32 %v2879_v59, %v225_v50  ;;  %2880 = vrsqrt.f32 %v226_v58  ;;  %vm245_vm10 = vweird.f32 %v2879_v59  ;;  %vm254_vm14 = vweird.f32 %v226_v58  ;;  %vm266_vm3 = vmor %vm264_vm2, %vm265_vm15 }
 0x206   :  { %v237_v0 = vsel %vm236_vm9, %v2875_v48, %v233_v60  ;;  %v260_v5 = vmul.f32 %v2877_v57, %v259_v62  ;;  %vm246_vm12 = vmor %vm244_vm11, %vm245_vm10 }
 0x207   :  { %v268_v2 = vmul.f32 %v237_v0, %v3096_v11  ;;  %v240_v3 = vmul.f32 %v2879_v59, %v239_v63 }
 0x208   :  { %v261_v13 = vmul.f32 0.5, %v260_v5 }
 0x209   :  { %v273_v4 = vmul.f32 %v2843_v61, %v268_v2  ;;  %v241_v6 = vmul.f32 0.5, %v240_v3 }
 0x20a   :  { %v262_v20 = vsub.f32 1.5, %v261_v13 }
 0x20b   :  { %v2881_v7 = vpop.eup %2880  ;;  %v3130_v9 = vadd.f32 %v2844_v1, %v273_v4  ;;  %v242_v10 = vsub.f32 1.5, %v241_v6 }
 0x20c   :  { %v249_v12 = vmul.f32 %v2881_v7, %v226_v58  ;;  %vm255_vm13 = vweird.f32 %v2881_v7  ;;  %v263_v25 = vmul.f32 %v2877_v57, %v262_v20 }
 0x20d   :  { %v243_v14 = vmul.f32 %v2879_v59, %v242_v10  ;;  %2694 = vmatmul.msk.f32.vlgmr.msrb.gmra.mxu1 %vm176_vm5, %v3130_v9  ;;  %2698 = vmatmul.msk.f32.vlgmr.msra.gmra.mxu2 %vm176_vm5, %v3130_v9  ;;  %vm256_vm1 = vmor %vm254_vm14, %vm255_vm13 }
 0x20e   :  { %v250_v11 = vmul.f32 %v2881_v7, %v249_v12  ;;  %2702 = vmatmul.msk.f32.vlgmr.msra.gmra.mxu3 %vm176_vm5, %v3130_v9  ;;  %v267_v28 = vsel %vm266_vm3, %v2877_v57, %v263_v25 }
 0x20f   :  { %v247_v15 = vsel %vm246_vm12, %v2879_v59, %v243_v14  ;;  %v271_v31 = vmul.f32 %v267_v28, %v3103_v18  ;;  %v166_v59 = vld [vmem:[%s3677_s2] sm:$0xf] }
 0x210   :  { %v269_v16 = vmul.f32 %v247_v15, %v3105_v19  ;;  %v251_v17 = vmul.f32 0.5, %v250_v11  ;;  %v167_v60 = vcvt.s32.f32 %v166_v59 }
 0x212   :  { %v274_v21 = vmul.f32 %v2843_v61, %v269_v16  ;;  %v252_v22 = vsub.f32 1.5, %v251_v17 }
 0x214   :  { %v3139_v23 = vadd.f32 %v2844_v1, %v274_v21  ;;  %v253_v24 = vmul.f32 %v2881_v7, %v252_v22 }
 0x216   :  { %v257_v27 = vsel %vm256_vm1, %v2881_v7, %v253_v24  ;;  %2695 = vmatmul.msk.f32.gmra.mxu1 %vm176_vm5, %v3139_v23  ;;  %2699 = vmatmul.msk.f32.gmra.mxu2 %vm176_vm5, %v3139_v23 }
 0x217   :  { %v270_v19 = vmul.f32 %v257_v27, %v3114_v26  ;;  %2703 = vmatmul.msk.f32.gmra.mxu3 %vm176_vm5, %v3139_v23  ;;  %v276_v26 = vmul.f32 %v2843_v61, %v271_v31 }
 0x219   :  { %v275_v29 = vmul.f32 %v2843_v61, %v270_v19  ;;  %v3157_v32 = vadd.f32 %v2844_v1, %v276_v26  ;;  %v168_v61 = vsub.f32 1.0, %v167_v60 }
 0x21b   :  { %v3148_v30 = vadd.f32 %v2844_v1, %v275_v29  ;;  %v169_v62 = vmul.f32 -10000.0, %v168_v61  ;;  %v776_v61 = vld [vmem:[#allocation2 + $0x108] sm:$0xff] }
 0x21d   :  { %v3185_v63 = vperm.slane %v169_v62, 0  ;;  %v171_v4 = vrot.slane %v169_v62, 1  ;;  %v172_v12 = vrot.slane %v169_v62, 2  ;;  %v173_v14 = vrot.slane %v169_v62, 3 }
 0x21e   :  { %2696 = vmatmul.msk.f32.gmra.mxu1 %vm176_vm5, %v3148_v30  ;;  %2700 = vmatmul.msk.f32.gmra.mxu2 %vm176_vm5, %v3148_v30 }
 0x21f   :  { %2704 = vmatmul.msk.f32.gmra.mxu3 %vm176_vm5, %v3148_v30  ;;  %v3189_v5 = vperm.slane %v171_v4, 0  ;;  %v3193_v11 = vperm.slane %v172_v12, 0  ;;  %v3195_v17 = vperm.slane %v173_v14, 0  ;;  %v659_v12 = vld [vmem:[#allocation2 + $0x130] sm:$0xff] }
 0x226   :  { %2697 = vmatmul.msk.f32.gmra.mxu1 %vm176_vm5, %v3157_v32  ;;  %2701 = vmatmul.msk.f32.gmra.mxu2 %vm176_vm5, %v3157_v32 }
 0x227   :  { %2705 = vmatmul.msk.f32.gmra.mxu3 %vm176_vm5, %v3157_v32 }
 0x28a   :  { %v318_v18 = vpop.f32.mrf.mxu1 }
 0x28b   :  { %v319_v40 = vadd.f32 %v2845_v35, %v318_v18 }
 0x290   :  { %v353_v36 = vpop.f32.mrf.mxu2 }
 0x291   :  { %v354_v37 = vadd.f32 %v2846_v33, %v353_v36  ;;  %v388_v38 = vpop.f32.mrf.mxu3 }
 0x292   :  { %v389_v39 = vadd.f32 %v2847_v34, %v388_v38 }
 0x293   :  { %2706 = vmatpush.xpose.msk.msra.mxu1 %vm400_vm4, %v354_v37  ;;  %v321_v41 = vpop.f32.mrf.mxu1 }
 0x294   :  { %v322_v46 = vadd.f32 %v2845_v35, %v321_v41 }
 0x296   :  { %2707 = vmatmul.msk.f32.vlgmr.msra.gmra.mxu1 %vm400_vm4, %v319_v40 }
 0x297   :  { %584 = vmatpush.msrb.mxu1 %v389_v39 }
 0x299   :  { %v356_v42 = vpop.f32.mrf.mxu2  ;;  %686 = vmatpush.msra.mxu1 %v659_v12 }
 0x29a   :  { %v357_v43 = vadd.f32 %v2846_v33, %v356_v42  ;;  %v391_v44 = vpop.f32.mrf.mxu3 }
 0x29b   :  { %v392_v45 = vadd.f32 %v2847_v34, %v391_v44  ;;  %v324_v47 = vpop.f32.mrf.mxu1 }
 0x29c   :  { %2708 = vmatpush.xpose.msk.msrb.mxu2 %vm400_vm4, %v357_v43  ;;  %v325_v52 = vadd.f32 %v2845_v35, %v324_v47  ;;  %v709_v47 = vld [vmem:[#allocation2 + $0xa0] sm:$0xff] }
 0x29f   :  { %2709 = vmatmul.msk.f32.vlgmr.msrb.gmra.mxu2 %vm400_vm4, %v322_v46 }
 0x2a0   :  { %607 = vmatpush.msra.mxu2 %v392_v45 }
 0x2a1   :  { %v359_v48 = vpop.f32.mrf.mxu2 }
 0x2a2   :  { %v360_v49 = vadd.f32 %v2846_v33, %v359_v48  ;;  %v394_v50 = vpop.f32.mrf.mxu3  ;;  %724 = vmatpush.msrb.mxu2 %v709_v47  ;;  %v708_v48 = vld [vmem:[#allocation2 + $0x98] sm:$0xff] }
 0x2a3   :  { %v395_v51 = vadd.f32 %v2847_v34, %v394_v50  ;;  %v327_v54 = vpop.f32.mrf.mxu1 }
 0x2a4   :  { %2710 = vmatpush.xpose.msk.msrb.mxu3 %vm400_vm4, %v360_v49  ;;  %v328_v58 = vadd.f32 %v2845_v35, %v327_v54  ;;  %725 = vmatpush.msrb.mxu2 %v708_v48  ;;  %v707_v49 = vld [vmem:[#allocation2 + $0x90] sm:$0xff]  ;;  %v779_v54 = vld [vmem:[#allocation2 + $0x120] sm:$0xff] }
 0x2a6   :  { %726 = vmatpush.msrb.mxu2 %v707_v49 }
 0x2a7   :  { %2711 = vmatmul.msk.f32.vlgmr.msrb.gmra.mxu3 %vm400_vm4, %v325_v52  ;;  %v744_v52 = vld [vmem:[#allocation2 + $0xe0] sm:$0xff] }
 0x2a8   :  { %630 = vmatpush.msra.mxu3 %v395_v51  ;;  %v706_v51 = vld [vmem:[#allocation2 + $0x88] sm:$0xff] }
 0x2a9   :  { %v362_v53 = vpop.f32.mrf.mxu2  ;;  %727 = vmatpush.msrb.mxu2 %v706_v51 }
 0x2aa   :  { %v363_v55 = vadd.f32 %v2846_v33, %v362_v53  ;;  %v397_v56 = vpop.f32.mrf.mxu3  ;;  %759 = vmatpush.msrb.mxu3 %v744_v52  ;;  %v743_v53 = vld [vmem:[#allocation2 + $0xd8] sm:$0xff] }
 0x2ab   :  { %v398_v57 = vadd.f32 %v2847_v34, %v397_v56  ;;  %v778_v56 = vld [vmem:[#allocation2 + $0x118] sm:$0xff] }
 0x2ac   :  { %2712 = vmatpush.xpose.msk.msrb.mxu0 %vm400_vm4, %v363_v55  ;;  %v742_v55 = vld [vmem:[#allocation2 + $0xd0] sm:$0xff]  ;;  %760 = vmatpush.msrb.mxu3 %v743_v53 }
 0x2ae   :  { %761 = vmatpush.msrb.mxu3 %v742_v55 }
 0x2af   :  { %2713 = vmatmul.msk.f32.vlgmr.msrb.gmra.mxu0 %vm400_vm4, %v328_v58  ;;  %v777_v58 = vld [vmem:[#allocation2 + $0x110] sm:$0xff] }
 0x2b0   :  { %653 = vmatpush.msra.mxu0 %v398_v57  ;;  %v741_v57 = vld [vmem:[#allocation2 + $0xc8] sm:$0xff] }
 0x2b1   :  { %762 = vmatpush.msrb.mxu3 %v741_v57 }
 0x2b2   :  { %794 = vmatpush.msrb.mxu0 %v779_v54 }
 0x2b4   :  { %795 = vmatpush.msrb.mxu0 %v778_v56 }
 0x2b6   :  { %796 = vmatpush.msrb.mxu0 %v777_v58 }
 0x2b8   :  { %797 = vmatpush.msrb.mxu0 %v776_v61 }
 0x313   :  { %v424_v0 = vpop.f32.mrf.mxu1 }
 0x314   :  { %v505_v1 = vmul.f32 0.25, %v424_v0 }
 0x316   :  { %v517_v2 = vadd.f32 %v3185_v63, %v505_v1 }
 0x318   :  { %v522_v3 = vsel %vm521_vm6, %v517_v2, -inf }
 0x319   :  { %523 = vmax.xlane.f32.xlu0 %v522_v3 }
 0x322   :  { %v450_v6 = vpop.f32.mrf.mxu2 }
 0x323   :  { %v506_v7 = vmul.f32 0.25, %v450_v6 }
 0x325   :  { %v518_v10 = vadd.f32 %v3189_v5, %v506_v7 }
 0x327   :  { %v525_v13 = vsel %vm521_vm6, %v518_v10, -inf }
 0x328   :  { %526 = vmax.xlane.f32.xlu2 %v525_v13  ;;  %v658_v13 = vld [vmem:[#allocation2 + $0x128] sm:$0xff] }
 0x329   :  { %687 = vmatpush.msra.mxu1 %v658_v13 }
 0x32a   :  { %v476_v15 = vpop.f32.mrf.mxu3 }
 0x32b   :  { %v507_v16 = vmul.f32 0.25, %v476_v15 }
 0x32c   :  { %v502_v20 = vpop.f32.mrf.mxu0 }
 0x32d   :  { %v508_v21 = vmul.f32 0.25, %v502_v20  ;;  %v519_v22 = vadd.f32 %v3193_v11, %v507_v16 }
 0x32f   :  { %v528_v24 = vsel %vm521_vm6, %v519_v22, -inf  ;;  %v520_v25 = vadd.f32 %v3195_v17, %v508_v21 }
 0x330   :  { %529 = vmax.xlane.f32.xlu1 %v528_v24  ;;  %v2850_v24 = vld [vmem:[%s3679_s4 + $0x5] ss:$0 sm:$0xff] }
 0x331   :  { %v531_v27 = vsel %vm521_vm6, %v520_v25, -inf }
 0x332   :  { %532 = vmax.xlane.f32.xlu0 %v531_v27 }
 0x38c   :  { %v524_v19 = vpop.xlane.xlu0 %523 }
 0x38d   :  { %v534_v28 = vsub.f32 %v517_v2, %v524_v19 }
 0x38f   :  { %v538_v29 = vmul.f32 1.442695, %v534_v28 }
 0x391   :  { %2882 = vpow2.f32 %v538_v29  ;;  %v2848_v29 = vld [vmem:[%s3679_s4 + $0x1] ss:$0 sm:$0xff] }
 0x397   :  { %v2883_v31 = vpop.eup %2882 }
 0x398   :  { %v546_v26 = vsel %vm521_vm6, %v2883_v31, 0.0 }
 0x399   :  { %547 = vadd.xlane.f32.xlu1 %v546_v26 }
 0x39b   :  { %v527_v18 = vpop.xlane.xlu2 %526 }
 0x39c   :  { %v535_v33 = vsub.f32 %v518_v10, %v527_v18 }
 0x39e   :  { %v540_v34 = vmul.f32 1.442695, %v535_v33 }
 0x3a0   :  { %2884 = vpow2.f32 %v540_v34 }
 0x3a3   :  { %v530_v35 = vpop.xlane.xlu1 %529 }
 0x3a4   :  { %v536_v36 = vsub.f32 %v519_v22, %v530_v35 }
 0x3a5   :  { %v533_v37 = vpop.xlane.xlu0 %532 }
 0x3a6   :  { %v2885_v38 = vpop.eup %2884  ;;  %v542_v39 = vmul.f32 1.442695, %v536_v36  ;;  %v537_v40 = vsub.f32 %v520_v25, %v533_v37  ;;  %v2849_v25 = vld [vmem:[%s3679_s4 + $0x9] ss:$0 sm:$0xff] }
 0x3a7   :  { %v549_v41 = vsel %vm521_vm6, %v2885_v38, 0.0 }
 0x3a8   :  { %2886 = vpow2.f32 %v542_v39  ;;  %v544_v42 = vmul.f32 1.442695, %v537_v40  ;;  %550 = vadd.xlane.f32.xlu0 %v549_v41 }
 0x3aa   :  { %2888 = vpow2.f32 %v544_v42 }
 0x3ae   :  { %v2887_v43 = vpop.eup %2886 }
 0x3af   :  { %v552_v44 = vsel %vm521_vm6, %v2887_v43, 0.0 }
 0x3b0   :  { %v2889_v45 = vpop.eup %2888  ;;  %553 = vadd.xlane.f32.xlu2 %v552_v44 }
 0x3b1   :  { %v555_v46 = vsel %vm521_vm6, %v2889_v45, 0.0 }
 0x3b2   :  { %556 = vadd.xlane.f32.xlu1 %v555_v46 }
 0x40c   :  { %v548_v50 = vpop.xlane.xlu1 %547 }
 0x40d   :  { %2890 = vrcp.f32 %v548_v50 }
 0x413   :  { %v2891_v59 = vpop.eup %2890 }
 0x414   :  { %v562_v60 = vmul.f32 %v2891_v59, %v2883_v31 }
 0x416   :  { %2714 = vmatmul.msk.f32.vlgmr.msrb.gmra.mxu1 %vm521_vm6, %v562_v60 }
 0x41b   :  { %v551_v62 = vpop.xlane.xlu0 %550 }
 0x41c   :  { %2892 = vrcp.f32 %v551_v62 }
 0x422   :  { %v2893_v0 = vpop.eup %2892 }
 0x423   :  { %v563_v1 = vmul.f32 %v2893_v0, %v2885_v38  ;;  %v554_v2 = vpop.xlane.xlu2 %553 }
 0x424   :  { %2894 = vrcp.f32 %v554_v2 }
 0x425   :  { %v557_v3 = vpop.xlane.xlu1 %556  ;;  %2715 = vmatmul.msk.f32.vlgmr.msra.gmra.mxu2 %vm521_vm6, %v563_v1 }
 0x426   :  { %2896 = vrcp.f32 %v557_v3 }
 0x42a   :  { %v2895_v4 = vpop.eup %2894 }
 0x42b   :  { %v564_v6 = vmul.f32 %v2895_v4, %v2887_v43 }
 0x42c   :  { %v2897_v7 = vpop.eup %2896 }
 0x42d   :  { %v565_v10 = vmul.f32 %v2897_v7, %v2889_v45  ;;  %2716 = vmatmul.msk.f32.vlgmr.msra.gmra.mxu3 %vm521_vm6, %v564_v6  ;;  %2722 = vmatmul.msk.f32.vlgmr.msrb.gmra.mxu2 %vm176_vm5, %v3130_v9 }
 0x42f   :  { %2717 = vmatmul.msk.f32.vlgmr.msra.gmra.mxu0 %vm521_vm6, %v565_v10 }
 0x435   :  { %2723 = vmatmul.msk.f32.gmra.mxu2 %vm176_vm5, %v3139_v23  ;;  %2726 = vmatmul.msk.f32.vlgmr.msrb.gmra.mxu3 %vm176_vm5, %v3130_v9 }
 0x437   :  { %2730 = vmatmul.msk.f32.vlgmr.msrb.gmra.mxu0 %vm176_vm5, %v3130_v9 }
 0x43d   :  { %2724 = vmatmul.msk.f32.gmra.mxu2 %vm176_vm5, %v3148_v30  ;;  %2727 = vmatmul.msk.f32.gmra.mxu3 %vm176_vm5, %v3139_v23 }
 0x43f   :  { %2731 = vmatmul.msk.f32.gmra.mxu0 %vm176_vm5, %v3139_v23 }
 0x445   :  { %2725 = vmatmul.msk.f32.gmra.mxu2 %vm176_vm5, %v3157_v32  ;;  %2728 = vmatmul.msk.f32.gmra.mxu3 %vm176_vm5, %v3148_v30 }
 0x447   :  { %2732 = vmatmul.msk.f32.gmra.mxu0 %vm176_vm5, %v3148_v30 }
 0x44d   :  { %2729 = vmatmul.msk.f32.gmra.mxu3 %vm176_vm5, %v3157_v32 }
 0x44f   :  { %2733 = vmatmul.msk.f32.gmra.mxu0 %vm176_vm5, %v3157_v32 }
 0x493   :  { %v586_v14 = vpop.f32.mrf.mxu1 }
 0x494   :  { %2718 = vmatmul.msk.f32.vlgmr.msra.gmra.mxu1 %vm400_vm4, %v586_v14 }
 0x4a8   :  { %v609_v15 = vpop.f32.mrf.mxu2 }
 0x4a9   :  { %2719 = vmatmul.msk.f32.gmra.mxu1 %vm400_vm4, %v609_v15 }
 0x4ac   :  { %v655_v16 = vpop.f32.mrf.mxu0 }
 0x4b0   :  { %v632_v20 = vpop.f32.mrf.mxu3  ;;  %v729_v21 = vpop.f32.mrf.mxu2 }
 0x4b1   :  { %2720 = vmatmul.msk.f32.gmra.mxu1 %vm400_vm4, %v632_v20  ;;  %v730_v18 = vadd.f32 %v2848_v29, %v729_v21 }
 0x4b4   :  { %v799_v22 = vpop.f32.mrf.mxu0 }
 0x4b5   :  { %v800_v28 = vadd.f32 %v2849_v25, %v799_v22 }
 0x4b8   :  { %v764_v27 = vpop.f32.mrf.mxu3  ;;  %v732_v26 = vpop.f32.mrf.mxu2 }
 0x4b9   :  { %v765_v19 = vadd.f32 %v2850_v24, %v764_v27  ;;  %2721 = vmatmul.msk.f32.gmra.mxu1 %vm400_vm4, %v655_v16  ;;  %v733_v36 = vadd.f32 %v2848_v29, %v732_v26 }
 0x4bb   :  { %2734 = vmatpush.xpose.msk.msrb.mxu1 %vm400_vm4, %v765_v19 }
 0x4bc   :  { %v802_v31 = vpop.f32.mrf.mxu0 }
 0x4bd   :  { %v803_v35 = vadd.f32 %v2849_v25, %v802_v31 }
 0x4bf   :  { %985 = vmatpush.msra.mxu1 %v800_v28 }
 0x4c0   :  { %v767_v33 = vpop.f32.mrf.mxu3  ;;  %v735_v38 = vpop.f32.mrf.mxu2 }
 0x4c1   :  { %v768_v34 = vadd.f32 %v2850_v24, %v767_v33  ;;  %2735 = vmatmul.msk.f32.vlgmr.msrb.gmra.mxu1 %vm400_vm4, %v730_v18  ;;  %v736_v42 = vadd.f32 %v2848_v29, %v735_v38 }
 0x4c3   :  { %2736 = vmatpush.xpose.msk.msra.mxu2 %vm400_vm4, %v768_v34  ;;  %v1060_v34 = vld [vmem:[#allocation2 + $0x140] sm:$0xff] }
 0x4c4   :  { %v805_v37 = vpop.f32.mrf.mxu0  ;;  %1087 = vmatpush.msrb.mxu1 %v1060_v34  ;;  %v1213_v34 = vld [vmem:[#allocation2 + $0x160] sm:$0xff] }
 0x4c5   :  { %v806_v41 = vadd.f32 %v2849_v25, %v805_v37 }
 0x4c6   :  { %2737 = vmatmul.msk.f32.vlgmr.msra.gmra.mxu2 %vm400_vm4, %v733_v36 }
 0x4c7   :  { %1008 = vmatpush.msrb.mxu2 %v803_v35 }
 0x4c8   :  { %v770_v39 = vpop.f32.mrf.mxu3  ;;  %v738_v45 = vpop.f32.mrf.mxu2 }
 0x4c9   :  { %v771_v40 = vadd.f32 %v2850_v24, %v770_v39  ;;  %v739_v48 = vadd.f32 %v2848_v29, %v738_v45  ;;  %1240 = vmatpush.msra.mxu2 %v1213_v34 }
 0x4cb   :  { %2738 = vmatpush.xpose.msk.msra.mxu3 %vm400_vm4, %v771_v40 }
 0x4cc   :  { %v808_v43 = vpop.f32.mrf.mxu0 }
 0x4cd   :  { %v809_v47 = vadd.f32 %v2849_v25, %v808_v43 }
 0x4ce   :  { %2739 = vmatmul.msk.f32.vlgmr.msra.gmra.mxu3 %vm400_vm4, %v736_v42 }
 0x4cf   :  { %1031 = vmatpush.msrb.mxu3 %v806_v41 }
 0x4d0   :  { %v773_v44 = vpop.f32.mrf.mxu3 }
 0x4d1   :  { %v774_v46 = vadd.f32 %v2850_v24, %v773_v44 }
 0x4d3   :  { %2740 = vmatpush.xpose.msk.msra.mxu0 %vm400_vm4, %v774_v46 }
 0x4d6   :  { %2741 = vmatmul.msk.f32.vlgmr.msra.gmra.mxu0 %vm400_vm4, %v739_v48 }
 0x4d7   :  { %1054 = vmatpush.msrb.mxu0 %v809_v47  ;;  %v1059_v47 = vld [vmem:[#allocation2 + $0x138] sm:$0xff] }
 0x4d8   :  { %1088 = vmatpush.msrb.mxu1 %v1059_v47 }
 0x511   :  { %v3254_v49 = vpop.f32.mrf.mxu1 }
 0x526   :  { %v3256_v50 = vpop.f32.mrf.mxu1 }
 0x52e   :  { %v3258_v51 = vpop.f32.mrf.mxu1 }
 0x536   :  { %v3260_v52 = vpop.f32.mrf.mxu1 }
 0x53e   :  { %v834_v53 = vpop.f32.mrf.mxu1 }
 0x53f   :  { %v915_v54 = vmul.f32 0.25, %v834_v53 }
 0x541   :  { %v919_v55 = vadd.f32 %v915_v54, %v3185_v63 }
 0x543   :  { %v923_v56 = vsel %vm521_vm6, %v919_v55, -inf }
 0x544   :  { %924 = vmax.xlane.f32.xlu2 %v923_v56  ;;  %v2851_v56 = vld [vmem:[%s3679_s4 + $0xc] ss:$0 sm:$0xff] }
 0x549   :  { %v860_v57 = vpop.f32.mrf.mxu2 }
 0x54a   :  { %v916_v58 = vmul.f32 0.25, %v860_v57  ;;  %v702_v57 = vadd.f32 %v2851_v56, %v3254_v49 }
 0x54c   :  { %v920_v59 = vadd.f32 %v916_v58, %v3189_v5 }
 0x54e   :  { %v926_v60 = vsel %vm521_vm6, %v920_v59, -inf }
 0x54f   :  { %927 = vmax.xlane.f32.xlu0 %v926_v60 }
 0x551   :  { %v886_v61 = vpop.f32.mrf.mxu3 }
 0x552   :  { %v917_v62 = vmul.f32 0.25, %v886_v61 }
 0x553   :  { %v912_v0 = vpop.f32.mrf.mxu0 }
 0x554   :  { %v918_v1 = vmul.f32 0.25, %v912_v0  ;;  %v921_v2 = vadd.f32 %v917_v62, %v3193_v11  ;;  %v703_v62 = vadd.f32 %v2851_v56, %v3256_v50 }
 0x556   :  { %v929_v3 = vsel %vm521_vm6, %v921_v2, -inf  ;;  %v922_v4 = vadd.f32 %v918_v1, %v3195_v17 }
 0x557   :  { %930 = vmax.xlane.f32.xlu1 %v929_v3 }
 0x558   :  { %v932_v6 = vsel %vm521_vm6, %v922_v4, -inf }
 0x559   :  { %933 = vmax.xlane.f32.xlu2 %v932_v6 }
 0x5b7   :  { %v925_v7 = vpop.xlane.xlu2 %924 }
 0x5b8   :  { %v935_v10 = vsub.f32 %v919_v55, %v925_v7 }
 0x5ba   :  { %v939_v12 = vmul.f32 1.442695, %v935_v10  ;;  %v705_v10 = vadd.f32 %v2851_v56, %v3260_v52 }
 0x5bc   :  { %2898 = vpow2.f32 %v939_v12 }
 0x5c2   :  { %v2899_v13 = vpop.eup %2898  ;;  %v928_v14 = vpop.xlane.xlu0 %927 }
 0x5c3   :  { %v936_v15 = vsub.f32 %v920_v59, %v928_v14  ;;  %v947_v16 = vsel %vm521_vm6, %v2899_v13, 0.0 }
 0x5c4   :  { %948 = vadd.xlane.f32.xlu0 %v947_v16 }
 0x5c5   :  { %v941_v20 = vmul.f32 1.442695, %v936_v15 }
 0x5c7   :  { %2900 = vpow2.f32 %v941_v20 }
 0x5ca   :  { %v931_v21 = vpop.xlane.xlu1 %930 }
 0x5cb   :  { %v937_v22 = vsub.f32 %v921_v2, %v931_v21 }
 0x5cc   :  { %v934_v24 = vpop.xlane.xlu2 %933 }
 0x5cd   :  { %v2901_v25 = vpop.eup %2900  ;;  %v943_v27 = vmul.f32 1.442695, %v937_v22  ;;  %v938_v19 = vsub.f32 %v922_v4, %v934_v24  ;;  %v704_v4 = vadd.f32 %v2851_v56, %v3258_v51 }
 0x5ce   :  { %v950_v28 = vsel %vm521_vm6, %v2901_v25, 0.0 }
 0x5cf   :  { %2902 = vpow2.f32 %v943_v27  ;;  %v945_v29 = vmul.f32 1.442695, %v938_v19  ;;  %951 = vadd.xlane.f32.xlu1 %v950_v28 }
 0x5d1   :  { %2904 = vpow2.f32 %v945_v29 }
 0x5d5   :  { %v2903_v31 = vpop.eup %2902 }
 0x5d6   :  { %v953_v26 = vsel %vm521_vm6, %v2903_v31, 0.0 }
 0x5d7   :  { %v2905_v18 = vpop.eup %2904  ;;  %954 = vadd.xlane.f32.xlu2 %v953_v26 }
 0x5d8   :  { %v956_v33 = vsel %vm521_vm6, %v2905_v18, 0.0 }
 0x5d9   :  { %957 = vadd.xlane.f32.xlu0 %v956_v33 }
 0x637   :  { %v949_v35 = vpop.xlane.xlu0 %948 }
 0x638   :  { %2906 = vrcp.f32 %v949_v35  ;;  %v1212_v35 = vld [vmem:[#allocation2 + $0x158] sm:$0xff] }
 0x639   :  { %1241 = vmatpush.msra.mxu2 %v1212_v35  ;;  %v1299_v35 = vld [vmem:[#allocation2 + $0x198] sm:$0xff] }
 0x63e   :  { %v2907_v36 = vpop.eup %2906 }
 0x63f   :  { %v963_v37 = vmul.f32 %v2907_v36, %v2899_v13  ;;  %v1211_v36 = vld [vmem:[#allocation2 + $0x150] sm:$0xff] }
 0x640   :  { %1242 = vmatpush.msra.mxu2 %v1211_v36  ;;  %v1298_v36 = vld [vmem:[#allocation2 + $0x190] sm:$0xff] }
 0x641   :  { %2742 = vmatmul.msk.f32.vlgmr.msra.gmra.mxu1 %vm521_vm6, %v963_v37  ;;  %v1210_v37 = vld [vmem:[#allocation2 + $0x148] sm:$0xff] }
 0x642   :  { %v952_v38 = vpop.xlane.xlu1 %951  ;;  %1243 = vmatpush.msra.mxu2 %v1210_v37  ;;  %v1297_v37 = vld [vmem:[#allocation2 + $0x188] sm:$0xff] }
 0x643   :  { %2908 = vrcp.f32 %v952_v38 }
 0x649   :  { %v2909_v39 = vpop.eup %2908 }
 0x64a   :  { %v964_v40 = vmul.f32 %v2909_v39, %v2901_v25  ;;  %v955_v41 = vpop.xlane.xlu2 %954 }
 0x64b   :  { %2910 = vrcp.f32 %v955_v41 }
 0x64c   :  { %2743 = vmatmul.msk.f32.vlgmr.msrb.gmra.mxu2 %vm521_vm6, %v964_v40  ;;  %v958_v42 = vpop.xlane.xlu0 %957 }
 0x64d   :  { %2912 = vrcp.f32 %v958_v42 }
 0x651   :  { %v2911_v43 = vpop.eup %2910 }
 0x652   :  { %v965_v44 = vmul.f32 %v2911_v43, %v2903_v31 }
 0x653   :  { %v2913_v45 = vpop.eup %2912 }
 0x654   :  { %v966_v46 = vmul.f32 %v2913_v45, %v2905_v18  ;;  %2744 = vmatmul.msk.f32.vlgmr.msrb.gmra.mxu3 %vm521_vm6, %v965_v44 }
 0x656   :  { %2745 = vmatmul.msk.f32.vlgmr.msrb.gmra.mxu0 %vm521_vm6, %v966_v46 }
 0x6be   :  { %v987_v48 = vpop.f32.mrf.mxu1 }
 0x6bf   :  { %2746 = vmatmul.msk.f32.vlgmr.msrb.gmra.mxu1 %vm400_vm4, %v987_v48 }
 0x6cf   :  { %v1010_v53 = vpop.f32.mrf.mxu2 }
 0x6d0   :  { %2747 = vmatmul.msk.f32.gmra.mxu1 %vm400_vm4, %v1010_v53 }
 0x6d3   :  { %v1056_v55 = vpop.f32.mrf.mxu0 }
 0x6d7   :  { %v1033_v54 = vpop.f32.mrf.mxu3 }
 0x6d8   :  { %2748 = vmatmul.msk.f32.gmra.mxu1 %vm400_vm4, %v1033_v54  ;;  %v2852_v54 = vld [vmem:[%s3679_s4 + $0x13] ss:$0 sm:$0xff] }
 0x6e0   :  { %2749 = vmatmul.msk.f32.gmra.mxu1 %vm400_vm4, %v1056_v55 }
 0x73c   :  { %v1090_v58 = vpop.f32.mrf.mxu1 }
 0x73d   :  { %v1102_v59 = vadd.f32 %v1090_v58, %v702_v57  ;;  %v2853_v57 = vld [vmem:[%s3679_s4 + $0x18] ss:$0 sm:$0xff] }
 0x73f   :  { %v1106_v60 = vadd.f32 %v1102_v59, %v3130_v9 }
 0x741   :  { %v1112_v61 = vsel %vm176_vm5, %v1106_v60, 0.0 }
 0x742   :  { %1113 = vadd.xlane.f32.xlu1 %v1112_v61 }
 0x74d   :  { %v1093_v0 = vpop.f32.mrf.mxu1 }
 0x74e   :  { %v1103_v1 = vadd.f32 %v1093_v0, %v703_v62 }
 0x750   :  { %v1107_v2 = vadd.f32 %v1103_v1, %v3139_v23 }
 0x752   :  { %v1115_v3 = vsel %vm176_vm5, %v1107_v2, 0.0 }
 0x753   :  { %1116 = vadd.xlane.f32.xlu2 %v1115_v3 }
 0x755   :  { %v1096_v6 = vpop.f32.mrf.mxu1 }
 0x756   :  { %v1104_v49 = vadd.f32 %v1096_v6, %v704_v4 }
 0x758   :  { %v1108_v7 = vadd.f32 %v1104_v49, %v3148_v30 }
 0x75a   :  { %v1118_v9 = vsel %vm176_vm5, %v1108_v7, 0.0 }
 0x75b   :  { %1119 = vadd.xlane.f32.xlu0 %v1118_v9 }
 0x75d   :  { %v1099_v12 = vpop.f32.mrf.mxu1 }
 0x75e   :  { %v1105_v50 = vadd.f32 %v1099_v12, %v705_v10 }
 0x760   :  { %v1109_v13 = vadd.f32 %v1105_v50, %v3157_v32 }
 0x762   :  { %v1121_v23 = vsel %vm176_vm5, %v1109_v13, 0.0 }
 0x763   :  { %1122 = vadd.xlane.f32.xlu1 %v1121_v23 }
 0x7b5   :  { %v1114_v14 = vpop.xlane.xlu1 %1113 }
 0x7b6   :  { %v1124_v15 = vmul.f32 %v1114_v14, %v3093_v8 }
 0x7b8   :  { %v1128_v51 = vsub.f32 %v1106_v60, %v1124_v15 }
 0x7ba   :  { %v1132_v16 = vmul.f32 %v1128_v51, %v1128_v51 }
 0x7bc   :  { %v1136_v20 = vsel %vm176_vm5, %v1132_v16, 0.0 }
 0x7bd   :  { %1137 = vadd.xlane.f32.xlu2 %v1136_v20 }
 0x7c6   :  { %v1117_v30 = vpop.xlane.xlu2 %1116 }
 0x7c7   :  { %v1125_v21 = vmul.f32 %v1117_v30, %v3093_v8 }
 0x7c9   :  { %v3300_v22 = vsub.f32 %v1107_v2, %v1125_v21 }
 0x7cb   :  { %v1133_v52 = vmul.f32 %v3300_v22, %v3300_v22 }
 0x7cd   :  { %v1139_v32 = vsel %vm176_vm5, %v1133_v52, 0.0 }
 0x7ce   :  { %v1120_v24 = vpop.xlane.xlu0 %1119  ;;  %1140 = vadd.xlane.f32.xlu0 %v1139_v32 }
 0x7cf   :  { %v1126_v25 = vmul.f32 %v1120_v24, %v3093_v8 }
 0x7d1   :  { %v3306_v27 = vsub.f32 %v1108_v7, %v1126_v25 }
 0x7d3   :  { %v1134_v19 = vmul.f32 %v3306_v27, %v3306_v27 }
 0x7d5   :  { %v1142_v28 = vsel %vm176_vm5, %v1134_v19, 0.0 }
 0x7d6   :  { %1143 = vadd.xlane.f32.xlu1 %v1142_v28  ;;  %v1123_v29 = vpop.xlane.xlu1 %1122 }
 0x7d7   :  { %v1127_v31 = vmul.f32 %v1123_v29, %v3093_v8 }
 0x7d9   :  { %v3312_v26 = vsub.f32 %v1109_v13, %v1127_v31 }
 0x7db   :  { %v1135_v18 = vmul.f32 %v3312_v26, %v3312_v26 }
 0x7dd   :  { %v1145_v33 = vsel %vm176_vm5, %v1135_v18, 0.0 }
 0x7de   :  { %1146 = vadd.xlane.f32.xlu2 %v1145_v33 }
 0x830   :  { %v1138_v38 = vpop.xlane.xlu2 %1137 }
 0x831   :  { %v1148_v39 = vmul.f32 %v1138_v38, %v3093_v8  ;;  %v1296_v38 = vld [vmem:[#allocation2 + $0x180] sm:$0xff] }
 0x833   :  { %v1152_v40 = vadd.f32 1e-12, %v1148_v39  ;;  %v1295_v39 = vld [vmem:[#allocation2 + $0x178] sm:$0xff] }
 0x835   :  { %2914 = vrsqrt.f32 %v1152_v40  ;;  %vm1162_vm8 = vweird.f32 %v1152_v40 }
 0x83b   :  { %v2915_v41 = vpop.eup %2914 }
 0x83c   :  { %v1157_v42 = vmul.f32 %v2915_v41, %v1152_v40  ;;  %vm1163_vm7 = vweird.f32 %v2915_v41  ;;  %v1294_v40 = vld [vmem:[#allocation2 + $0x170] sm:$0xff] }
 0x83d   :  { %vm1164_vm9 = vmor %vm1162_vm8, %vm1163_vm7 }
 0x83e   :  { %v1158_v43 = vmul.f32 %v2915_v41, %v1157_v42 }
 0x840   :  { %v1159_v44 = vmul.f32 0.5, %v1158_v43 }
 0x841   :  { %v1141_v45 = vpop.xlane.xlu0 %1140 }
 0x842   :  { %v1160_v46 = vsub.f32 1.5, %v1159_v44  ;;  %v1149_v47 = vmul.f32 %v1141_v45, %v3093_v8 }
 0x844   :  { %v1161_v48 = vmul.f32 %v2915_v41, %v1160_v46  ;;  %v1153_v53 = vadd.f32 1e-12, %v1149_v47 }
 0x846   :  { %v1165_v55 = vsel %vm1164_vm9, %v2915_v41, %v1161_v48  ;;  %2916 = vrsqrt.f32 %v1153_v53  ;;  %vm1172_vm11 = vweird.f32 %v1153_v53  ;;  %v2854_v41 = vld [vmem:[%s3679_s4 + $0xe] ss:$0 sm:$0xff] }
 0x847   :  { %v1196_v56 = vmul.f32 %v1165_v55, %v1128_v51 }
 0x849   :  { %v1201_v58 = vmul.f32 %v2852_v54, %v1196_v56  ;;  %v1144_v59 = vpop.xlane.xlu1 %1143 }
 0x84a   :  { %v1150_v60 = vmul.f32 %v1144_v59, %v3093_v8 }
 0x84b   :  { %v3326_v61 = vadd.f32 %v2853_v57, %v1201_v58 }
 0x84c   :  { %v2917_v62 = vpop.eup %2916  ;;  %v1154_v0 = vadd.f32 1e-12, %v1150_v60 }
 0x84d   :  { %v1167_v1 = vmul.f32 %v2917_v62, %v1153_v53  ;;  %2750 = vmatmul.msk.f32.vlgmr.msra.gmra.mxu2 %vm176_vm5, %v3326_v61  ;;  %vm1173_vm10 = vweird.f32 %v2917_v62 }
 0x84e   :  { %2918 = vrsqrt.f32 %v1154_v0  ;;  %vm1174_vm12 = vmor %vm1172_vm11, %vm1173_vm10  ;;  %vm1182_vm14 = vweird.f32 %v1154_v0 }
 0x84f   :  { %v1168_v2 = vmul.f32 %v2917_v62, %v1167_v1 }
 0x851   :  { %v1169_v3 = vmul.f32 0.5, %v1168_v2  ;;  %v1147_v4 = vpop.xlane.xlu2 %1146 }
 0x852   :  { %v1151_v6 = vmul.f32 %v1147_v4, %v3093_v8 }
 0x853   :  { %v1170_v49 = vsub.f32 1.5, %v1169_v3 }
 0x854   :  { %v2919_v7 = vpop.eup %2918  ;;  %v1155_v9 = vadd.f32 1e-12, %v1151_v6 }
 0x855   :  { %v1171_v10 = vmul.f32 %v2917_v62, %v1170_v49  ;;  %v1177_v12 = vmul.f32 %v2919_v7, %v1154_v0  ;;  %vm1183_vm13 = vweird.f32 %v2919_v7 }
 0x856   :  { %2920 = vrsqrt.f32 %v1155_v9  ;;  %vm1184_vm15 = vmor %vm1182_vm14, %vm1183_vm13  ;;  %vm1192_vm2 = vweird.f32 %v1155_v9 }
 0x857   :  { %v1175_v50 = vsel %vm1174_vm12, %v2917_v62, %v1171_v10  ;;  %v1178_v13 = vmul.f32 %v2919_v7, %v1177_v12 }
 0x858   :  { %v1197_v23 = vmul.f32 %v1175_v50, %v3300_v22 }
 0x859   :  { %v1179_v14 = vmul.f32 0.5, %v1178_v13 }
 0x85a   :  { %v1202_v15 = vmul.f32 %v2852_v54, %v1197_v23 }
 0x85b   :  { %v1180_v51 = vsub.f32 1.5, %v1179_v14 }
 0x85c   :  { %v2921_v16 = vpop.eup %2920  ;;  %v3332_v20 = vadd.f32 %v2853_v57, %v1202_v15 }
 0x85d   :  { %v1181_v30 = vmul.f32 %v2919_v7, %v1180_v51  ;;  %v1187_v21 = vmul.f32 %v2921_v16, %v1155_v9  ;;  %vm1193_vm1 = vweird.f32 %v2921_v16 }
 0x85e   :  { %2751 = vmatmul.msk.f32.gmra.mxu2 %vm176_vm5, %v3332_v20  ;;  %vm1194_vm3 = vmor %vm1192_vm2, %vm1193_vm1 }
 0x85f   :  { %v1185_v52 = vsel %vm1184_vm15, %v2919_v7, %v1181_v30  ;;  %v1188_v32 = vmul.f32 %v2921_v16, %v1187_v21 }
 0x860   :  { %v1198_v24 = vmul.f32 %v1185_v52, %v3306_v27  ;;  %v1300_v27 = vld [vmem:[#allocation2 + $0x1a0] sm:$0xff] }
 0x861   :  { %v1189_v25 = vmul.f32 0.5, %v1188_v32  ;;  %1323 = vmatpush.msra.mxu3 %v1300_v27 }
 0x862   :  { %v1203_v22 = vmul.f32 %v2852_v54, %v1198_v24 }
 0x863   :  { %v1190_v19 = vsub.f32 1.5, %v1189_v25  ;;  %1324 = vmatpush.msra.mxu3 %v1299_v35 }
 0x864   :  { %v3337_v28 = vadd.f32 %v2853_v57, %v1203_v22 }
 0x865   :  { %v1191_v29 = vmul.f32 %v2921_v16, %v1190_v19  ;;  %1325 = vmatpush.msra.mxu3 %v1298_v36 }
 0x866   :  { %2752 = vmatmul.msk.f32.gmra.mxu2 %vm176_vm5, %v3337_v28 }
 0x867   :  { %v1195_v31 = vsel %vm1194_vm3, %v2921_v16, %v1191_v29  ;;  %1326 = vmatpush.msra.mxu3 %v1297_v37 }
 0x868   :  { %v1199_v18 = vmul.f32 %v1195_v31, %v3312_v26  ;;  %v1293_v26 = vld [vmem:[#allocation2 + $0x168] sm:$0xff] }
 0x869   :  { %1327 = vmatpush.msra.mxu3 %v1296_v38 }
 0x86a   :  { %v1204_v33 = vmul.f32 %v2852_v54, %v1199_v18  ;;  %v2855_v18 = vld [vmem:[%s3679_s4 + $0x10] ss:$0 sm:$0xff] }
 0x86b   :  { %1328 = vmatpush.msra.mxu3 %v1295_v39 }
 0x86c   :  { %v3342_v34 = vadd.f32 %v2853_v57, %v1204_v33 }
 0x86d   :  { %1329 = vmatpush.msra.mxu3 %v1294_v40 }
 0x86e   :  { %2753 = vmatmul.msk.f32.gmra.mxu2 %vm176_vm5, %v3342_v34 }
 0x86f   :  { %1330 = vmatpush.msra.mxu3 %v1293_v26 }
 0x8d0   :  { %v1245_v42 = vpop.f32.mrf.mxu2 }
 0x8d1   :  { %v1246_v43 = vadd.f32 %v2854_v41, %v1245_v42 }
 0x8d3   :  { %v1257_v44 = vmul.f32 %v1246_v43, %v1246_v43 }
 0x8d5   :  { %v1261_v45 = vmul.f32 %v1257_v44, %v1246_v43 }
 0x8d7   :  { %v1265_v46 = vmul.f32 0.044715, %v1261_v45 }
 0x8d9   :  { %v1269_v47 = vadd.f32 %v1265_v46, %v1246_v43 }
 0x8db   :  { %v1273_v48 = vmul.f32 0.7978846, %v1269_v47 }
 0x8dd   :  { %2922 = vtanh.f32 %v1273_v48 }
 0x8e1   :  { %v1248_v53 = vpop.f32.mrf.mxu2 }
 0x8e2   :  { %v1249_v54 = vadd.f32 %v2854_v41, %v1248_v53 }
 0x8e3   :  { %v2923_v55 = vpop.eup %2922 }
 0x8e4   :  { %v1281_v56 = vadd.f32 1.0, %v2923_v55  ;;  %v1258_v57 = vmul.f32 %v1249_v54, %v1249_v54 }
 0x8e6   :  { %v1285_v58 = vmul.f32 0.5, %v1281_v56  ;;  %v1262_v59 = vmul.f32 %v1258_v57, %v1249_v54 }
 0x8e8   :  { %v1289_v60 = vmul.f32 %v1285_v58, %v1246_v43  ;;  %v1266_v62 = vmul.f32 0.044715, %v1262_v59 }
 0x8e9   :  { %v1251_v0 = vpop.f32.mrf.mxu2 }
 0x8ea   :  { %v1270_v1 = vadd.f32 %v1266_v62, %v1249_v54  ;;  %v1252_v2 = vadd.f32 %v2854_v41, %v1251_v0  ;;  %2754 = vmatmul.msk.f32.vlgmr.msra.gmra.mxu3 %vm82_vm0, %v1289_v60 }
 0x8ec   :  { %v1259_v3 = vmul.f32 %v1252_v2, %v1252_v2  ;;  %v1274_v4 = vmul.f32 0.7978846, %v1270_v1 }
 0x8ee   :  { %v1263_v6 = vmul.f32 %v1259_v3, %v1252_v2  ;;  %2924 = vtanh.f32 %v1274_v4 }
 0x8f0   :  { %v1267_v49 = vmul.f32 0.044715, %v1263_v6 }
 0x8f1   :  { %v1254_v7 = vpop.f32.mrf.mxu2 }
 0x8f2   :  { %v1271_v9 = vadd.f32 %v1267_v49, %v1252_v2  ;;  %v1255_v10 = vadd.f32 %v2854_v41, %v1254_v7  ;;  %v1452_v49 = vld [vmem:[#allocation2 + $0x1c0] sm:$0xff] }
 0x8f3   :  { %v1499_v7 = vld [vmem:[#allocation2 + $0x200] sm:$0xff]  ;;  %1479 = vmatpush.msra.mxu0 %v1452_v49 }
 0x8f4   :  { %v2925_v12 = vpop.eup %2924  ;;  %v1260_v50 = vmul.f32 %v1255_v10, %v1255_v10  ;;  %v1275_v13 = vmul.f32 0.7978846, %v1271_v9  ;;  %v1534_v9 = vld [vmem:[#allocation2 + $0x240] sm:$0xff]  ;;  %1514 = vmatpush.msra.mxu1 %v1499_v7 }
 0x8f5   :  { %v1282_v23 = vadd.f32 1.0, %v2925_v12  ;;  %1549 = vmatpush.msrb.mxu2 %v1534_v9  ;;  %v1498_v12 = vld [vmem:[#allocation2 + $0x1f8] sm:$0xff] }
 0x8f6   :  { %v1264_v14 = vmul.f32 %v1260_v50, %v1255_v10  ;;  %2926 = vtanh.f32 %v1275_v13  ;;  %v1533_v50 = vld [vmem:[#allocation2 + $0x238] sm:$0xff]  ;;  %1515 = vmatpush.msra.mxu1 %v1498_v12  ;;  %v1450_v13 = vld [vmem:[#allocation2 + $0x1b0] sm:$0xff] }
 0x8f7   :  { %v1286_v15 = vmul.f32 0.5, %v1282_v23  ;;  %1550 = vmatpush.msrb.mxu2 %v1533_v50  ;;  %v1497_v23 = vld [vmem:[#allocation2 + $0x1f0] sm:$0xff] }
 0x8f8   :  { %v1268_v51 = vmul.f32 0.044715, %v1264_v14  ;;  %v1532_v14 = vld [vmem:[#allocation2 + $0x230] sm:$0xff]  ;;  %1516 = vmatpush.msra.mxu1 %v1497_v23 }
 0x8f9   :  { %v1290_v16 = vmul.f32 %v1286_v15, %v1249_v54  ;;  %1551 = vmatpush.msrb.mxu2 %v1532_v14  ;;  %v1449_v15 = vld [vmem:[#allocation2 + $0x1a8] sm:$0xff]  ;;  %v2859_v14 = vld [vmem:[%s3679_s4 + $0x6] ss:$0 sm:$0xff] }
 0x8fa   :  { %v1272_v30 = vadd.f32 %v1268_v51, %v1255_v10  ;;  %v1496_v51 = vld [vmem:[#allocation2 + $0x1e8] sm:$0xff] }
 0x8fb   :  { %2755 = vmatmul.msk.f32.gmra.mxu3 %vm82_vm0, %v1290_v16  ;;  %v1531_v16 = vld [vmem:[#allocation2 + $0x228] sm:$0xff]  ;;  %1517 = vmatpush.msra.mxu1 %v1496_v51 }
 0x8fc   :  { %v2927_v21 = vpop.eup %2926  ;;  %v1276_v52 = vmul.f32 0.7978846, %v1272_v30  ;;  %1552 = vmatpush.msrb.mxu2 %v1531_v16 }
 0x8fd   :  { %v1283_v32 = vadd.f32 1.0, %v2927_v21 }
 0x8fe   :  { %2928 = vtanh.f32 %v1276_v52 }
 0x8ff   :  { %v1287_v24 = vmul.f32 0.5, %v1283_v32 }
 0x901   :  { %v1291_v25 = vmul.f32 %v1287_v24, %v1252_v2 }
 0x903   :  { %2756 = vmatmul.msk.f32.gmra.mxu3 %vm82_vm0, %v1291_v25 }
 0x904   :  { %v2929_v22 = vpop.eup %2928 }
 0x905   :  { %v1284_v19 = vadd.f32 1.0, %v2929_v22 }
 0x907   :  { %v1288_v29 = vmul.f32 0.5, %v1284_v19 }
 0x909   :  { %v1292_v31 = vmul.f32 %v1288_v29, %v1255_v10  ;;  %v1451_v10 = vld [vmem:[#allocation2 + $0x1b8] sm:$0xff] }
 0x90a   :  { %1480 = vmatpush.msra.mxu0 %v1451_v10 }
 0x90b   :  { %2757 = vmatmul.msk.f32.gmra.mxu3 %vm82_vm0, %v1292_v31 }
 0x90c   :  { %1481 = vmatpush.msra.mxu0 %v1450_v13 }
 0x90e   :  { %1482 = vmatpush.msra.mxu0 %v1449_v15 }
 0x96d   :  { %v1332_v33 = vpop.f32.mrf.mxu3 }
 0x96e   :  { %v1333_v27 = vadd.f32 %v2855_v18, %v1332_v33 }
 0x970   :  { %v1344_v35 = vadd.f32 %v1333_v27, %v3326_v61  ;;  %v2856_v27 = vld [vmem:[%s3679_s4 + $0x14] ss:$0 sm:$0xff] }
 0x972   :  { %v1350_v36 = vsel %vm176_vm5, %v1344_v35, 0.0 }
 0x973   :  { %1351 = vadd.xlane.f32.xlu0 %v1350_v36  ;;  %v2857_v36 = vld [vmem:[%s3679_s4 + $0x19] ss:$0 sm:$0xff] }
 0x97e   :  { %v1335_v37 = vpop.f32.mrf.mxu3 }
 0x97f   :  { %v1336_v38 = vadd.f32 %v2855_v18, %v1335_v37 }
 0x981   :  { %v1345_v39 = vadd.f32 %v1336_v38, %v3332_v20 }
 0x983   :  { %v1353_v40 = vsel %vm176_vm5, %v1345_v39, 0.0 }
 0x984   :  { %1354 = vadd.xlane.f32.xlu1 %v1353_v40 }
 0x986   :  { %v1338_v26 = vpop.f32.mrf.mxu3 }
 0x987   :  { %v1339_v41 = vadd.f32 %v2855_v18, %v1338_v26 }
 0x989   :  { %v1346_v42 = vadd.f32 %v1339_v41, %v3337_v28 }
 0x98b   :  { %v1356_v43 = vsel %vm176_vm5, %v1346_v42, 0.0 }
 0x98c   :  { %1357 = vadd.xlane.f32.xlu2 %v1356_v43 }
 0x98e   :  { %v1341_v44 = vpop.f32.mrf.mxu3 }
 0x98f   :  { %v1342_v45 = vadd.f32 %v2855_v18, %v1341_v44 }
 0x991   :  { %v1347_v61 = vadd.f32 %v1342_v45, %v3342_v34 }
 0x993   :  { %v1359_v46 = vsel %vm176_vm5, %v1347_v61, 0.0 }
 0x994   :  { %1360 = vadd.xlane.f32.xlu0 %v1359_v46 }
 0x9e6   :  { %v1352_v47 = vpop.xlane.xlu0 %1351 }
 0x9e7   :  { %v1362_v20 = vmul.f32 %v1352_v47, %v3093_v8 }
 0x9e9   :  { %v3365_v48 = vsub.f32 %v1344_v35, %v1362_v20 }
 0x9eb   :  { %v1370_v53 = vmul.f32 %v3365_v48, %v3365_v48 }
 0x9ed   :  { %v1374_v28 = vsel %vm176_vm5, %v1370_v53, 0.0 }
 0x9ee   :  { %1375 = vadd.xlane.f32.xlu1 %v1374_v28 }
 0x9f7   :  { %v1355_v54 = vpop.xlane.xlu1 %1354 }
 0x9f8   :  { %v1363_v55 = vmul.f32 %v1355_v54, %v3093_v8 }
 0x9fa   :  { %v3371_v56 = vsub.f32 %v1345_v39, %v1363_v55 }
 0x9fc   :  { %v1371_v34 = vmul.f32 %v3371_v56, %v3371_v56 }
 0x9fe   :  { %v1377_v57 = vsel %vm176_vm5, %v1371_v34, 0.0 }
 0x9ff   :  { %v1358_v58 = vpop.xlane.xlu2 %1357  ;;  %1378 = vadd.xlane.f32.xlu2 %v1377_v57 }
 0xa00   :  { %v1364_v59 = vmul.f32 %v1358_v58, %v3093_v8 }
 0xa02   :  { %v3377_v60 = vsub.f32 %v1346_v42, %v1364_v59 }
 0xa04   :  { %v1372_v62 = vmul.f32 %v3377_v60, %v3377_v60 }
 0xa06   :  { %v1380_v0 = vsel %vm176_vm5, %v1372_v62, 0.0 }
 0xa07   :  { %v1361_v1 = vpop.xlane.xlu0 %1360  ;;  %1381 = vadd.xlane.f32.xlu0 %v1380_v0 }
 0xa08   :  { %v1365_v2 = vmul.f32 %v1361_v1, %v3093_v8 }
 0xa0a   :  { %v3383_v3 = vsub.f32 %v1347_v61, %v1365_v2 }
 0xa0c   :  { %v1373_v4 = vmul.f32 %v3383_v3, %v3383_v3 }
 0xa0e   :  { %v1383_v6 = vsel %vm176_vm5, %v1373_v4, 0.0 }
 0xa0f   :  { %1384 = vadd.xlane.f32.xlu1 %v1383_v6 }
 0xa61   :  { %v1376_v30 = vpop.xlane.xlu1 %1375 }
 0xa62   :  { %v1386_v21 = vmul.f32 %v1376_v30, %v3093_v8 }
 0xa64   :  { %v1390_v52 = vadd.f32 1e-12, %v1386_v21 }
 0xa66   :  { %2930 = vrsqrt.f32 %v1390_v52  ;;  %vm1400_vm8 = vweird.f32 %v1390_v52 }
 0xa6c   :  { %v2931_v32 = vpop.eup %2930 }
 0xa6d   :  { %v1395_v24 = vmul.f32 %v2931_v32, %v1390_v52  ;;  %vm1401_vm7 = vweird.f32 %v2931_v32 }
 0xa6e   :  { %vm1402_vm9 = vmor %vm1400_vm8, %vm1401_vm7 }
 0xa6f   :  { %v1396_v25 = vmul.f32 %v2931_v32, %v1395_v24 }
 0xa71   :  { %v1397_v22 = vmul.f32 0.5, %v1396_v25 }
 0xa72   :  { %v1379_v19 = vpop.xlane.xlu2 %1378 }
 0xa73   :  { %v1398_v29 = vsub.f32 1.5, %v1397_v22  ;;  %v1387_v31 = vmul.f32 %v1379_v19, %v3093_v8  ;;  %v2860_v22 = vld [vmem:[%s3679_s4 + $0xa] ss:$0 sm:$0xff] }
 0xa75   :  { %v1399_v18 = vmul.f32 %v2931_v32, %v1398_v29  ;;  %v1391_v33 = vadd.f32 1e-12, %v1387_v31 }
 0xa77   :  { %v1403_v35 = vsel %vm1402_vm9, %v2931_v32, %v1399_v18  ;;  %2932 = vrsqrt.f32 %v1391_v33  ;;  %vm1410_vm11 = vweird.f32 %v1391_v33 }
 0xa78   :  { %v1434_v37 = vmul.f32 %v1403_v35, %v3365_v48 }
 0xa7a   :  { %v1439_v38 = vmul.f32 %v2856_v27, %v1434_v37  ;;  %v1382_v39 = vpop.xlane.xlu0 %1381 }
 0xa7b   :  { %v1388_v40 = vmul.f32 %v1382_v39, %v3093_v8 }
 0xa7c   :  { %v3398_v26 = vadd.f32 %v2857_v36, %v1439_v38 }
 0xa7d   :  { %v2933_v41 = vpop.eup %2932  ;;  %v1392_v42 = vadd.f32 1e-12, %v1388_v40 }
 0xa7e   :  { %v1405_v43 = vmul.f32 %v2933_v41, %v1391_v33  ;;  %2758 = vmatmul.msk.f32.vlgmr.msra.gmra.mxu0 %vm176_vm5, %v3398_v26  ;;  %2762 = vmatmul.msk.f32.vlgmr.msra.gmra.mxu1 %vm176_vm5, %v3398_v26  ;;  %vm1411_vm10 = vweird.f32 %v2933_v41 }
 0xa7f   :  { %2934 = vrsqrt.f32 %v1392_v42  ;;  %2766 = vmatmul.msk.f32.vlgmr.msrb.gmra.mxu2 %vm176_vm5, %v3398_v26  ;;  %vm1412_vm12 = vmor %vm1410_vm11, %vm1411_vm10  ;;  %vm1420_vm14 = vweird.f32 %v1392_v42 }
 0xa80   :  { %v1406_v44 = vmul.f32 %v2933_v41, %v1405_v43 }
 0xa82   :  { %v1407_v45 = vmul.f32 0.5, %v1406_v44  ;;  %v1385_v61 = vpop.xlane.xlu1 %1384 }
 0xa83   :  { %v1389_v46 = vmul.f32 %v1385_v61, %v3093_v8 }
 0xa84   :  { %v1408_v47 = vsub.f32 1.5, %v1407_v45 }
 0xa85   :  { %v2935_v20 = vpop.eup %2934  ;;  %v1393_v48 = vadd.f32 1e-12, %v1389_v46 }
 0xa86   :  { %v1409_v53 = vmul.f32 %v2933_v41, %v1408_v47  ;;  %v1415_v28 = vmul.f32 %v2935_v20, %v1392_v42  ;;  %vm1421_vm13 = vweird.f32 %v2935_v20 }
 0xa87   :  { %2936 = vrsqrt.f32 %v1393_v48  ;;  %vm1422_vm15 = vmor %vm1420_vm14, %vm1421_vm13  ;;  %vm1430_vm2 = vweird.f32 %v1393_v48 }
 0xa88   :  { %v1413_v54 = vsel %vm1412_vm12, %v2933_v41, %v1409_v53  ;;  %v1416_v55 = vmul.f32 %v2935_v20, %v1415_v28 }
 0xa89   :  { %v1435_v34 = vmul.f32 %v1413_v54, %v3371_v56 }
 0xa8a   :  { %v1417_v57 = vmul.f32 0.5, %v1416_v55 }
 0xa8b   :  { %v1440_v58 = vmul.f32 %v2856_v27, %v1435_v34 }
 0xa8c   :  { %v1418_v59 = vsub.f32 1.5, %v1417_v57 }
 0xa8d   :  { %v2937_v62 = vpop.eup %2936  ;;  %v3408_v0 = vadd.f32 %v2857_v36, %v1440_v58 }
 0xa8e   :  { %v1419_v1 = vmul.f32 %v2935_v20, %v1418_v59  ;;  %v1425_v2 = vmul.f32 %v2937_v62, %v1393_v48  ;;  %vm1431_vm1 = vweird.f32 %v2937_v62 }
 0xa8f   :  { %2759 = vmatmul.msk.f32.gmra.mxu0 %vm176_vm5, %v3408_v0  ;;  %2763 = vmatmul.msk.f32.gmra.mxu1 %vm176_vm5, %v3408_v0  ;;  %vm1432_vm3 = vmor %vm1430_vm2, %vm1431_vm1 }
 0xa90   :  { %v1423_v4 = vsel %vm1422_vm15, %v2935_v20, %v1419_v1  ;;  %v1426_v6 = vmul.f32 %v2937_v62, %v1425_v2  ;;  %2767 = vmatmul.msk.f32.gmra.mxu2 %vm176_vm5, %v3408_v0 }
 0xa91   :  { %v1436_v56 = vmul.f32 %v1423_v4, %v3377_v60 }
 0xa92   :  { %v1427_v49 = vmul.f32 0.5, %v1426_v6 }
 0xa93   :  { %v1441_v7 = vmul.f32 %v2856_v27, %v1436_v56 }
 0xa94   :  { %v1428_v9 = vsub.f32 1.5, %v1427_v49 }
 0xa95   :  { %v3417_v10 = vadd.f32 %v2857_v36, %v1441_v7 }
 0xa96   :  { %v1429_v12 = vmul.f32 %v2937_v62, %v1428_v9 }
 0xa97   :  { %2760 = vmatmul.msk.f32.gmra.mxu0 %vm176_vm5, %v3417_v10  ;;  %2764 = vmatmul.msk.f32.gmra.mxu1 %vm176_vm5, %v3417_v10 }
 0xa98   :  { %v1433_v50 = vsel %vm1432_vm3, %v2937_v62, %v1429_v12  ;;  %2768 = vmatmul.msk.f32.gmra.mxu2 %vm176_vm5, %v3417_v10 }
 0xa99   :  { %v1437_v60 = vmul.f32 %v1433_v50, %v3383_v3  ;;  %v2858_v3 = vld [vmem:[%s3679_s4 + $0x2] ss:$0 sm:$0xff] }
 0xa9b   :  { %v1442_v13 = vmul.f32 %v2856_v27, %v1437_v60 }
 0xa9d   :  { %v3426_v23 = vadd.f32 %v2857_v36, %v1442_v13 }
 0xa9f   :  { %2761 = vmatmul.msk.f32.gmra.mxu0 %vm176_vm5, %v3426_v23  ;;  %2765 = vmatmul.msk.f32.gmra.mxu1 %vm176_vm5, %v3426_v23 }
 0xaa0   :  { %2769 = vmatmul.msk.f32.gmra.mxu2 %vm176_vm5, %v3426_v23 }
 0xafb   :  { %v1519_v15 = vpop.f32.mrf.mxu1  ;;  %v1484_v51 = vpop.f32.mrf.mxu0 }
 0xafc   :  { %v1520_v16 = vadd.f32 %v2859_v14, %v1519_v15  ;;  %v1485_v30 = vadd.f32 %v2858_v3, %v1484_v51 }
 0xafe   :  { %2770 = vmatpush.xpose.msk.msrb.mxu0 %vm400_vm4, %v1520_v16 }
 0xb01   :  { %2771 = vmatmul.msk.f32.vlgmr.msrb.gmra.mxu0 %vm400_vm4, %v1485_v30 }
 0xb02   :  { %v1554_v21 = vpop.f32.mrf.mxu2 }
 0xb03   :  { %v1555_v33 = vadd.f32 %v2860_v22, %v1554_v21 }
 0xb0c   :  { %v1487_v52 = vpop.f32.mrf.mxu0  ;;  %v1522_v32 = vpop.f32.mrf.mxu1 }
 0xb0d   :  { %v1523_v24 = vadd.f32 %v2859_v14, %v1522_v32  ;;  %v1488_v25 = vadd.f32 %v2858_v3, %v1487_v52 }
 0xb0f   :  { %2772 = vmatpush.xpose.msk.msrb.mxu3 %vm400_vm4, %v1523_v24  ;;  %v1865_v24 = vld [vmem:[#allocation2 + $0x1e0] sm:$0xff] }
 0xb12   :  { %2773 = vmatmul.msk.f32.vlgmr.msrb.gmra.mxu3 %vm400_vm4, %v1488_v25  ;;  %v1864_v25 = vld [vmem:[#allocation2 + $0x1d8] sm:$0xff] }
 0xb13   :  { %v1557_v19 = vpop.f32.mrf.mxu2 }
 0xb14   :  { %v1490_v29 = vpop.f32.mrf.mxu0  ;;  %v1525_v31 = vpop.f32.mrf.mxu1  ;;  %v1558_v40 = vadd.f32 %v2860_v22, %v1557_v19 }
 0xb15   :  { %v1526_v18 = vadd.f32 %v2859_v14, %v1525_v31  ;;  %v1491_v27 = vadd.f32 %v2858_v3, %v1490_v29  ;;  %v1900_v31 = vld [vmem:[#allocation2 + $0x220] sm:$0xff] }
 0xb17   :  { %2774 = vmatpush.xpose.msk.msra.mxu0 %vm400_vm4, %v1526_v18  ;;  %v1862_v18 = vld [vmem:[#allocation2 + $0x1c8] sm:$0xff] }
 0xb1a   :  { %2775 = vmatmul.msk.f32.vlgmr.msra.gmra.mxu0 %vm400_vm4, %v1491_v27  ;;  %v1898_v27 = vld [vmem:[#allocation2 + $0x210] sm:$0xff] }
 0xb1b   :  { %1740 = vmatpush.msrb.mxu0 %v1555_v33  ;;  %v1560_v35 = vpop.f32.mrf.mxu2  ;;  %v1899_v33 = vld [vmem:[#allocation2 + $0x218] sm:$0xff] }
 0xb1c   :  { %v1561_v36 = vadd.f32 %v2860_v22, %v1560_v35  ;;  %v1528_v37 = vpop.f32.mrf.mxu1  ;;  %v1493_v38 = vpop.f32.mrf.mxu0  ;;  %v1897_v35 = vld [vmem:[#allocation2 + $0x208] sm:$0xff] }
 0xb1d   :  { %v1529_v39 = vadd.f32 %v2859_v14, %v1528_v37  ;;  %v1494_v41 = vadd.f32 %v2858_v3, %v1493_v38  ;;  %v1934_v37 = vld [vmem:[#allocation2 + $0x258] sm:$0xff]  ;;  %v1933_v38 = vld [vmem:[#allocation2 + $0x250] sm:$0xff] }
 0xb1e   :  { %1786 = vmatpush.msra.mxu0 %v1561_v36  ;;  %v1935_v36 = vld [vmem:[#allocation2 + $0x260] sm:$0xff] }
 0xb1f   :  { %2776 = vmatpush.xpose.msk.msra.mxu3 %vm400_vm4, %v1529_v39  ;;  %v1932_v39 = vld [vmem:[#allocation2 + $0x248] sm:$0xff] }
 0xb22   :  { %2777 = vmatmul.msk.f32.vlgmr.msra.gmra.mxu3 %vm400_vm4, %v1494_v41 }
 0xb23   :  { %1763 = vmatpush.msrb.mxu3 %v1558_v40  ;;  %v1563_v42 = vpop.f32.mrf.mxu2 }
 0xb24   :  { %v1564_v43 = vadd.f32 %v2860_v22, %v1563_v42  ;;  %v1863_v22 = vld [vmem:[#allocation2 + $0x1d0] sm:$0xff] }
 0xb25   :  { %1880 = vmatpush.msra.mxu3 %v1865_v24 }
 0xb26   :  { %1809 = vmatpush.msrb.mxu1 %v1564_v43 }
 0xb27   :  { %1881 = vmatpush.msra.mxu3 %v1864_v25 }
 0xb28   :  { %1950 = vmatpush.msra.mxu1 %v1935_v36 }
 0xb29   :  { %1882 = vmatpush.msra.mxu3 %v1863_v22 }
 0xb2a   :  { %1951 = vmatpush.msra.mxu1 %v1934_v37 }
 0xb2b   :  { %1883 = vmatpush.msra.mxu3 %v1862_v18 }
 0xb2c   :  { %1952 = vmatpush.msra.mxu1 %v1933_v38 }
 0xb2e   :  { %1953 = vmatpush.msra.mxu1 %v1932_v39 }
 0xb7e   :  { %v1589_v44 = vpop.f32.mrf.mxu0 }
 0xb7f   :  { %v1670_v45 = vmul.f32 0.25, %v1589_v44 }
 0xb81   :  { %v1674_v61 = vadd.f32 %v1670_v45, %v3185_v63 }
 0xb83   :  { %v1678_v46 = vsel %vm521_vm6, %v1674_v61, -inf }
 0xb84   :  { %1679 = vmax.xlane.f32.xlu2 %v1678_v46 }
 0xb95   :  { %v1615_v47 = vpop.f32.mrf.mxu3 }
 0xb96   :  { %v1671_v20 = vmul.f32 0.25, %v1615_v47 }
 0xb97   :  { %v1641_v48 = vpop.f32.mrf.mxu0 }
 0xb98   :  { %v1672_v53 = vmul.f32 0.25, %v1641_v48  ;;  %v1675_v28 = vadd.f32 %v1671_v20, %v3189_v5  ;;  %v1815_v20 = vld [vmem:[#allocation2 + $0x270] sm:$0xff]  ;;  %v1814_v48 = vld [vmem:[#allocation2 + $0x268] sm:$0xff] }
 0xb99   :  { %1842 = vmatpush.msra.mxu2 %v1815_v20 }
 0xb9a   :  { %v1681_v54 = vsel %vm521_vm6, %v1675_v28, -inf  ;;  %v1676_v55 = vadd.f32 %v1672_v53, %v3193_v11 }
 0xb9b   :  { %1682 = vmax.xlane.f32.xlu0 %v1681_v54  ;;  %1843 = vmatpush.msra.mxu2 %v1814_v48 }
 0xb9c   :  { %v1684_v34 = vsel %vm521_vm6, %v1676_v55, -inf }
 0xb9d   :  { %1685 = vmax.xlane.f32.xlu1 %v1684_v34 }
 0xba5   :  { %v1667_v57 = vpop.f32.mrf.mxu3 }
 0xba6   :  { %v1673_v58 = vmul.f32 0.25, %v1667_v57 }
 0xba8   :  { %v1677_v59 = vadd.f32 %v1673_v58, %v3195_v17 }
 0xbaa   :  { %v1687_v62 = vsel %vm521_vm6, %v1677_v59, -inf }
 0xbab   :  { %1688 = vmax.xlane.f32.xlu2 %v1687_v62 }
 0xbf7   :  { %v1680_v1 = vpop.xlane.xlu2 %1679 }
 0xbf8   :  { %v1690_v2 = vsub.f32 %v1674_v61, %v1680_v1 }
 0xbfa   :  { %v1694_v4 = vmul.f32 1.442695, %v1690_v2  ;;  %v2862_v2 = vld [vmem:[%s3679_s4 + $0x3] ss:$0 sm:$0xff] }
 0xbfc   :  { %2938 = vpow2.f32 %v1694_v4  ;;  %v2863_v4 = vld [vmem:[%s3679_s4 + $0xb] ss:$0 sm:$0xff] }
 0xc02   :  { %v2939_v6 = vpop.eup %2938 }
 0xc03   :  { %v1702_v56 = vsel %vm521_vm6, %v2939_v6, 0.0 }
 0xc04   :  { %1703 = vadd.xlane.f32.xlu0 %v1702_v56 }
 0xc0e   :  { %v1683_v49 = vpop.xlane.xlu0 %1682 }
 0xc0f   :  { %v1691_v7 = vsub.f32 %v1675_v28, %v1683_v49 }
 0xc10   :  { %v1686_v9 = vpop.xlane.xlu1 %1685 }
 0xc11   :  { %v1696_v12 = vmul.f32 1.442695, %v1691_v7  ;;  %v1692_v50 = vsub.f32 %v1676_v55, %v1686_v9  ;;  %v2861_v55 = vld [vmem:[%s3679_s4 + $0x7] ss:$0 sm:$0xff] }
 0xc13   :  { %2940 = vpow2.f32 %v1696_v12  ;;  %v1698_v60 = vmul.f32 1.442695, %v1692_v50 }
 0xc15   :  { %2942 = vpow2.f32 %v1698_v60 }
 0xc19   :  { %v2941_v13 = vpop.eup %2940 }
 0xc1a   :  { %v1705_v14 = vsel %vm521_vm6, %v2941_v13, 0.0 }
 0xc1b   :  { %v2943_v3 = vpop.eup %2942  ;;  %1706 = vadd.xlane.f32.xlu1 %v1705_v14 }
 0xc1c   :  { %v1708_v15 = vsel %vm521_vm6, %v2943_v3, 0.0 }
 0xc1d   :  { %1709 = vadd.xlane.f32.xlu2 %v1708_v15 }
 0xc1e   :  { %v1689_v51 = vpop.xlane.xlu2 %1688 }
 0xc1f   :  { %v1693_v16 = vsub.f32 %v1677_v59, %v1689_v51 }
 0xc21   :  { %v1700_v30 = vmul.f32 1.442695, %v1693_v16 }
 0xc23   :  { %2944 = vpow2.f32 %v1700_v30 }
 0xc29   :  { %v2945_v21 = vpop.eup %2944 }
 0xc2a   :  { %v1711_v52 = vsel %vm521_vm6, %v2945_v21, 0.0 }
 0xc2b   :  { %1712 = vadd.xlane.f32.xlu0 %v1711_v52 }
 0xc77   :  { %v1704_v32 = vpop.xlane.xlu0 %1703 }
 0xc78   :  { %2946 = vrcp.f32 %v1704_v32 }
 0xc7e   :  { %v2947_v19 = vpop.eup %2946 }
 0xc7f   :  { %v1718_v29 = vmul.f32 %v2947_v19, %v2939_v6 }
 0xc81   :  { %2778 = vmatmul.msk.f32.vlgmr.msrb.gmra.mxu0 %vm521_vm6, %v1718_v29 }
 0xc82   :  { %1915 = vmatpush.msrb.mxu0 %v1900_v31 }
 0xc84   :  { %1916 = vmatpush.msrb.mxu0 %v1899_v33 }
 0xc86   :  { %1917 = vmatpush.msrb.mxu0 %v1898_v27 }
 0xc88   :  { %1918 = vmatpush.msrb.mxu0 %v1897_v35 }
 0xc8e   :  { %v1707_v40 = vpop.xlane.xlu1 %1706 }
 0xc8f   :  { %2948 = vrcp.f32 %v1707_v40 }
 0xc90   :  { %v1710_v41 = vpop.xlane.xlu2 %1709 }
 0xc91   :  { %2950 = vrcp.f32 %v1710_v41 }
 0xc95   :  { %v2949_v42 = vpop.eup %2948 }
 0xc96   :  { %v1719_v43 = vmul.f32 %v2949_v42, %v2941_v13 }
 0xc97   :  { %v2951_v44 = vpop.eup %2950 }
 0xc98   :  { %v1720_v45 = vmul.f32 %v2951_v44, %v2943_v3  ;;  %2779 = vmatmul.msk.f32.vlgmr.msrb.gmra.mxu3 %vm521_vm6, %v1719_v43 }
 0xc9a   :  { %2780 = vmatmul.msk.f32.vlgmr.msra.gmra.mxu0 %vm521_vm6, %v1720_v45 }
 0xc9e   :  { %v1713_v61 = vpop.xlane.xlu0 %1712 }
 0xc9f   :  { %2952 = vrcp.f32 %v1713_v61 }
 0xca0   :  { %2786 = vmatmul.msk.f32.vlgmr.msra.gmra.mxu3 %vm176_vm5, %v3398_v26 }
 0xca2   :  { %2790 = vmatmul.msk.f32.vlgmr.msrb.gmra.mxu0 %vm176_vm5, %v3398_v26 }
 0xca5   :  { %v2953_v46 = vpop.eup %2952 }
 0xca6   :  { %v1721_v47 = vmul.f32 %v2953_v46, %v2945_v21 }
 0xca8   :  { %2781 = vmatmul.msk.f32.vlgmr.msrb.gmra.mxu1 %vm521_vm6, %v1721_v47  ;;  %2787 = vmatmul.msk.f32.gmra.mxu3 %vm176_vm5, %v3408_v0 }
 0xcaa   :  { %2791 = vmatmul.msk.f32.gmra.mxu0 %vm176_vm5, %v3408_v0 }
 0xcb0   :  { %2788 = vmatmul.msk.f32.gmra.mxu3 %vm176_vm5, %v3417_v10  ;;  %2794 = vmatmul.msk.f32.vlgmr.msra.gmra.mxu1 %vm176_vm5, %v3398_v26 }
 0xcb2   :  { %2792 = vmatmul.msk.f32.gmra.mxu0 %vm176_vm5, %v3417_v10 }
 0xcb8   :  { %2789 = vmatmul.msk.f32.gmra.mxu3 %vm176_vm5, %v3426_v23  ;;  %2795 = vmatmul.msk.f32.gmra.mxu1 %vm176_vm5, %v3408_v0 }
 0xcba   :  { %2793 = vmatmul.msk.f32.gmra.mxu0 %vm176_vm5, %v3426_v23 }
 0xcc0   :  { %2796 = vmatmul.msk.f32.gmra.mxu1 %vm176_vm5, %v3417_v10 }
 0xcc8   :  { %2797 = vmatmul.msk.f32.gmra.mxu1 %vm176_vm5, %v3426_v23 }
 0xcfe   :  { %v1742_v53 = vpop.f32.mrf.mxu0 }
 0xcff   :  { %2782 = vmatmul.msk.f32.vlgmr.msra.gmra.mxu2 %vm400_vm4, %v1742_v53 }
 0xd17   :  { %v1788_v28 = vpop.f32.mrf.mxu0 }
 0xd1b   :  { %v1765_v54 = vpop.f32.mrf.mxu3 }
 0xd1c   :  { %2783 = vmatmul.msk.f32.gmra.mxu2 %vm400_vm4, %v1765_v54 }
 0xd1f   :  { %v1920_v34 = vpop.f32.mrf.mxu0 }
 0xd20   :  { %v1921_v57 = vadd.f32 %v2861_v55, %v1920_v34 }
 0xd22   :  { %2798 = vmatpush.xpose.msk.msrb.mxu2 %vm400_vm4, %v1921_v57 }
 0xd23   :  { %v1885_v58 = vpop.f32.mrf.mxu3 }
 0xd24   :  { %2784 = vmatmul.msk.f32.gmra.mxu2 %vm400_vm4, %v1788_v28  ;;  %v1886_v50 = vadd.f32 %v2862_v2, %v1885_v58 }
 0xd25   :  { %v1811_v59 = vpop.f32.mrf.mxu1 }
 0xd27   :  { %v1923_v62 = vpop.f32.mrf.mxu0 }
 0xd28   :  { %v1924_v1 = vadd.f32 %v2861_v55, %v1923_v62 }
 0xd2a   :  { %2800 = vmatpush.xpose.msk.msrb.mxu3 %vm400_vm4, %v1924_v1 }
 0xd2b   :  { %v1888_v6 = vpop.f32.mrf.mxu3 }
 0xd2c   :  { %v1889_v56 = vadd.f32 %v2862_v2, %v1888_v6  ;;  %2785 = vmatmul.msk.f32.gmra.mxu2 %vm400_vm4, %v1811_v59 }
 0xd2d   :  { %v1955_v49 = vpop.f32.mrf.mxu1 }
 0xd2e   :  { %v1956_v7 = vadd.f32 %v2863_v4, %v1955_v49  ;;  %2801 = vmatmul.msk.f32.vlgmr.msrb.gmra.mxu3 %vm400_vm4, %v1889_v56 }
 0xd2f   :  { %v1926_v9 = vpop.f32.mrf.mxu0 }
 0xd30   :  { %v1927_v12 = vadd.f32 %v2861_v55, %v1926_v9  ;;  %2141 = vmatpush.msra.mxu2 %v1956_v7 }
 0xd32   :  { %2802 = vmatpush.xpose.msk.msra.mxu0 %vm400_vm4, %v1927_v12 }
 0xd33   :  { %v1891_v60 = vpop.f32.mrf.mxu3 }
 0xd34   :  { %v1892_v13 = vadd.f32 %v2862_v2, %v1891_v60  ;;  %2799 = vmatmul.msk.f32.vlgmr.msrb.gmra.mxu2 %vm400_vm4, %v1886_v50 }
 0xd35   :  { %v1958_v14 = vpop.f32.mrf.mxu1 }
 0xd36   :  { %v1959_v3 = vadd.f32 %v2863_v4, %v1958_v14  ;;  %2803 = vmatmul.msk.f32.vlgmr.msra.gmra.mxu0 %vm400_vm4, %v1892_v13 }
 0xd37   :  { %v1929_v15 = vpop.f32.mrf.mxu0 }
 0xd38   :  { %v1930_v51 = vadd.f32 %v2861_v55, %v1929_v15  ;;  %2164 = vmatpush.msra.mxu3 %v1959_v3 }
 0xd3a   :  { %2804 = vmatpush.xpose.msk.msrb.mxu1 %vm400_vm4, %v1930_v51  ;;  %v2216_v51 = vld [vmem:[#allocation2 + $0x280] sm:$0xff] }
 0xd3b   :  { %v1894_v16 = vpop.f32.mrf.mxu3  ;;  %2243 = vmatpush.msrb.mxu2 %v2216_v51 }
 0xd3c   :  { %v1895_v30 = vadd.f32 %v2862_v2, %v1894_v16  ;;  %v2215_v16 = vld [vmem:[#allocation2 + $0x278] sm:$0xff] }
 0xd3d   :  { %v1961_v21 = vpop.f32.mrf.mxu1  ;;  %2244 = vmatpush.msrb.mxu2 %v2215_v16 }
 0xd3e   :  { %v1962_v52 = vadd.f32 %v2863_v4, %v1961_v21  ;;  %2805 = vmatmul.msk.f32.vlgmr.msrb.gmra.mxu1 %vm400_vm4, %v1895_v30 }
 0xd40   :  { %2187 = vmatpush.msrb.mxu0 %v1962_v52 }
 0xd45   :  { %v1964_v32 = vpop.f32.mrf.mxu1 }
 0xd46   :  { %v1965_v24 = vadd.f32 %v2863_v4, %v1964_v32 }
 0xd48   :  { %2210 = vmatpush.msra.mxu1 %v1965_v24  ;;  %v2864_v24 = vld [vmem:[%s3679_s4 + $0xd] ss:$0 sm:$0xff] }
 0xd82   :  { %v3512_v25 = vpop.f32.mrf.mxu2 }
 0xd9f   :  { %v3514_v22 = vpop.f32.mrf.mxu2 }
 0xda7   :  { %v3516_v19 = vpop.f32.mrf.mxu2 }
 0xdaf   :  { %v3518_v29 = vpop.f32.mrf.mxu2 }
 0xdb1   :  { %v2016_v31 = vpop.f32.mrf.mxu3 }
 0xdb2   :  { %v2072_v18 = vmul.f32 0.25, %v2016_v31  ;;  %v1858_v31 = vadd.f32 %v2864_v24, %v3512_v25 }
 0xdb3   :  { %v2042_v33 = vpop.f32.mrf.mxu0 }
 0xdb4   :  { %v2073_v27 = vmul.f32 0.25, %v2042_v33  ;;  %v2076_v35 = vadd.f32 %v2072_v18, %v3189_v5 }
 0xdb6   :  { %v2082_v36 = vsel %vm521_vm6, %v2076_v35, -inf  ;;  %v2077_v37 = vadd.f32 %v2073_v27, %v3193_v11 }
 0xdb7   :  { %2083 = vmax.xlane.f32.xlu2 %v2082_v36  ;;  %v1990_v38 = vpop.f32.mrf.mxu2  ;;  %v1859_v36 = vadd.f32 %v2864_v24, %v3514_v22 }
 0xdb8   :  { %v2071_v39 = vmul.f32 0.25, %v1990_v38  ;;  %v2085_v40 = vsel %vm521_vm6, %v2077_v37, -inf }
 0xdb9   :  { %2086 = vmax.xlane.f32.xlu0 %v2085_v40 }
 0xdba   :  { %v2075_v41 = vadd.f32 %v2071_v39, %v3185_v63 }
 0xdbb   :  { %v2068_v42 = vpop.f32.mrf.mxu1 }
 0xdbc   :  { %v2074_v43 = vmul.f32 0.25, %v2068_v42  ;;  %v2079_v44 = vsel %vm521_vm6, %v2075_v41, -inf }
 0xdbd   :  { %2080 = vmax.xlane.f32.xlu1 %v2079_v44  ;;  %v1861_v44 = vadd.f32 %v2864_v24, %v3518_v29 }
 0xdbe   :  { %v2078_v45 = vadd.f32 %v2074_v43, %v3195_v17 }
 0xdc0   :  { %v2088_v5 = vsel %vm521_vm6, %v2078_v45, -inf }
 0xdc5   :  { %2089 = vmax.xlane.f32.xlu1 %v2088_v5 }
 0xe2a   :  { %v2084_v61 = vpop.xlane.xlu2 %2083 }
 0xe2b   :  { %v2092_v11 = vsub.f32 %v2076_v35, %v2084_v61 }
 0xe2c   :  { %v2087_v46 = vpop.xlane.xlu0 %2086 }
 0xe2d   :  { %v2097_v47 = vmul.f32 1.442695, %v2092_v11  ;;  %v2093_v20 = vsub.f32 %v2077_v37, %v2087_v46 }
 0xe2f   :  { %2954 = vpow2.f32 %v2097_v47  ;;  %v2099_v48 = vmul.f32 1.442695, %v2093_v20 }
 0xe30   :  { %v2081_v53 = vpop.xlane.xlu1 %2080 }
 0xe31   :  { %2956 = vpow2.f32 %v2099_v48  ;;  %v2091_v63 = vsub.f32 %v2075_v41, %v2081_v53  ;;  %v1860_v41 = vadd.f32 %v2864_v24, %v3516_v19 }
 0xe33   :  { %v2095_v28 = vmul.f32 1.442695, %v2091_v63 }
 0xe35   :  { %v2955_v54 = vpop.eup %2954  ;;  %2958 = vpow2.f32 %v2095_v28 }
 0xe36   :  { %v2106_v55 = vsel %vm521_vm6, %v2955_v54, 0.0 }
 0xe37   :  { %v2957_v34 = vpop.eup %2956  ;;  %2107 = vadd.xlane.f32.xlu0 %v2106_v55 }
 0xe38   :  { %v2090_v17 = vpop.xlane.xlu1 %2089  ;;  %v2109_v57 = vsel %vm521_vm6, %v2957_v34, 0.0 }
 0xe39   :  { %v2094_v58 = vsub.f32 %v2078_v45, %v2090_v17  ;;  %2110 = vadd.xlane.f32.xlu1 %v2109_v57 }
 0xe3b   :  { %v2959_v59 = vpop.eup %2958  ;;  %v2101_v62 = vmul.f32 1.442695, %v2094_v58 }
 0xe3c   :  { %v2103_v1 = vsel %vm521_vm6, %v2959_v59, 0.0 }
 0xe3d   :  { %2960 = vpow2.f32 %v2101_v62  ;;  %2104 = vadd.xlane.f32.xlu2 %v2103_v1  ;;  %v2369_v62 = vld [vmem:[#allocation2 + $0x2a0] sm:$0xff]  ;;  %v2368_v1 = vld [vmem:[#allocation2 + $0x298] sm:$0xff] }
 0xe3e   :  { %2396 = vmatpush.msrb.mxu3 %v2369_v62  ;;  %v2452_v62 = vld [vmem:[#allocation2 + $0x2c0] sm:$0xff] }
 0xe40   :  { %2397 = vmatpush.msrb.mxu3 %v2368_v1  ;;  %v2451_v1 = vld [vmem:[#allocation2 + $0x2b8] sm:$0xff] }
 0xe43   :  { %v2961_v2 = vpop.eup %2960 }
 0xe44   :  { %v2112_v4 = vsel %vm521_vm6, %v2961_v2, 0.0 }
 0xe45   :  { %2113 = vadd.xlane.f32.xlu2 %v2112_v4  ;;  %v2366_v4 = vld [vmem:[#allocation2 + $0x288] sm:$0xff] }
 0xeaa   :  { %v2108_v6 = vpop.xlane.xlu0 %2107 }
 0xeab   :  { %2962 = vrcp.f32 %v2108_v6 }
 0xeac   :  { %v2111_v56 = vpop.xlane.xlu1 %2110 }
 0xead   :  { %2964 = vrcp.f32 %v2111_v56 }
 0xeb0   :  { %v2105_v49 = vpop.xlane.xlu2 %2104 }
 0xeb1   :  { %v2963_v7 = vpop.eup %2962  ;;  %2966 = vrcp.f32 %v2105_v49 }
 0xeb2   :  { %v2120_v9 = vmul.f32 %v2963_v7, %v2955_v54 }
 0xeb3   :  { %v2965_v12 = vpop.eup %2964 }
 0xeb4   :  { %v2121_v50 = vmul.f32 %v2965_v12, %v2957_v34  ;;  %2807 = vmatmul.msk.f32.vlgmr.msra.gmra.mxu3 %vm521_vm6, %v2120_v9 }
 0xeb6   :  { %2808 = vmatmul.msk.f32.vlgmr.msrb.gmra.mxu0 %vm521_vm6, %v2121_v50 }
 0xeb7   :  { %v2967_v60 = vpop.eup %2966 }
 0xeb8   :  { %v2119_v13 = vmul.f32 %v2967_v60, %v2959_v59  ;;  %v2114_v14 = vpop.xlane.xlu2 %2113 }
 0xeb9   :  { %2968 = vrcp.f32 %v2114_v14 }
 0xeba   :  { %2806 = vmatmul.msk.f32.vlgmr.msra.gmra.mxu2 %vm521_vm6, %v2119_v13 }
 0xebf   :  { %v2969_v3 = vpop.eup %2968 }
 0xec0   :  { %v2122_v15 = vmul.f32 %v2969_v3, %v2961_v2  ;;  %v2367_v2 = vld [vmem:[#allocation2 + $0x290] sm:$0xff] }
 0xec1   :  { %2398 = vmatpush.msrb.mxu3 %v2367_v2  ;;  %v2450_v2 = vld [vmem:[#allocation2 + $0x2b0] sm:$0xff] }
 0xec2   :  { %2809 = vmatmul.msk.f32.vlgmr.msra.gmra.mxu1 %vm521_vm6, %v2122_v15 }
 0xec3   :  { %2399 = vmatpush.msrb.mxu3 %v2366_v4  ;;  %v2867_v4 = vld [vmem:[%s3679_s4 + $0xf] ss:$0 sm:$0xff] }
 0xf33   :  { %v2189_v52 = vpop.f32.mrf.mxu0 }
 0xf37   :  { %v2166_v21 = vpop.f32.mrf.mxu3 }
 0xf3d   :  { %v2143_v30 = vpop.f32.mrf.mxu2 }
 0xf3e   :  { %2810 = vmatmul.msk.f32.vlgmr.msrb.gmra.mxu2 %vm400_vm4, %v2143_v30 }
 0xf3f   :  { %v2212_v32 = vpop.f32.mrf.mxu1 }
 0xf46   :  { %2811 = vmatmul.msk.f32.gmra.mxu2 %vm400_vm4, %v2166_v21 }
 0xf4e   :  { %2812 = vmatmul.msk.f32.gmra.mxu2 %vm400_vm4, %v2189_v52 }
 0xf56   :  { %2813 = vmatmul.msk.f32.gmra.mxu2 %vm400_vm4, %v2212_v32  ;;  %v2865_v32 = vld [vmem:[%s3679_s4 + $0x15] ss:$0 sm:$0xff] }
 0xfc1   :  { %v2246_v18 = vpop.f32.mrf.mxu2 }
 0xfc2   :  { %v2258_v33 = vadd.f32 %v2246_v18, %v1858_v31  ;;  %v2866_v18 = vld [vmem:[%s3679_s4 + $0x1a] ss:$0 sm:$0xff] }
 0xfc4   :  { %v2262_v27 = vadd.f32 %v2258_v33, %v3398_v26 }
 0xfc6   :  { %v2268_v35 = vsel %vm176_vm5, %v2262_v27, 0.0 }
 0xfc7   :  { %2269 = vadd.xlane.f32.xlu0 %v2268_v35 }
 0xfc9   :  { %v2249_v37 = vpop.f32.mrf.mxu2 }
 0xfca   :  { %v2259_v38 = vadd.f32 %v2249_v37, %v1859_v36 }
 0xfcc   :  { %v2263_v39 = vadd.f32 %v2259_v38, %v3408_v0 }
 0xfce   :  { %v2271_v40 = vsel %vm176_vm5, %v2263_v39, 0.0 }
 0xfcf   :  { %2272 = vadd.xlane.f32.xlu1 %v2271_v40 }
 0xfd1   :  { %v2252_v42 = vpop.f32.mrf.mxu2 }
 0xfd2   :  { %v2260_v25 = vadd.f32 %v2252_v42, %v1860_v41 }
 0xfd4   :  { %v2264_v43 = vadd.f32 %v2260_v25, %v3417_v10 }
 0xfd6   :  { %v2274_v26 = vsel %vm176_vm5, %v2264_v43, 0.0 }
 0xfd7   :  { %2275 = vadd.xlane.f32.xlu2 %v2274_v26 }
 0xfd9   :  { %v2255_v45 = vpop.f32.mrf.mxu2 }
 0xfda   :  { %v2261_v22 = vadd.f32 %v2255_v45, %v1861_v44 }
 0xfdc   :  { %v2265_v5 = vadd.f32 %v2261_v22, %v3426_v23 }
 0xfde   :  { %v2277_v0 = vsel %vm176_vm5, %v2265_v5, 0.0 }
 0xfdf   :  { %2278 = vadd.xlane.f32.xlu0 %v2277_v0 }
0x103a   :  { %v2270_v61 = vpop.xlane.xlu0 %2269 }
0x103b   :  { %v2280_v11 = vmul.f32 %v2270_v61, %v3093_v8 }
0x103d   :  { %v2284_v19 = vsub.f32 %v2262_v27, %v2280_v11 }
0x103f   :  { %v2288_v46 = vmul.f32 %v2284_v19, %v2284_v19 }
0x1041   :  { %v2292_v47 = vsel %vm176_vm5, %v2288_v46, 0.0 }
0x1042   :  { %2293 = vadd.xlane.f32.xlu1 %v2292_v47  ;;  %v2273_v10 = vpop.xlane.xlu1 %2272 }
0x1043   :  { %v2281_v20 = vmul.f32 %v2273_v10, %v3093_v8 }
0x1045   :  { %v3558_v48 = vsub.f32 %v2263_v39, %v2281_v20 }
0x1047   :  { %v2289_v29 = vmul.f32 %v3558_v48, %v3558_v48 }
0x1049   :  { %v2295_v23 = vsel %vm176_vm5, %v2289_v29, 0.0 }
0x104a   :  { %v2276_v53 = vpop.xlane.xlu2 %2275  ;;  %2296 = vadd.xlane.f32.xlu2 %v2295_v23 }
0x104b   :  { %v2282_v63 = vmul.f32 %v2276_v53, %v3093_v8 }
0x104d   :  { %v3564_v28 = vsub.f32 %v2264_v43, %v2282_v63 }
0x104f   :  { %v2290_v54 = vmul.f32 %v3564_v28, %v3564_v28 }
0x1051   :  { %v2298_v55 = vsel %vm176_vm5, %v2290_v54, 0.0 }
0x1052   :  { %2299 = vadd.xlane.f32.xlu0 %v2298_v55  ;;  %v2279_v34 = vpop.xlane.xlu0 %2278 }
0x1053   :  { %v2283_v17 = vmul.f32 %v2279_v34, %v3093_v8 }
0x1055   :  { %v3570_v57 = vsub.f32 %v2265_v5, %v2283_v17  ;;  %v2455_v17 = vld [vmem:[#allocation2 + $0x2d8] sm:$0xff] }
0x1057   :  { %v2291_v58 = vmul.f32 %v3570_v57, %v3570_v57 }
0x1059   :  { %v2301_v59 = vsel %vm176_vm5, %v2291_v58, 0.0  ;;  %v2454_v58 = vld [vmem:[#allocation2 + $0x2d0] sm:$0xff] }
0x105a   :  { %2302 = vadd.xlane.f32.xlu1 %v2301_v59  ;;  %v2453_v59 = vld [vmem:[#allocation2 + $0x2c8] sm:$0xff] }
0x10b5   :  { %v2294_v6 = vpop.xlane.xlu1 %2293 }
0x10b6   :  { %v2304_v56 = vmul.f32 %v2294_v6, %v3093_v8 }
0x10b8   :  { %v2308_v49 = vadd.f32 1e-12, %v2304_v56 }
0x10ba   :  { %2970 = vrsqrt.f32 %v2308_v49  ;;  %vm2318_vm6 = vweird.f32 %v2308_v49 }
0x10bd   :  { %v2297_v7 = vpop.xlane.xlu2 %2296 }
0x10be   :  { %v2305_v9 = vmul.f32 %v2297_v7, %v3093_v8 }
0x10c0   :  { %v2971_v12 = vpop.eup %2970  ;;  %v2309_v50 = vadd.f32 1e-12, %v2305_v9 }
0x10c1   :  { %v2313_v60 = vmul.f32 %v2971_v12, %v2308_v49  ;;  %vm2319_vm4 = vweird.f32 %v2971_v12 }
0x10c2   :  { %2972 = vrsqrt.f32 %v2309_v50  ;;  %vm2320_vm7 = vmor %vm2318_vm6, %vm2319_vm4  ;;  %vm2328_vm9 = vweird.f32 %v2309_v50 }
0x10c3   :  { %v2314_v13 = vmul.f32 %v2971_v12, %v2313_v60 }
0x10c5   :  { %v2315_v14 = vmul.f32 0.5, %v2314_v13  ;;  %v2300_v3 = vpop.xlane.xlu0 %2299 }
0x10c6   :  { %v2306_v15 = vmul.f32 %v2300_v3, %v3093_v8 }
0x10c7   :  { %v2316_v51 = vsub.f32 1.5, %v2315_v14 }
0x10c8   :  { %v2973_v16 = vpop.eup %2972  ;;  %v2310_v30 = vadd.f32 1e-12, %v2306_v15 }
0x10c9   :  { %v2317_v21 = vmul.f32 %v2971_v12, %v2316_v51  ;;  %v2323_v52 = vmul.f32 %v2973_v16, %v2309_v50  ;;  %vm2329_vm8 = vweird.f32 %v2973_v16 }
0x10ca   :  { %2974 = vrsqrt.f32 %v2310_v30  ;;  %vm2330_vm10 = vmor %vm2328_vm9, %vm2329_vm8  ;;  %vm2338_vm12 = vweird.f32 %v2310_v30 }
0x10cb   :  { %v2321_v24 = vsel %vm2320_vm7, %v2971_v12, %v2317_v21  ;;  %v2324_v31 = vmul.f32 %v2973_v16, %v2323_v52 }
0x10cc   :  { %v2352_v33 = vmul.f32 %v2321_v24, %v2284_v19 }
0x10cd   :  { %v2325_v27 = vmul.f32 0.5, %v2324_v31  ;;  %v2303_v35 = vpop.xlane.xlu1 %2302 }
0x10ce   :  { %v2357_v36 = vmul.f32 %v2865_v32, %v2352_v33  ;;  %v2307_v37 = vmul.f32 %v2303_v35, %v3093_v8 }
0x10cf   :  { %v2326_v38 = vsub.f32 1.5, %v2325_v27 }
0x10d0   :  { %v2975_v39 = vpop.eup %2974  ;;  %v3585_v40 = vadd.f32 %v2866_v18, %v2357_v36  ;;  %v2311_v41 = vadd.f32 1e-12, %v2307_v37 }
0x10d1   :  { %v2327_v42 = vmul.f32 %v2973_v16, %v2326_v38  ;;  %v2333_v25 = vmul.f32 %v2975_v39, %v2310_v30  ;;  %vm2339_vm11 = vweird.f32 %v2975_v39 }
0x10d2   :  { %2976 = vrsqrt.f32 %v2311_v41  ;;  %2814 = vmatmul.msk.f32.vlgmr.msrb.gmra.mxu3 %vm176_vm5, %v3585_v40  ;;  %vm2340_vm13 = vmor %vm2338_vm12, %vm2339_vm11  ;;  %vm2348_vm15 = vweird.f32 %v2311_v41 }
0x10d3   :  { %v2331_v43 = vsel %vm2330_vm10, %v2973_v16, %v2327_v42  ;;  %v2334_v26 = vmul.f32 %v2975_v39, %v2333_v25 }
0x10d4   :  { %v2353_v44 = vmul.f32 %v2331_v43, %v3558_v48 }
0x10d5   :  { %v2335_v45 = vmul.f32 0.5, %v2334_v26 }
0x10d6   :  { %v2358_v22 = vmul.f32 %v2865_v32, %v2353_v44 }
0x10d7   :  { %v2336_v5 = vsub.f32 1.5, %v2335_v45 }
0x10d8   :  { %v2977_v0 = vpop.eup %2976  ;;  %v3590_v61 = vadd.f32 %v2866_v18, %v2358_v22 }
0x10d9   :  { %v2337_v11 = vmul.f32 %v2975_v39, %v2336_v5  ;;  %v2343_v19 = vmul.f32 %v2977_v0, %v2311_v41  ;;  %vm2349_vm14 = vweird.f32 %v2977_v0 }
0x10da   :  { %2815 = vmatmul.msk.f32.gmra.mxu3 %vm176_vm5, %v3590_v61  ;;  %vm2350_vm1 = vmor %vm2348_vm15, %vm2349_vm14  ;;  %vm2615_vm14 = vcmask 1041409   ;;  %vm2618_vm15 = vcmask 1042434  }
0x10db   :  { %v2341_v46 = vsel %vm2340_vm13, %v2975_v39, %v2337_v11  ;;  %v2344_v47 = vmul.f32 %v2977_v0, %v2343_v19 }
0x10dc   :  { %v2354_v10 = vmul.f32 %v2341_v46, %v3564_v28  ;;  %v2456_v28 = vld [vmem:[#allocation2 + $0x2e0] sm:$0xff] }
0x10dd   :  { %v2345_v20 = vmul.f32 0.5, %v2344_v47  ;;  %2479 = vmatpush.msra.mxu0 %v2456_v28 }
0x10de   :  { %v2359_v48 = vmul.f32 %v2865_v32, %v2354_v10 }
0x10df   :  { %v2346_v29 = vsub.f32 1.5, %v2345_v20  ;;  %2480 = vmatpush.msra.mxu0 %v2455_v17 }
0x10e0   :  { %v3595_v23 = vadd.f32 %v2866_v18, %v2359_v48  ;;  %v2868_v48 = vld [vmem:[%s3679_s4 + $0x11] ss:$0 sm:$0xff] }
0x10e1   :  { %v2347_v53 = vmul.f32 %v2977_v0, %v2346_v29  ;;  %2481 = vmatpush.msra.mxu0 %v2454_v58 }
0x10e2   :  { %2816 = vmatmul.msk.f32.gmra.mxu3 %vm176_vm5, %v3595_v23 }
0x10e3   :  { %v2351_v63 = vsel %vm2350_vm1, %v2977_v0, %v2347_v53  ;;  %2482 = vmatpush.msra.mxu0 %v2453_v59  ;;  %vm2621_vm1 = vcmask 1043459  }
0x10e4   :  { %v2355_v54 = vmul.f32 %v2351_v63, %v3570_v57  ;;  %v2449_v57 = vld [vmem:[#allocation2 + $0x2a8] sm:$0xff] }
0x10e5   :  { %2483 = vmatpush.msra.mxu0 %v2452_v62 }
0x10e6   :  { %v2360_v55 = vmul.f32 %v2865_v32, %v2355_v54 }
0x10e7   :  { %2484 = vmatpush.msra.mxu0 %v2451_v1 }
0x10e8   :  { %v3600_v34 = vadd.f32 %v2866_v18, %v2360_v55 }
0x10e9   :  { %2485 = vmatpush.msra.mxu0 %v2450_v2 }
0x10ea   :  { %2817 = vmatmul.msk.f32.gmra.mxu3 %vm176_vm5, %v3600_v34 }
0x10eb   :  { %2486 = vmatpush.msra.mxu0 %v2449_v57 }
0x1155   :  { %v2401_v6 = vpop.f32.mrf.mxu3 }
0x1156   :  { %v2402_v56 = vadd.f32 %v2867_v4, %v2401_v6 }
0x1158   :  { %v2413_v49 = vmul.f32 %v2402_v56, %v2402_v56 }
0x115a   :  { %v2417_v7 = vmul.f32 %v2413_v49, %v2402_v56 }
0x115c   :  { %v2421_v9 = vmul.f32 0.044715, %v2417_v7 }
0x115d   :  { %v2404_v12 = vpop.f32.mrf.mxu3 }
0x115e   :  { %v2425_v50 = vadd.f32 %v2421_v9, %v2402_v56  ;;  %v2405_v60 = vadd.f32 %v2867_v4, %v2404_v12 }
0x1160   :  { %v2429_v13 = vmul.f32 0.7978846, %v2425_v50  ;;  %v2414_v14 = vmul.f32 %v2405_v60, %v2405_v60 }
0x1162   :  { %2978 = vtanh.f32 %v2429_v13  ;;  %v2418_v3 = vmul.f32 %v2414_v14, %v2405_v60 }
0x1164   :  { %v2422_v15 = vmul.f32 0.044715, %v2418_v3 }
0x1165   :  { %v2407_v51 = vpop.f32.mrf.mxu3 }
0x1166   :  { %v2426_v16 = vadd.f32 %v2422_v15, %v2405_v60  ;;  %v2408_v30 = vadd.f32 %v2867_v4, %v2407_v51 }
0x1168   :  { %v2979_v21 = vpop.eup %2978  ;;  %v2430_v52 = vmul.f32 0.7978846, %v2426_v16  ;;  %v2415_v32 = vmul.f32 %v2408_v30, %v2408_v30 }
0x1169   :  { %v2437_v24 = vadd.f32 1.0, %v2979_v21 }
0x116a   :  { %2980 = vtanh.f32 %v2430_v52  ;;  %v2419_v31 = vmul.f32 %v2415_v32, %v2408_v30 }
0x116b   :  { %v2441_v18 = vmul.f32 0.5, %v2437_v24  ;;  %v2647_v24 = vld [vmem:[%s3679_s4 + $0x1e] sm:$0x1] }
0x116c   :  { %v2423_v33 = vmul.f32 0.044715, %v2419_v31 }
0x116d   :  { %v2445_v27 = vmul.f32 %v2441_v18, %v2402_v56  ;;  %v2410_v35 = vpop.f32.mrf.mxu3 }
0x116e   :  { %v2427_v36 = vadd.f32 %v2423_v33, %v2408_v30  ;;  %v2411_v37 = vadd.f32 %v2867_v4, %v2410_v35 }
0x116f   :  { %2818 = vmatmul.msk.f32.vlgmr.msra.gmra.mxu0 %vm82_vm0, %v2445_v27 }
0x1170   :  { %v2981_v38 = vpop.eup %2980  ;;  %v2431_v39 = vmul.f32 0.7978846, %v2427_v36  ;;  %v2416_v41 = vmul.f32 %v2411_v37, %v2411_v37 }
0x1171   :  { %v2438_v42 = vadd.f32 1.0, %v2981_v38 }
0x1172   :  { %2982 = vtanh.f32 %v2431_v39  ;;  %v2420_v25 = vmul.f32 %v2416_v41, %v2411_v37  ;;  %v2607_v41 = vld [vmem:[#allocation2 + $0x300] sm:$0xff] }
0x1173   :  { %v2442_v43 = vmul.f32 0.5, %v2438_v42  ;;  %v2606_v42 = vld [vmem:[#allocation2 + $0x2f8] sm:$0xff]  ;;  %2637 = vmatpush.msrb.mxu1 %v2607_v41 }
0x1174   :  { %v2424_v26 = vmul.f32 0.044715, %v2420_v25 }
0x1175   :  { %v2446_v44 = vmul.f32 %v2442_v43, %v2405_v60  ;;  %2638 = vmatpush.msrb.mxu1 %v2606_v42 }
0x1176   :  { %v2428_v45 = vadd.f32 %v2424_v26, %v2411_v37  ;;  %v2605_v26 = vld [vmem:[#allocation2 + $0x2f0] sm:$0xff] }
0x1177   :  { %2819 = vmatmul.msk.f32.gmra.mxu0 %vm82_vm0, %v2446_v44  ;;  %2639 = vmatpush.msrb.mxu1 %v2605_v26 }
0x1178   :  { %v2983_v22 = vpop.eup %2982  ;;  %v2432_v5 = vmul.f32 0.7978846, %v2428_v45 }
0x1179   :  { %v2439_v0 = vadd.f32 1.0, %v2983_v22  ;;  %v2604_v22 = vld [vmem:[#allocation2 + $0x2e8] sm:$0xff] }
0x117a   :  { %2984 = vtanh.f32 %v2432_v5  ;;  %2640 = vmatpush.msrb.mxu1 %v2604_v22 }
0x117b   :  { %v2443_v11 = vmul.f32 0.5, %v2439_v0 }
0x117d   :  { %v2447_v19 = vmul.f32 %v2443_v11, %v2408_v30 }
0x117f   :  { %2820 = vmatmul.msk.f32.gmra.mxu0 %vm82_vm0, %v2447_v19 }
0x1180   :  { %v2985_v46 = vpop.eup %2984 }
0x1181   :  { %v2440_v47 = vadd.f32 1.0, %v2985_v46 }
0x1183   :  { %v2444_v10 = vmul.f32 0.5, %v2440_v47 }
0x1185   :  { %v2448_v20 = vmul.f32 %v2444_v10, %v2411_v37 }
0x1187   :  { %2821 = vmatmul.msk.f32.gmra.mxu0 %vm82_vm0, %v2448_v20 }
0x11ec   :  { %v2488_v29 = vpop.f32.mrf.mxu0 }
0x11ed   :  { %v2489_v53 = vadd.f32 %v2868_v48, %v2488_v29 }
0x11ef   :  { %v2500_v63 = vadd.f32 %v2489_v53, %v3585_v40 }
0x11f1   :  { %v2506_v54 = vsel %vm176_vm5, %v2500_v63, 0.0 }
0x11f2   :  { %2507 = vadd.xlane.f32.xlu1 %v2506_v54 }
0x11f4   :  { %v2491_v55 = vpop.f32.mrf.mxu0 }
0x11f5   :  { %v2492_v28 = vadd.f32 %v2868_v48, %v2491_v55 }
0x11f7   :  { %v2501_v17 = vadd.f32 %v2492_v28, %v3590_v61 }
0x11f9   :  { %v2509_v58 = vsel %vm176_vm5, %v2501_v17, 0.0 }
0x11fa   :  { %2510 = vadd.xlane.f32.xlu2 %v2509_v58 }
0x11fc   :  { %v2494_v59 = vpop.f32.mrf.mxu0 }
0x11fd   :  { %v2495_v62 = vadd.f32 %v2868_v48, %v2494_v59 }
0x11ff   :  { %v2502_v1 = vadd.f32 %v2495_v62, %v3595_v23 }
0x1201   :  { %v2512_v2 = vsel %vm176_vm5, %v2502_v1, 0.0 }
0x1202   :  { %2513 = vadd.xlane.f32.xlu0 %v2512_v2 }
0x1204   :  { %v2497_v57 = vpop.f32.mrf.mxu0 }
0x1205   :  { %v2498_v4 = vadd.f32 %v2868_v48, %v2497_v57 }
0x1207   :  { %v2503_v40 = vadd.f32 %v2498_v4, %v3600_v34  ;;  %v2869_v4 = vld [vmem:[%s3679_s4 + $0x16] ss:$0 sm:$0xff] }
0x1209   :  { %v2515_v6 = vsel %vm176_vm5, %v2503_v40, 0.0 }
0x120a   :  { %2516 = vadd.xlane.f32.xlu2 %v2515_v6 }
0x1265   :  { %v2508_v56 = vpop.xlane.xlu1 %2507 }
0x1266   :  { %v2518_v61 = vmul.f32 %v2508_v56, %v3093_v8 }
0x1268   :  { %v3623_v49 = vsub.f32 %v2500_v63, %v2518_v61 }
0x126a   :  { %v2526_v7 = vmul.f32 %v3623_v49, %v3623_v49 }
0x126c   :  { %v2530_v23 = vsel %vm176_vm5, %v2526_v7, 0.0 }
0x126d   :  { %v2511_v9 = vpop.xlane.xlu2 %2510  ;;  %2531 = vadd.xlane.f32.xlu2 %v2530_v23 }
0x126e   :  { %v2519_v12 = vmul.f32 %v2511_v9, %v3093_v8  ;;  %v2870_v9 = vld [vmem:[%s3679_s4 + $0x1b] ss:$0 sm:$0xff] }
0x1270   :  { %v3629_v50 = vsub.f32 %v2501_v17, %v2519_v12 }
0x1272   :  { %v2527_v34 = vmul.f32 %v3629_v50, %v3629_v50 }
0x1274   :  { %v2533_v60 = vsel %vm176_vm5, %v2527_v34, 0.0 }
0x1275   :  { %2534 = vadd.xlane.f32.xlu0 %v2533_v60  ;;  %v2514_v13 = vpop.xlane.xlu0 %2513 }
0x1276   :  { %v2520_v14 = vmul.f32 %v2514_v13, %v3093_v8 }
0x1278   :  { %v3635_v3 = vsub.f32 %v2502_v1, %v2520_v14 }
0x127a   :  { %v2528_v15 = vmul.f32 %v3635_v3, %v3635_v3 }
0x127c   :  { %v2536_v51 = vsel %vm176_vm5, %v2528_v15, 0.0 }
0x127d   :  { %v2517_v16 = vpop.xlane.xlu2 %2516  ;;  %2537 = vadd.xlane.f32.xlu1 %v2536_v51 }
0x127e   :  { %v2521_v30 = vmul.f32 %v2517_v16, %v3093_v8 }
0x1280   :  { %v3641_v21 = vsub.f32 %v2503_v40, %v2521_v30 }
0x1282   :  { %v2529_v52 = vmul.f32 %v3641_v21, %v3641_v21 }
0x1284   :  { %v2539_v32 = vsel %vm176_vm5, %v2529_v52, 0.0 }
0x1285   :  { %2540 = vadd.xlane.f32.xlu0 %v2539_v32 }
0x1296   :  { %2650 = vperm.xlu1 %2840, %v2647_v24  }
0x12e0   :  { %v2532_v31 = vpop.xlane.xlu2 %2531 }
0x12e1   :  { %v2542_v18 = vmul.f32 %v2532_v31, %v3093_v8 }
0x12e3   :  { %v2546_v33 = vadd.f32 1e-12, %v2542_v18  ;;  %v2871_v18 = vld [vmem:[%s3679_s4 + $0x1c] ss:$0 sm:$0xff] }
0x12e5   :  { %2986 = vrsqrt.f32 %v2546_v33  ;;  %vm2556_vm9 = vweird.f32 %v2546_v33 }
0x12e8   :  { %v2535_v27 = vpop.xlane.xlu0 %2534 }
0x12e9   :  { %v2543_v35 = vmul.f32 %v2535_v27, %v3093_v8 }
0x12eb   :  { %v2547_v36 = vadd.f32 1e-12, %v2543_v35  ;;  %v2987_v38 = vpop.eup %2986  ;;  %v2646_v35 = vld [vmem:[%s3679_s4 + $0x1d] sm:$0x1] }
0x12ec   :  { %v2551_v44 = vmul.f32 %v2987_v38, %v2546_v33  ;;  %vm2557_vm6 = vweird.f32 %v2987_v38 }
0x12ed   :  { %2988 = vrsqrt.f32 %v2547_v36  ;;  %vm2566_vm2 = vweird.f32 %v2547_v36  ;;  %vm2558_vm10 = vmor %vm2556_vm9, %vm2557_vm6 }
0x12ee   :  { %v2552_v0 = vmul.f32 %v2987_v38, %v2551_v44 }
0x12f0   :  { %v2538_v37 = vpop.xlane.xlu1 %2537  ;;  %v2553_v48 = vmul.f32 0.5, %v2552_v0 }
0x12f1   :  { %v2544_v39 = vmul.f32 %v2538_v37, %v3093_v8 }
0x12f2   :  { %v2554_v54 = vsub.f32 1.5, %v2553_v48 }
0x12f3   :  { %v2989_v25 = vpop.eup %2988  ;;  %v2548_v43 = vadd.f32 1e-12, %v2544_v39 }
0x12f4   :  { %v2561_v45 = vmul.f32 %v2989_v25, %v2547_v36  ;;  %vm2567_vm0 = vweird.f32 %v2989_v25  ;;  %v2555_v59 = vmul.f32 %v2987_v38, %v2554_v54 }
0x12f5   :  { %2990 = vrsqrt.f32 %v2548_v43  ;;  %vm2568_vm3 = vmor %vm2566_vm2, %vm2567_vm0  ;;  %vm2576_vm7 = vweird.f32 %v2548_v43  ;;  %vm2679_vm0 = vcmask 24576  }
0x12f6   :  { %v2562_v5 = vmul.f32 %v2989_v25, %v2561_v45  ;;  %v2559_v6 = vsel %vm2558_vm10, %v2987_v38, %v2555_v59 }
0x12f7   :  { %v2590_v12 = vmul.f32 %v2559_v6, %v3623_v49 }
0x12f8   :  { %v2563_v11 = vmul.f32 0.5, %v2562_v5  ;;  %v2541_v19 = vpop.xlane.xlu0 %2540 }
0x12f9   :  { %v2545_v46 = vmul.f32 %v2541_v19, %v3093_v8  ;;  %v2595_v14 = vmul.f32 %v2869_v4, %v2590_v12 }
0x12fa   :  { %v2564_v47 = vsub.f32 1.5, %v2563_v11 }
0x12fb   :  { %v2991_v10 = vpop.eup %2990  ;;  %v2549_v20 = vadd.f32 1e-12, %v2545_v46  ;;  %v2600_v30 = vadd.f32 %v2870_v9, %v2595_v14 }
0x12fc   :  { %v2571_v29 = vmul.f32 %v2991_v10, %v2548_v43  ;;  %v2565_v53 = vmul.f32 %v2989_v25, %v2564_v47  ;;  %vm2577_vm4 = vweird.f32 %v2991_v10 }
0x12fd   :  { %2992 = vrsqrt.f32 %v2549_v20  ;;  %vm2578_vm8 = vmor %vm2576_vm7, %vm2577_vm4  ;;  %vm2586_vm12 = vweird.f32 %v2549_v20 }
0x12fe   :  { %v2572_v63 = vmul.f32 %v2991_v10, %v2571_v29  ;;  %v2569_v28 = vsel %vm2568_vm3, %v2989_v25, %v2565_v53 }
0x12ff   :  { %v2591_v1 = vmul.f32 %v2569_v28, %v3629_v50 }
0x1300   :  { %v2573_v55 = vmul.f32 0.5, %v2572_v63 }
0x1301   :  { %v2596_v61 = vmul.f32 %v2869_v4, %v2591_v1 }
0x1302   :  { %v2574_v17 = vsub.f32 1.5, %v2573_v55 }
0x1303   :  { %v2993_v58 = vpop.eup %2992  ;;  %v2601_v34 = vadd.f32 %v2870_v9, %v2596_v61 }
0x1304   :  { %v2575_v8 = vmul.f32 %v2991_v10, %v2574_v17  ;;  %v2581_v62 = vmul.f32 %v2993_v58, %v2549_v20  ;;  %vm2587_vm11 = vweird.f32 %v2993_v58 }
0x1305   :  { %vm2588_vm13 = vmor %vm2586_vm12, %vm2587_vm11  ;;  %v2614_v15 = vrot.slane %v2601_v34, 7 }
0x1306   :  { %v2579_v2 = vsel %vm2578_vm8, %v2991_v10, %v2575_v8  ;;  %v2582_v57 = vmul.f32 %v2993_v58, %v2581_v62 }
0x1307   :  { %v2592_v40 = vmul.f32 %v2579_v2, %v3635_v3  ;;  %v2616_v32 = vsel %vm2615_vm14, %v2614_v15, %v2600_v30 }
0x1308   :  { %v2583_v56 = vmul.f32 0.5, %v2582_v57  ;;  %v2651_v36 = vpop.permute.xlu1 %2650 }
0x1309   :  { %v2597_v7 = vmul.f32 %v2869_v4, %v2592_v40 }
0x130a   :  { %v2584_v23 = vsub.f32 1.5, %v2583_v56 }
0x130b   :  { %v2602_v60 = vadd.f32 %v2870_v9, %v2597_v7 }
0x130c   :  { %v2585_v50 = vmul.f32 %v2993_v58, %v2584_v23 }
0x130d   :  { %v2617_v16 = vrot.slane %v2602_v60, 6 }
0x130e   :  { %v2589_v13 = vsel %vm2588_vm13, %v2993_v58, %v2585_v50 }
0x130f   :  { %v2593_v3 = vmul.f32 %v2589_v13, %v3641_v21  ;;  %v2619_v49 = vsel %vm2618_vm15, %v2617_v16, %v2616_v32 }
0x1311   :  { %v2598_v51 = vmul.f32 %v2869_v4, %v2593_v3 }
0x1313   :  { %v2603_v52 = vadd.f32 %v2870_v9, %v2598_v51 }
0x1315   :  { %v2620_v24 = vrot.slane %v2603_v52, 5 }
0x1317   :  { %v2622_v31 = vsel %vm2621_vm1, %v2620_v24, %v2619_v49 }
0x1318   :  { %2822 = vmatmul.msk.f32.vlgmr.msrb.gmra.mxu1 %vm176_vm5, %v2622_v31 }
0x1395   :  { %v2642_v33 = vpop.f32.mrf.mxu1 }
0x1396   :  { %v2643_v21 = vadd.f32 %v2871_v18, %v2642_v33 }
0x1398   :  { %2994 = vtanh.f32 %v2643_v21 }
0x139e   :  { %v2995_v27 = vpop.eup %2994 }
0x139f   :  { %2823 = vmatpush.xpose.msk.msra.mxu1 %vm176_vm5, %v2995_v27 }
0x13a2   :  { %2824 = vmatmul.msk.f32.vlgmr.msra.gmra.mxu1 %vm176_vm5, %v2646_v35 }
0x141f   :  { %v2676_v37 = vpop.f32.mrf.mxu1 }
0x1420   :  { %v2677_v38 = vadd.f32 %v2676_v37, %v2651_v36 }
0x1422   :  { %2680 = vst.msk [vmem:[%s3680_s5] sm:$0x1] %vm2679_vm0, %v2677_v38 }
0x1423   :  { %2685 = vsyncpa [#allocation3], 1 }

</bundles_post_ra>
